<compile_context>
chip_gen: v7x
topology: tpu7x:2x2x1
jax: 0.10.0
libtpu: 0.0.40
codegen_flags: <defaults>
</compile_context>

<pallas_src>
import functools

import jax
import jax.numpy as jnp
from jax.experimental import pallas as pl
from jax.experimental.pallas import tpu as pltpu

EPS = 1e-5                      # nn.BatchNorm2d default eps
VMEM_LIMIT = 48 * 1024 * 1024   # above default scoped limits, below physical VMEM everywhere


def _mish(x):
    """Mish(x) = x * tanh(softplus(x)) = x * u / (u + 2),  u = e^x (e^x + 2).

    One EUP exp + one (approx) reciprocal instead of exp + log1p + tanh.
    The clamp is exact: for x >= 20, tanh(softplus(x)) == 1.0 in f32.
    """
    e = jnp.exp(jnp.minimum(x, 20.0))
    u = e * (e + 2.0)
    return x * u * pl.reciprocal(u + 2.0, approx=True)


# ---------------------------------------------------------------------------
# Kernels 1/2: 3x3 "same" conv (stride 1, no bias) on one image, optionally
# preceded by a fused affine-BN + Mish on the input, plus per-image channel
# statistics of the (pre-BN) conv output.
# ---------------------------------------------------------------------------
def _conv3x3_stats_kernel(x_ref, w_ref, scale_ref, shift_ref,   # inputs
                          y_ref, stats_ref,                     # outputs
                          shift_sc,                             # scratch
                          *, H, W, Cin, apply_act):
    """
    x_ref     : (1, H, W, Cin)    f32   input image (pre-BN conv1 output for conv2)
    w_ref     : (9, Cin, Cout)    bf16  conv taps, ordered dy-major / dx-minor
    scale_ref : (1, Cin)          f32   BN scale for the input (unused if not apply_act)
    shift_ref : (1, Cin)          f32   BN shift for the input (unused if not apply_act)
    y_ref     : (1, H*W, Cout)    f32   conv output (pre-BN)
    stats_ref : (1, 2, Cout)      f32   [sum, sum-of-squares] of y over this image
    shift_sc  : (3, H+2, W, Cin)  f32   dx-shifted, zero-haloed activation copies
    """
    a = x_ref[0]                                    # (H, W, Cin) f32
    if apply_act:
        # Mish(BN1(.)) fused into conv2's input path (BN kept in f32)
        a = _mish(a * scale_ref[...] + shift_ref[...])

    # --- stage the activation: zero only the halo, 3 shifted copies (not 9) ---
    zrow = jnp.zeros((3, 1, W, Cin), jnp.float32)
    shift_sc[:, 0:1, :, :] = zrow                   # top halo row (all shifts)
    shift_sc[:, H + 1:H + 2, :, :] = zrow           # bottom halo row
    zcol = jnp.zeros((H, 1, Cin), jnp.float32)
    shift_sc[0, 1:H + 1, 0:1, :] = zcol             # left halo column  (dx = 0)
    shift_sc[2, 1:H + 1, W - 1:W, :] = zcol         # right halo column (dx = 2)

    shift_sc[1, 1:H + 1, :, :] = a                  # dx = 1: unshifted
    # dx = 0 / dx = 2: one-column shifts derived from the staged copy
    shift_sc[0, 1:H + 1, 1:W, :] = shift_sc[1, 1:H + 1, 0:W - 1, :]
    shift_sc[2, 1:H + 1, 0:W - 1, :] = shift_sc[1, 1:H + 1, 1:W, :]

    # --- 9 taps -> 9 bf16 MXU matmuls, f32 accumulation ----------------------
    Cout = w_ref.shape[-1]
    acc = jnp.zeros((H * W, Cout), jnp.float32)
    for dy in range(3):
        for dx in range(3):
            # slab load along non-(sublane/lane) dims: no relayout copy
            xs = shift_sc[dx, dy:dy + H].reshape(H * W, Cin).astype(jnp.bfloat16)
            acc += jnp.dot(xs, w_ref[dy * 3 + dx],
                           preferred_element_type=jnp.float32)

    y_ref[0] = acc
    # per-image partial BN statistics; reduced across the batch outside the kernel
    stats_ref[0, 0:1, :] = jnp.sum(acc, axis=0, keepdims=True)
    stats_ref[0, 1:2, :] = jnp.sum(acc * acc, axis=0, keepdims=True)


# ---------------------------------------------------------------------------
# Kernel 3: BN2 (as per-channel affine) + residual add + Mish.
# ---------------------------------------------------------------------------
def _bn_add_mish_kernel(y_ref, x_ref, scale_ref, shift_ref, o_ref):
    """out = Mish(scale * y + shift + x);  y/x/o blocks are (1, H*W, C)."""
    o_ref[0] = _mish(y_ref[0] * scale_ref[...] + shift_ref[...] + x_ref[0])


# ---------------------------------------------------------------------------
# pallas_call builders
# ---------------------------------------------------------------------------
def _conv3x3_stats(x_nhwc, w_taps, scale, shift, *, apply_act):
    N, H, W, Cin = x_nhwc.shape
    Cout = w_taps.shape[-1]
    kernel = functools.partial(_conv3x3_stats_kernel,
                               H=H, W=W, Cin=Cin, apply_act=apply_act)
    return pl.pallas_call(
        kernel,
        grid=(N,),
        out_shape=(jax.ShapeDtypeStruct((N, H * W, Cout), jnp.float32),
                   jax.ShapeDtypeStruct((N, 2, Cout), jnp.float32)),
        in_specs=[
            pl.BlockSpec((1, H, W, Cin), lambda n: (n, 0, 0, 0)),
            pl.BlockSpec((9, Cin, Cout), lambda n: (0, 0, 0)),
            pl.BlockSpec((1, Cin), lambda n: (0, 0)),
            pl.BlockSpec((1, Cin), lambda n: (0, 0)),
        ],
        out_specs=(
            pl.BlockSpec((1, H * W, Cout), lambda n: (n, 0, 0)),
            pl.BlockSpec((1, 2, Cout), lambda n: (n, 0, 0)),
        ),
        scratch_shapes=[pltpu.VMEM((3, H + 2, W, Cin), jnp.float32)],
        compiler_params=pltpu.CompilerParams(
            dimension_semantics=("parallel",),
            vmem_limit_bytes=VMEM_LIMIT),
    )(x_nhwc, w_taps, scale, shift)


def _bn_add_mish(y, x, scale, shift):
    N, HW, C = y.shape
    return pl.pallas_call(
        _bn_add_mish_kernel,
        grid=(N,),
        out_shape=jax.ShapeDtypeStruct((N, HW, C), jnp.float32),
        in_specs=[
            pl.BlockSpec((1, HW, C), lambda n: (n, 0, 0)),
            pl.BlockSpec((1, HW, C), lambda n: (n, 0, 0)),
            pl.BlockSpec((1, C), lambda n: (0, 0)),
            pl.BlockSpec((1, C), lambda n: (0, 0)),
        ],
        out_specs=pl.BlockSpec((1, HW, C), lambda n: (n, 0, 0)),
        compiler_params=pltpu.CompilerParams(
            dimension_semantics=("parallel",),
            vmem_limit_bytes=VMEM_LIMIT),
    )(y, x, scale, shift)


def _bn_scale_shift(stats, gamma, beta, count):
    """Training-mode BatchNorm2d as a per-channel affine: batch mean, biased variance."""
    s = jnp.sum(stats, axis=0)                           # (2, C): [sum, sumsq] over batch
    mean = s[0] / count
    var = jnp.maximum(s[1] / count - mean * mean, 0.0)   # biased (population) variance
    scale = gamma * jax.lax.rsqrt(var + EPS)
    shift = beta - mean * scale
    return scale.reshape(1, -1), shift.reshape(1, -1)


@jax.jit
def basic_block_forward(x_nchw, params):
    """BasicBlock forward.  NCHW in/out (PyTorch convention); NHWC inside kernels."""
    w1, g1, b1, w2, g2, b2 = params
    N, Cin, H, W = x_nchw.shape
    P = w1.shape[-1]
    assert Cin == P, "residual add requires inplanes == planes (no downsample)"

    x_nhwc = jnp.transpose(x_nchw, (0, 2, 3, 1)).astype(jnp.float32)   # (N, H, W, C)
    count = N * H * W

    # HWIO (3, 3, Cin, P) -> (9, Cin, P): tap index = dy * 3 + dx (matches kernel)
    w1_taps = w1.reshape(9, Cin, P).astype(jnp.bfloat16)
    w2_taps = w2.reshape(9, P, P).astype(jnp.bfloat16)

    one = jnp.ones((1, Cin), jnp.float32)
    zero = jnp.zeros((1, Cin), jnp.float32)

    # conv1 + BN1 partial stats
    y1, s1 = _conv3x3_stats(x_nhwc, w1_taps, one, zero, apply_act=False)
    sc1, sh1 = _bn_scale_shift(s1, g1, b1, count)
    # Mish(BN1(.)) fused into conv2's input path; conv2 + BN2 partial stats
    y2, s2 = _conv3x3_stats(y1.reshape(N, H, W, P), w2_taps, sc1, sh1, apply_act=True)
    sc2, sh2 = _bn_scale_shift(s2, g2, b2, count)
    # BN2 + residual + Mish (residual reads the unpadded x in its native layout)
    out = _bn_add_mish(y2, x_nhwc.reshape(N, H * W, P), sc2, sh2)      # (N, H*W, P)

    return jnp.transpose(out.reshape(N, H, W, P), (0, 3, 1, 2))        # back to NCHW


# ---------------------------------------------------------------------------
# Plain-JAX reference (NCHW), mirrors the PyTorch module in training mode.
# ---------------------------------------------------------------------------
def _mish_ref(x):
    return x * jnp.tanh(jnp.logaddexp(x, 0.0))


def _ref_forward(x, params):
    w1, g1, b1, w2, g2, b2 = params

    def conv(y, w):
        w_oihw = jnp.transpose(w, (3, 2, 0, 1))
        return jax.lax.conv_general_dilated(
            y, w_oihw, (1, 1), ((1, 1), (1, 1)),
            dimension_numbers=("NCHW", "OIHW", "NCHW"))

    def bn(y, g, b):
        mean = jnp.mean(y, axis=(0, 2, 3), keepdims=True)
        var = jnp.mean((y - mean) ** 2, axis=(0, 2, 3), keepdims=True)
        return ((y - mean) * jax.lax.rsqrt(var + EPS)
                * g.reshape(1, -1, 1, 1) + b.reshape(1, -1, 1, 1))

    out = _mish_ref(bn(conv(x, w1), g1, b1))
    out = bn(conv(out, w2), g2, b2)
    return _mish_ref(out + x)


if __name__ == "__main__":
    N, C, H, W = 2, 4, 16, 16   # inplanes = planes = 4 (BasicBlock default config)
    P = C

    key = jax.random.PRNGKey(0)
    ks = jax.random.split(key, 7)
    x = jax.random.normal(ks[0], (N, C, H, W), jnp.float32)
    # conv weights in HWIO; BN affine params (gamma near 1, beta near 0)
    w1 = 0.1 * jax.random.normal(ks[1], (3, 3, C, P), jnp.float32)
    w2 = 0.1 * jax.random.normal(ks[2], (3, 3, P, P), jnp.float32)
    g1 = 1.0 + 0.1 * jax.random.normal(ks[3], (P,), jnp.float32)
    b1 = 0.1 * jax.random.normal(ks[4], (P,), jnp.float32)
    g2 = 1.0 + 0.1 * jax.random.normal(ks[5], (P,), jnp.float32)
    b2 = 0.1 * jax.random.normal(ks[6], (P,), jnp.float32)
    params = (w1, g1, b1, w2, g2, b2)

    out = jax.block_until_ready(basic_block_forward(x, params))
    ref = jax.block_until_ready(_ref_forward(x, params))

    assert out.shape == (N, P, H, W), out.shape
    # bf16 MXU operands (f32 accumulation) vs a pure-f32 reference -> loose-ish tolerance
    err_max = float(jnp.max(jnp.abs(out - ref)))
    err_mean = float(jnp.mean(jnp.abs(out - ref)))
    assert err_max < 8e-2 and err_mean < 1.5e-2, (err_max, err_mean)
    print("KERNEL_OK")
</pallas_src>

<mosaic_0001>
module attributes {stable_mosaic.version = 11 : i64} {
  func.func @_bn_add_mish_kernel(%arg0: i32, %arg1: memref<1x256x4xf32, #tpu.memory_space<vmem>>, %arg2: memref<1x256x4xf32, #tpu.memory_space<vmem>>, %arg3: memref<1x4xf32, #tpu.memory_space<vmem>>, %arg4: memref<1x4xf32, #tpu.memory_space<vmem>>, %arg5: memref<1x256x4xf32, #tpu.memory_space<vmem>>) attributes {dimension_semantics = [#tpu.dimension_semantics<parallel>], iteration_bounds = array<i64: 2>, scalar_prefetch = 0 : i64, scratch_operands = 0 : i64, tpu.core_type = #tpu.core_type<tc>, window_params = [{transform_indices = @transform_0, window_bounds = array<i64: 1, 256, 4>}, {transform_indices = @transform_1, window_bounds = array<i64: 1, 256, 4>}, {pipeline_mode = #tpu.pipeline_mode<synchronous>, transform_indices = @transform_2, window_bounds = array<i64: 1, 4>}, {pipeline_mode = #tpu.pipeline_mode<synchronous>, transform_indices = @transform_3, window_bounds = array<i64: 1, 4>}, {transform_indices = @transform_4, window_bounds = array<i64: 1, 256, 4>}]} {
    %c0 = arith.constant 0 : index
    %c0_0 = arith.constant 0 : index
    %c0_1 = arith.constant 0 : index
    %0 = vector.load %arg1[%c0, %c0_0, %c0_1] : memref<1x256x4xf32, #tpu.memory_space<vmem>>, vector<1x256x4xf32>
    %1 = vector.shape_cast %0 : vector<1x256x4xf32> to vector<256x4xf32>
    %c0_2 = arith.constant 0 : index
    %c0_3 = arith.constant 0 : index
    %2 = vector.load %arg3[%c0_2, %c0_3] : memref<1x4xf32, #tpu.memory_space<vmem>>, vector<1x4xf32>
    %3 = vector.broadcast %2 : vector<1x4xf32> to vector<256x4xf32>
    %4 = arith.mulf %1, %3 : vector<256x4xf32>
    %c0_4 = arith.constant 0 : index
    %c0_5 = arith.constant 0 : index
    %5 = vector.load %arg4[%c0_4, %c0_5] : memref<1x4xf32, #tpu.memory_space<vmem>>, vector<1x4xf32>
    %6 = vector.broadcast %5 : vector<1x4xf32> to vector<256x4xf32>
    %7 = arith.addf %4, %6 : vector<256x4xf32>
    %c0_6 = arith.constant 0 : index
    %c0_7 = arith.constant 0 : index
    %c0_8 = arith.constant 0 : index
    %8 = vector.load %arg2[%c0_6, %c0_7, %c0_8] : memref<1x256x4xf32, #tpu.memory_space<vmem>>, vector<1x256x4xf32>
    %9 = vector.shape_cast %8 : vector<1x256x4xf32> to vector<256x4xf32>
    %10 = arith.addf %7, %9 : vector<256x4xf32>
    %cst = arith.constant 2.000000e+01 : f32
    %11 = vector.broadcast %cst : f32 to vector<256x4xf32>
    %12 = arith.minimumf %10, %11 : vector<256x4xf32>
    %13 = math.exp %12 : vector<256x4xf32>
    %cst_9 = arith.constant 2.000000e+00 : f32
    %14 = vector.broadcast %cst_9 : f32 to vector<256x4xf32>
    %15 = arith.addf %13, %14 : vector<256x4xf32>
    %16 = arith.mulf %13, %15 : vector<256x4xf32>
    %17 = arith.mulf %10, %16 : vector<256x4xf32>
    %cst_10 = arith.constant 2.000000e+00 : f32
    %18 = vector.broadcast %cst_10 : f32 to vector<256x4xf32>
    %19 = arith.addf %16, %18 : vector<256x4xf32>
    %20 = tpu.reciprocal %19 {approx = true} : vector<256x4xf32> -> vector<256x4xf32>
    %21 = arith.mulf %17, %20 : vector<256x4xf32>
    %c0_11 = arith.constant 0 : index
    %c0_12 = arith.constant 0 : index
    %c0_13 = arith.constant 0 : index
    %22 = vector.load %arg5[%c0_11, %c0_12, %c0_13] : memref<1x256x4xf32, #tpu.memory_space<vmem>>, vector<1x256x4xf32>
    %23 = vector.shape_cast %22 : vector<1x256x4xf32> to vector<256x4xf32>
    %24 = vector.shape_cast %21 : vector<256x4xf32> to vector<1x256x4xf32>
    tpu.vector_store %arg5[%c0_11, %c0_12, %c0_13], %24 {strides = array<i32>} : memref<1x256x4xf32, #tpu.memory_space<vmem>>, vector<1x256x4xf32>,
    return
  }
  func.func @transform_0(%arg0: i32) -> (i32, i32, i32) {
    %c0_i32 = arith.constant 0 : i32
    %c0_i32_0 = arith.constant 0 : i32
    %c0_i32_1 = arith.constant 0 : i32
    return %arg0, %c0_i32, %c0_i32_0 : i32, i32, i32
  }
  func.func @transform_1(%arg0: i32) -> (i32, i32, i32) {
    %c0_i32 = arith.constant 0 : i32
    %c0_i32_0 = arith.constant 0 : i32
    %c0_i32_1 = arith.constant 0 : i32
    return %arg0, %c0_i32, %c0_i32_0 : i32, i32, i32
  }
  func.func @transform_2(%arg0: i32) -> (i32, i32) {
    %c0_i32 = arith.constant 0 : i32
    %c0_i32_0 = arith.constant 0 : i32
    %c0_i32_1 = arith.constant 0 : i32
    return %c0_i32, %c0_i32_0 : i32, i32
  }
  func.func @transform_3(%arg0: i32) -> (i32, i32) {
    %c0_i32 = arith.constant 0 : i32
    %c0_i32_0 = arith.constant 0 : i32
    %c0_i32_1 = arith.constant 0 : i32
    return %c0_i32, %c0_i32_0 : i32, i32
  }
  func.func @transform_4(%arg0: i32) -> (i32, i32, i32) {
    %c0_i32 = arith.constant 0 : i32
    %c0_i32_0 = arith.constant 0 : i32
    %c0_i32_1 = arith.constant 0 : i32
    return %arg0, %c0_i32, %c0_i32_0 : i32, i32, i32
  }
}

module attributes {stable_mosaic.version = 11 : i64} {
  func.func @_conv3x3_stats_kernel(%arg0: i32, %arg1: memref<1x16x16x4xf32, #tpu.memory_space<vmem>>, %arg2: memref<9x4x4xbf16, #tpu.memory_space<vmem>>, %arg3: memref<1x4xf32, #tpu.memory_space<vmem>>, %arg4: memref<1x4xf32, #tpu.memory_space<vmem>>, %arg5: memref<1x256x4xf32, #tpu.memory_space<vmem>>, %arg6: memref<1x2x4xf32, #tpu.memory_space<vmem>>, %arg7: memref<3x18x16x4xf32, #tpu.memory_space<vmem>>) attributes {dimension_semantics = [#tpu.dimension_semantics<parallel>], iteration_bounds = array<i64: 2>, scalar_prefetch = 0 : i64, scratch_operands = 1 : i64, tpu.core_type = #tpu.core_type<tc>, window_params = [{transform_indices = @transform_0, window_bounds = array<i64: 1, 16, 16, 4>}, {pipeline_mode = #tpu.pipeline_mode<synchronous>, transform_indices = @transform_1, window_bounds = array<i64: 9, 4, 4>}, {pipeline_mode = #tpu.pipeline_mode<synchronous>, transform_indices = @transform_2, window_bounds = array<i64: 1, 4>}, {pipeline_mode = #tpu.pipeline_mode<synchronous>, transform_indices = @transform_3, window_bounds = array<i64: 1, 4>}, {transform_indices = @transform_4, window_bounds = array<i64: 1, 256, 4>}, {transform_indices = @transform_5, window_bounds = array<i64: 1, 2, 4>}]} {
    %c0 = arith.constant 0 : index
    %c0_0 = arith.constant 0 : index
    %c0_1 = arith.constant 0 : index
    %c0_2 = arith.constant 0 : index
    %0 = vector.load %arg1[%c0, %c0_0, %c0_1, %c0_2] : memref<1x16x16x4xf32, #tpu.memory_space<vmem>>, vector<1x16x16x4xf32>
    %1 = vector.shape_cast %0 : vector<1x16x16x4xf32> to vector<16x16x4xf32>
    %cst = arith.constant 0.000000e+00 : f32
    %2 = vector.broadcast %cst : f32 to vector<3x1x16x4xf32>
    %c0_3 = arith.constant 0 : index
    %c0_4 = arith.constant 0 : index
    %c0_5 = arith.constant 0 : index
    %c0_6 = arith.constant 0 : index
    %3 = vector.load %arg7[%c0_3, %c0_4, %c0_5, %c0_6] : memref<3x18x16x4xf32, #tpu.memory_space<vmem>>, vector<3x1x16x4xf32>
    tpu.vector_store %arg7[%c0_3, %c0_4, %c0_5, %c0_6], %2 {strides = array<i32>} : memref<3x18x16x4xf32, #tpu.memory_space<vmem>>, vector<3x1x16x4xf32>,
    %c0_7 = arith.constant 0 : index
    %c17 = arith.constant 17 : index
    %c0_8 = arith.constant 0 : index
    %c0_9 = arith.constant 0 : index
    %4 = vector.load %arg7[%c0_7, %c17, %c0_8, %c0_9] : memref<3x18x16x4xf32, #tpu.memory_space<vmem>>, vector<3x1x16x4xf32>
    tpu.vector_store %arg7[%c0_7, %c17, %c0_8, %c0_9], %2 {strides = array<i32>} : memref<3x18x16x4xf32, #tpu.memory_space<vmem>>, vector<3x1x16x4xf32>,
    %cst_10 = arith.constant 0.000000e+00 : f32
    %5 = vector.broadcast %cst_10 : f32 to vector<16x1x4xf32>
    %c0_11 = arith.constant 0 : index
    %c1 = arith.constant 1 : index
    %c0_12 = arith.constant 0 : index
    %c0_13 = arith.constant 0 : index
    %6 = vector.load %arg7[%c0_11, %c1, %c0_12, %c0_13] : memref<3x18x16x4xf32, #tpu.memory_space<vmem>>, vector<1x16x1x4xf32>
    %7 = vector.shape_cast %6 : vector<1x16x1x4xf32> to vector<16x1x4xf32>
    %8 = vector.shape_cast %5 : vector<16x1x4xf32> to vector<1x16x1x4xf32>
    tpu.vector_store %arg7[%c0_11, %c1, %c0_12, %c0_13], %8 {strides = array<i32>} : memref<3x18x16x4xf32, #tpu.memory_space<vmem>>, vector<1x16x1x4xf32>,
    %c2 = arith.constant 2 : index
    %c1_14 = arith.constant 1 : index
    %c15 = arith.constant 15 : index
    %c0_15 = arith.constant 0 : index
    %9 = vector.load %arg7[%c2, %c1_14, %c15, %c0_15] : memref<3x18x16x4xf32, #tpu.memory_space<vmem>>, vector<1x16x1x4xf32>
    %10 = vector.shape_cast %9 : vector<1x16x1x4xf32> to vector<16x1x4xf32>
    %11 = vector.shape_cast %5 : vector<16x1x4xf32> to vector<1x16x1x4xf32>
    tpu.vector_store %arg7[%c2, %c1_14, %c15, %c0_15], %11 {strides = array<i32>} : memref<3x18x16x4xf32, #tpu.memory_space<vmem>>, vector<1x16x1x4xf32>,
    %c1_16 = arith.constant 1 : index
    %c1_17 = arith.constant 1 : index
    %c0_18 = arith.constant 0 : index
    %c0_19 = arith.constant 0 : index
    %12 = vector.load %arg7[%c1_16, %c1_17, %c0_18, %c0_19] : memref<3x18x16x4xf32, #tpu.memory_space<vmem>>, vector<1x16x16x4xf32>
    %13 = vector.shape_cast %12 : vector<1x16x16x4xf32> to vector<16x16x4xf32>
    %14 = vector.shape_cast %1 : vector<16x16x4xf32> to vector<1x16x16x4xf32>
    tpu.vector_store %arg7[%c1_16, %c1_17, %c0_18, %c0_19], %14 {strides = array<i32>} : memref<3x18x16x4xf32, #tpu.memory_space<vmem>>, vector<1x16x16x4xf32>,
    %c1_20 = arith.constant 1 : index
    %c1_21 = arith.constant 1 : index
    %c0_22 = arith.constant 0 : index
    %c0_23 = arith.constant 0 : index
    %15 = vector.load %arg7[%c1_20, %c1_21, %c0_22, %c0_23] : memref<3x18x16x4xf32, #tpu.memory_space<vmem>>, vector<1x16x15x4xf32>
    %16 = vector.shape_cast %15 : vector<1x16x15x4xf32> to vector<16x15x4xf32>
    %c0_24 = arith.constant 0 : index
    %c1_25 = arith.constant 1 : index
    %c1_26 = arith.constant 1 : index
    %c0_27 = arith.constant 0 : index
    %17 = vector.load %arg7[%c0_24, %c1_25, %c1_26, %c0_27] : memref<3x18x16x4xf32, #tpu.memory_space<vmem>>, vector<1x16x15x4xf32>
    %18 = vector.shape_cast %17 : vector<1x16x15x4xf32> to vector<16x15x4xf32>
    %19 = vector.shape_cast %16 : vector<16x15x4xf32> to vector<1x16x15x4xf32>
    tpu.vector_store %arg7[%c0_24, %c1_25, %c1_26, %c0_27], %19 {strides = array<i32>} : memref<3x18x16x4xf32, #tpu.memory_space<vmem>>, vector<1x16x15x4xf32>,
    %c1_28 = arith.constant 1 : index
    %c1_29 = arith.constant 1 : index
    %c1_30 = arith.constant 1 : index
    %c0_31 = arith.constant 0 : index
    %20 = vector.load %arg7[%c1_28, %c1_29, %c1_30, %c0_31] : memref<3x18x16x4xf32, #tpu.memory_space<vmem>>, vector<1x16x15x4xf32>
    %21 = vector.shape_cast %20 : vector<1x16x15x4xf32> to vector<16x15x4xf32>
    %c2_32 = arith.constant 2 : index
    %c1_33 = arith.constant 1 : index
    %c0_34 = arith.constant 0 : index
    %c0_35 = arith.constant 0 : index
    %22 = vector.load %arg7[%c2_32, %c1_33, %c0_34, %c0_35] : memref<3x18x16x4xf32, #tpu.memory_space<vmem>>, vector<1x16x15x4xf32>
    %23 = vector.shape_cast %22 : vector<1x16x15x4xf32> to vector<16x15x4xf32>
    %24 = vector.shape_cast %21 : vector<16x15x4xf32> to vector<1x16x15x4xf32>
    tpu.vector_store %arg7[%c2_32, %c1_33, %c0_34, %c0_35], %24 {strides = array<i32>} : memref<3x18x16x4xf32, #tpu.memory_space<vmem>>, vector<1x16x15x4xf32>,
    %cst_36 = arith.constant 0.000000e+00 : f32
    %25 = vector.broadcast %cst_36 : f32 to vector<256x4xf32>
    %c0_37 = arith.constant 0 : index
    %c0_38 = arith.constant 0 : index
    %c0_39 = arith.constant 0 : index
    %c0_40 = arith.constant 0 : index
    %26 = vector.load %arg7[%c0_37, %c0_38, %c0_39, %c0_40] : memref<3x18x16x4xf32, #tpu.memory_space<vmem>>, vector<1x16x16x4xf32>
    %27 = vector.shape_cast %26 : vector<1x16x16x4xf32> to vector<16x16x4xf32>
    %28 = vector.shape_cast %27 : vector<16x16x4xf32> to vector<256x4xf32>
    %29 = arith.truncf %28 : vector<256x4xf32> to vector<256x4xbf16>
    %c0_41 = arith.constant 0 : index
    %c0_42 = arith.constant 0 : index
    %c0_43 = arith.constant 0 : index
    %30 = vector.load %arg2[%c0_41, %c0_42, %c0_43] : memref<9x4x4xbf16, #tpu.memory_space<vmem>>, vector<1x4x4xbf16>
    %31 = vector.shape_cast %30 : vector<1x4x4xbf16> to vector<4x4xbf16>
    %cst_44 = arith.constant dense<0.000000e+00> : vector<256x4xf32>
    %32 = tpu.matmul %29, %31, %cst_44 {dimension_numbers = #tpu.dot_dimension_numbers<[1], [0], [0], [1], [0, 0, 1, 1], [], []>} : vector<256x4xbf16>, vector<4x4xbf16>, vector<256x4xf32> -> vector<256x4xf32>
    %33 = arith.addf %25, %32 : vector<256x4xf32>
    %c1_45 = arith.constant 1 : index
    %c0_46 = arith.constant 0 : index
    %c0_47 = arith.constant 0 : index
    %c0_48 = arith.constant 0 : index
    %34 = vector.load %arg7[%c1_45, %c0_46, %c0_47, %c0_48] : memref<3x18x16x4xf32, #tpu.memory_space<vmem>>, vector<1x16x16x4xf32>
    %35 = vector.shape_cast %34 : vector<1x16x16x4xf32> to vector<16x16x4xf32>
    %36 = vector.shape_cast %35 : vector<16x16x4xf32> to vector<256x4xf32>
    %37 = arith.truncf %36 : vector<256x4xf32> to vector<256x4xbf16>
    %c1_49 = arith.constant 1 : index
    %c0_50 = arith.constant 0 : index
    %c0_51 = arith.constant 0 : index
    %38 = vector.load %arg2[%c1_49, %c0_50, %c0_51] : memref<9x4x4xbf16, #tpu.memory_space<vmem>>, vector<1x4x4xbf16>
    %39 = vector.shape_cast %38 : vector<1x4x4xbf16> to vector<4x4xbf16>
    %cst_52 = arith.constant dense<0.000000e+00> : vector<256x4xf32>
    %40 = tpu.matmul %37, %39, %cst_52 {dimension_numbers = #tpu.dot_dimension_numbers<[1], [0], [0], [1], [0, 0, 1, 1], [], []>} : vector<256x4xbf16>, vector<4x4xbf16>, vector<256x4xf32> -> vector<256x4xf32>
    %41 = arith.addf %33, %40 : vector<256x4xf32>
    %c2_53 = arith.constant 2 : index
    %c0_54 = arith.constant 0 : index
    %c0_55 = arith.constant 0 : index
    %c0_56 = arith.constant 0 : index
    %42 = vector.load %arg7[%c2_53, %c0_54, %c0_55, %c0_56] : memref<3x18x16x4xf32, #tpu.memory_space<vmem>>, vector<1x16x16x4xf32>
    %43 = vector.shape_cast %42 : vector<1x16x16x4xf32> to vector<16x16x4xf32>
    %44 = vector.shape_cast %43 : vector<16x16x4xf32> to vector<256x4xf32>
    %45 = arith.truncf %44 : vector<256x4xf32> to vector<256x4xbf16>
    %c2_57 = arith.constant 2 : index
    %c0_58 = arith.constant 0 : index
    %c0_59 = arith.constant 0 : index
    %46 = vector.load %arg2[%c2_57, %c0_58, %c0_59] : memref<9x4x4xbf16, #tpu.memory_space<vmem>>, vector<1x4x4xbf16>
    %47 = vector.shape_cast %46 : vector<1x4x4xbf16> to vector<4x4xbf16>
    %cst_60 = arith.constant dense<0.000000e+00> : vector<256x4xf32>
    %48 = tpu.matmul %45, %47, %cst_60 {dimension_numbers = #tpu.dot_dimension_numbers<[1], [0], [0], [1], [0, 0, 1, 1], [], []>} : vector<256x4xbf16>, vector<4x4xbf16>, vector<256x4xf32> -> vector<256x4xf32>
    %49 = arith.addf %41, %48 : vector<256x4xf32>
    %c0_61 = arith.constant 0 : index
    %c1_62 = arith.constant 1 : index
    %c0_63 = arith.constant 0 : index
    %c0_64 = arith.constant 0 : index
    %50 = vector.load %arg7[%c0_61, %c1_62, %c0_63, %c0_64] : memref<3x18x16x4xf32, #tpu.memory_space<vmem>>, vector<1x16x16x4xf32>
    %51 = vector.shape_cast %50 : vector<1x16x16x4xf32> to vector<16x16x4xf32>
    %52 = vector.shape_cast %51 : vector<16x16x4xf32> to vector<256x4xf32>
    %53 = arith.truncf %52 : vector<256x4xf32> to vector<256x4xbf16>
    %c3 = arith.constant 3 : index
    %c0_65 = arith.constant 0 : index
    %c0_66 = arith.constant 0 : index
    %54 = vector.load %arg2[%c3, %c0_65, %c0_66] : memref<9x4x4xbf16, #tpu.memory_space<vmem>>, vector<1x4x4xbf16>
    %55 = vector.shape_cast %54 : vector<1x4x4xbf16> to vector<4x4xbf16>
    %cst_67 = arith.constant dense<0.000000e+00> : vector<256x4xf32>
    %56 = tpu.matmul %53, %55, %cst_67 {dimension_numbers = #tpu.dot_dimension_numbers<[1], [0], [0], [1], [0, 0, 1, 1], [], []>} : vector<256x4xbf16>, vector<4x4xbf16>, vector<256x4xf32> -> vector<256x4xf32>
    %57 = arith.addf %49, %56 : vector<256x4xf32>
    %c1_68 = arith.constant 1 : index
    %c1_69 = arith.constant 1 : index
    %c0_70 = arith.constant 0 : index
    %c0_71 = arith.constant 0 : index
    %58 = vector.load %arg7[%c1_68, %c1_69, %c0_70, %c0_71] : memref<3x18x16x4xf32, #tpu.memory_space<vmem>>, vector<1x16x16x4xf32>
    %59 = vector.shape_cast %58 : vector<1x16x16x4xf32> to vector<16x16x4xf32>
    %60 = vector.shape_cast %59 : vector<16x16x4xf32> to vector<256x4xf32>
    %61 = arith.truncf %60 : vector<256x4xf32> to vector<256x4xbf16>
    %c4 = arith.constant 4 : index
    %c0_72 = arith.constant 0 : index
    %c0_73 = arith.constant 0 : index
    %62 = vector.load %arg2[%c4, %c0_72, %c0_73] : memref<9x4x4xbf16, #tpu.memory_space<vmem>>, vector<1x4x4xbf16>
    %63 = vector.shape_cast %62 : vector<1x4x4xbf16> to vector<4x4xbf16>
    %cst_74 = arith.constant dense<0.000000e+00> : vector<256x4xf32>
    %64 = tpu.matmul %61, %63, %cst_74 {dimension_numbers = #tpu.dot_dimension_numbers<[1], [0], [0], [1], [0, 0, 1, 1], [], []>} : vector<256x4xbf16>, vector<4x4xbf16>, vector<256x4xf32> -> vector<256x4xf32>
    %65 = arith.addf %57, %64 : vector<256x4xf32>
    %c2_75 = arith.constant 2 : index
    %c1_76 = arith.constant 1 : index
    %c0_77 = arith.constant 0 : index
    %c0_78 = arith.constant 0 : index
    %66 = vector.load %arg7[%c2_75, %c1_76, %c0_77, %c0_78] : memref<3x18x16x4xf32, #tpu.memory_space<vmem>>, vector<1x16x16x4xf32>
    %67 = vector.shape_cast %66 : vector<1x16x16x4xf32> to vector<16x16x4xf32>
    %68 = vector.shape_cast %67 : vector<16x16x4xf32> to vector<256x4xf32>
    %69 = arith.truncf %68 : vector<256x4xf32> to vector<256x4xbf16>
    %c5 = arith.constant 5 : index
    %c0_79 = arith.constant 0 : index
    %c0_80 = arith.constant 0 : index
    %70 = vector.load %arg2[%c5, %c0_79, %c0_80] : memref<9x4x4xbf16, #tpu.memory_space<vmem>>, vector<1x4x4xbf16>
    %71 = vector.shape_cast %70 : vector<1x4x4xbf16> to vector<4x4xbf16>
    %cst_81 = arith.constant dense<0.000000e+00> : vector<256x4xf32>
    %72 = tpu.matmul %69, %71, %cst_81 {dimension_numbers = #tpu.dot_dimension_numbers<[1], [0], [0], [1], [0, 0, 1, 1], [], []>} : vector<256x4xbf16>, vector<4x4xbf16>, vector<256x4xf32> -> vector<256x4xf32>
    %73 = arith.addf %65, %72 : vector<256x4xf32>
    %c0_82 = arith.constant 0 : index
    %c2_83 = arith.constant 2 : index
    %c0_84 = arith.constant 0 : index
    %c0_85 = arith.constant 0 : index
    %74 = vector.load %arg7[%c0_82, %c2_83, %c0_84, %c0_85] : memref<3x18x16x4xf32, #tpu.memory_space<vmem>>, vector<1x16x16x4xf32>
    %75 = vector.shape_cast %74 : vector<1x16x16x4xf32> to vector<16x16x4xf32>
    %76 = vector.shape_cast %75 : vector<16x16x4xf32> to vector<256x4xf32>
    %77 = arith.truncf %76 : vector<256x4xf32> to vector<256x4xbf16>
    %c6 = arith.constant 6 : index
    %c0_86 = arith.constant 0 : index
    %c0_87 = arith.constant 0 : index
    %78 = vector.load %arg2[%c6, %c0_86, %c0_87] : memref<9x4x4xbf16, #tpu.memory_space<vmem>>, vector<1x4x4xbf16>
    %79 = vector.shape_cast %78 : vector<1x4x4xbf16> to vector<4x4xbf16>
    %cst_88 = arith.constant dense<0.000000e+00> : vector<256x4xf32>
    %80 = tpu.matmul %77, %79, %cst_88 {dimension_numbers = #tpu.dot_dimension_numbers<[1], [0], [0], [1], [0, 0, 1, 1], [], []>} : vector<256x4xbf16>, vector<4x4xbf16>, vector<256x4xf32> -> vector<256x4xf32>
    %81 = arith.addf %73, %80 : vector<256x4xf32>
    %c1_89 = arith.constant 1 : index
    %c2_90 = arith.constant 2 : index
    %c0_91 = arith.constant 0 : index
    %c0_92 = arith.constant 0 : index
    %82 = vector.load %arg7[%c1_89, %c2_90, %c0_91, %c0_92] : memref<3x18x16x4xf32, #tpu.memory_space<vmem>>, vector<1x16x16x4xf32>
    %83 = vector.shape_cast %82 : vector<1x16x16x4xf32> to vector<16x16x4xf32>
    %84 = vector.shape_cast %83 : vector<16x16x4xf32> to vector<256x4xf32>
    %85 = arith.truncf %84 : vector<256x4xf32> to vector<256x4xbf16>
    %c7 = arith.constant 7 : index
    %c0_93 = arith.constant 0 : index
    %c0_94 = arith.constant 0 : index
    %86 = vector.load %arg2[%c7, %c0_93, %c0_94] : memref<9x4x4xbf16, #tpu.memory_space<vmem>>, vector<1x4x4xbf16>
    %87 = vector.shape_cast %86 : vector<1x4x4xbf16> to vector<4x4xbf16>
    %cst_95 = arith.constant dense<0.000000e+00> : vector<256x4xf32>
    %88 = tpu.matmul %85, %87, %cst_95 {dimension_numbers = #tpu.dot_dimension_numbers<[1], [0], [0], [1], [0, 0, 1, 1], [], []>} : vector<256x4xbf16>, vector<4x4xbf16>, vector<256x4xf32> -> vector<256x4xf32>
    %89 = arith.addf %81, %88 : vector<256x4xf32>
    %c2_96 = arith.constant 2 : index
    %c2_97 = arith.constant 2 : index
    %c0_98 = arith.constant 0 : index
    %c0_99 = arith.constant 0 : index
    %90 = vector.load %arg7[%c2_96, %c2_97, %c0_98, %c0_99] : memref<3x18x16x4xf32, #tpu.memory_space<vmem>>, vector<1x16x16x4xf32>
    %91 = vector.shape_cast %90 : vector<1x16x16x4xf32> to vector<16x16x4xf32>
    %92 = vector.shape_cast %91 : vector<16x16x4xf32> to vector<256x4xf32>
    %93 = arith.truncf %92 : vector<256x4xf32> to vector<256x4xbf16>
    %c8 = arith.constant 8 : index
    %c0_100 = arith.constant 0 : index
    %c0_101 = arith.constant 0 : index
    %94 = vector.load %arg2[%c8, %c0_100, %c0_101] : memref<9x4x4xbf16, #tpu.memory_space<vmem>>, vector<1x4x4xbf16>
    %95 = vector.shape_cast %94 : vector<1x4x4xbf16> to vector<4x4xbf16>
    %cst_102 = arith.constant dense<0.000000e+00> : vector<256x4xf32>
    %96 = tpu.matmul %93, %95, %cst_102 {dimension_numbers = #tpu.dot_dimension_numbers<[1], [0], [0], [1], [0, 0, 1, 1], [], []>} : vector<256x4xbf16>, vector<4x4xbf16>, vector<256x4xf32> -> vector<256x4xf32>
    %97 = arith.addf %89, %96 : vector<256x4xf32>
    %c0_103 = arith.constant 0 : index
    %c0_104 = arith.constant 0 : index
    %c0_105 = arith.constant 0 : index
    %98 = vector.load %arg5[%c0_103, %c0_104, %c0_105] : memref<1x256x4xf32, #tpu.memory_space<vmem>>, vector<1x256x4xf32>
    %99 = vector.shape_cast %98 : vector<1x256x4xf32> to vector<256x4xf32>
    %100 = vector.shape_cast %97 : vector<256x4xf32> to vector<1x256x4xf32>
    tpu.vector_store %arg5[%c0_103, %c0_104, %c0_105], %100 {strides = array<i32>} : memref<1x256x4xf32, #tpu.memory_space<vmem>>, vector<1x256x4xf32>,
    %cst_106 = arith.constant dense<0.000000e+00> : vector<4xf32>
    %101 = vector.multi_reduction <add>, %97, %cst_106 [0] : vector<256x4xf32> to vector<4xf32>
    %102 = vector.shape_cast %101 : vector<4xf32> to vector<1x4xf32>
    %c0_107 = arith.constant 0 : index
    %c0_108 = arith.constant 0 : index
    %c0_109 = arith.constant 0 : index
    %103 = vector.load %arg6[%c0_107, %c0_108, %c0_109] : memref<1x2x4xf32, #tpu.memory_space<vmem>>, vector<1x1x4xf32>
    %104 = vector.shape_cast %103 : vector<1x1x4xf32> to vector<1x4xf32>
    %105 = vector.shape_cast %102 : vector<1x4xf32> to vector<1x1x4xf32>
    tpu.vector_store %arg6[%c0_107, %c0_108, %c0_109], %105 {strides = array<i32>} : memref<1x2x4xf32, #tpu.memory_space<vmem>>, vector<1x1x4xf32>,
    %106 = arith.mulf %97, %97 : vector<256x4xf32>
    %cst_110 = arith.constant dense<0.000000e+00> : vector<4xf32>
    %107 = vector.multi_reduction <add>, %106, %cst_110 [0] : vector<256x4xf32> to vector<4xf32>
    %108 = vector.shape_cast %107 : vector<4xf32> to vector<1x4xf32>
    %c0_111 = arith.constant 0 : index
    %c1_112 = arith.constant 1 : index
    %c0_113 = arith.constant 0 : index
    %109 = vector.load %arg6[%c0_111, %c1_112, %c0_113] : memref<1x2x4xf32, #tpu.memory_space<vmem>>, vector<1x1x4xf32>
    %110 = vector.shape_cast %109 : vector<1x1x4xf32> to vector<1x4xf32>
    %111 = vector.shape_cast %108 : vector<1x4xf32> to vector<1x1x4xf32>
    tpu.vector_store %arg6[%c0_111, %c1_112, %c0_113], %111 {strides = array<i32>} : memref<1x2x4xf32, #tpu.memory_space<vmem>>, vector<1x1x4xf32>,
    return
  }
  func.func @transform_0(%arg0: i32) -> (i32, i32, i32, i32) {
    %c0_i32 = arith.constant 0 : i32
    %c0_i32_0 = arith.constant 0 : i32
    %c0_i32_1 = arith.constant 0 : i32
    %c0_i32_2 = arith.constant 0 : i32
    return %arg0, %c0_i32, %c0_i32_0, %c0_i32_1 : i32, i32, i32, i32
  }
  func.func @transform_1(%arg0: i32) -> (i32, i32, i32) {
    %c0_i32 = arith.constant 0 : i32
    %c0_i32_0 = arith.constant 0 : i32
    %c0_i32_1 = arith.constant 0 : i32
    %c0_i32_2 = arith.constant 0 : i32
    return %c0_i32, %c0_i32_0, %c0_i32_1 : i32, i32, i32
  }
  func.func @transform_2(%arg0: i32) -> (i32, i32) {
    %c0_i32 = arith.constant 0 : i32
    %c0_i32_0 = arith.constant 0 : i32
    %c0_i32_1 = arith.constant 0 : i32
    return %c0_i32, %c0_i32_0 : i32, i32
  }
  func.func @transform_3(%arg0: i32) -> (i32, i32) {
    %c0_i32 = arith.constant 0 : i32
    %c0_i32_0 = arith.constant 0 : i32
    %c0_i32_1 = arith.constant 0 : i32
    return %c0_i32, %c0_i32_0 : i32, i32
  }
  func.func @transform_4(%arg0: i32) -> (i32, i32, i32) {
    %c0_i32 = arith.constant 0 : i32
    %c0_i32_0 = arith.constant 0 : i32
    %c0_i32_1 = arith.constant 0 : i32
    return %arg0, %c0_i32, %c0_i32_0 : i32, i32, i32
  }
  func.func @transform_5(%arg0: i32) -> (i32, i32, i32) {
    %c0_i32 = arith.constant 0 : i32
    %c0_i32_0 = arith.constant 0 : i32
    %c0_i32_1 = arith.constant 0 : i32
    return %arg0, %c0_i32, %c0_i32_0 : i32, i32, i32
  }
}

module attributes {stable_mosaic.version = 11 : i64} {
  func.func @_conv3x3_stats_kernel(%arg0: i32, %arg1: memref<1x16x16x4xf32, #tpu.memory_space<vmem>>, %arg2: memref<9x4x4xbf16, #tpu.memory_space<vmem>>, %arg3: memref<1x4xf32, #tpu.memory_space<vmem>>, %arg4: memref<1x4xf32, #tpu.memory_space<vmem>>, %arg5: memref<1x256x4xf32, #tpu.memory_space<vmem>>, %arg6: memref<1x2x4xf32, #tpu.memory_space<vmem>>, %arg7: memref<3x18x16x4xf32, #tpu.memory_space<vmem>>) attributes {dimension_semantics = [#tpu.dimension_semantics<parallel>], iteration_bounds = array<i64: 2>, scalar_prefetch = 0 : i64, scratch_operands = 1 : i64, tpu.core_type = #tpu.core_type<tc>, window_params = [{transform_indices = @transform_0, window_bounds = array<i64: 1, 16, 16, 4>}, {pipeline_mode = #tpu.pipeline_mode<synchronous>, transform_indices = @transform_1, window_bounds = array<i64: 9, 4, 4>}, {pipeline_mode = #tpu.pipeline_mode<synchronous>, transform_indices = @transform_2, window_bounds = array<i64: 1, 4>}, {pipeline_mode = #tpu.pipeline_mode<synchronous>, transform_indices = @transform_3, window_bounds = array<i64: 1, 4>}, {transform_indices = @transform_4, window_bounds = array<i64: 1, 256, 4>}, {transform_indices = @transform_5, window_bounds = array<i64: 1, 2, 4>}]} {
    %c0 = arith.constant 0 : index
    %c0_0 = arith.constant 0 : index
    %c0_1 = arith.constant 0 : index
    %c0_2 = arith.constant 0 : index
    %0 = vector.load %arg1[%c0, %c0_0, %c0_1, %c0_2] : memref<1x16x16x4xf32, #tpu.memory_space<vmem>>, vector<1x16x16x4xf32>
    %1 = vector.shape_cast %0 : vector<1x16x16x4xf32> to vector<16x16x4xf32>
    %c0_3 = arith.constant 0 : index
    %c0_4 = arith.constant 0 : index
    %2 = vector.load %arg3[%c0_3, %c0_4] : memref<1x4xf32, #tpu.memory_space<vmem>>, vector<1x4xf32>
    %3 = vector.shape_cast %2 : vector<1x4xf32> to vector<1x1x4xf32>
    %4 = vector.broadcast %3 : vector<1x1x4xf32> to vector<16x16x4xf32>
    %5 = arith.mulf %1, %4 : vector<16x16x4xf32>
    %c0_5 = arith.constant 0 : index
    %c0_6 = arith.constant 0 : index
    %6 = vector.load %arg4[%c0_5, %c0_6] : memref<1x4xf32, #tpu.memory_space<vmem>>, vector<1x4xf32>
    %7 = vector.shape_cast %6 : vector<1x4xf32> to vector<1x1x4xf32>
    %8 = vector.broadcast %7 : vector<1x1x4xf32> to vector<16x16x4xf32>
    %9 = arith.addf %5, %8 : vector<16x16x4xf32>
    %cst = arith.constant 2.000000e+01 : f32
    %10 = vector.broadcast %cst : f32 to vector<16x16x4xf32>
    %11 = arith.minimumf %9, %10 : vector<16x16x4xf32>
    %12 = math.exp %11 : vector<16x16x4xf32>
    %cst_7 = arith.constant 2.000000e+00 : f32
    %13 = vector.broadcast %cst_7 : f32 to vector<16x16x4xf32>
    %14 = arith.addf %12, %13 : vector<16x16x4xf32>
    %15 = arith.mulf %12, %14 : vector<16x16x4xf32>
    %16 = arith.mulf %9, %15 : vector<16x16x4xf32>
    %cst_8 = arith.constant 2.000000e+00 : f32
    %17 = vector.broadcast %cst_8 : f32 to vector<16x16x4xf32>
    %18 = arith.addf %15, %17 : vector<16x16x4xf32>
    %19 = tpu.reciprocal %18 {approx = true} : vector<16x16x4xf32> -> vector<16x16x4xf32>
    %20 = arith.mulf %16, %19 : vector<16x16x4xf32>
    %cst_9 = arith.constant 0.000000e+00 : f32
    %21 = vector.broadcast %cst_9 : f32 to vector<3x1x16x4xf32>
    %c0_10 = arith.constant 0 : index
    %c0_11 = arith.constant 0 : index
    %c0_12 = arith.constant 0 : index
    %c0_13 = arith.constant 0 : index
    %22 = vector.load %arg7[%c0_10, %c0_11, %c0_12, %c0_13] : memref<3x18x16x4xf32, #tpu.memory_space<vmem>>, vector<3x1x16x4xf32>
    tpu.vector_store %arg7[%c0_10, %c0_11, %c0_12, %c0_13], %21 {strides = array<i32>} : memref<3x18x16x4xf32, #tpu.memory_space<vmem>>, vector<3x1x16x4xf32>,
    %c0_14 = arith.constant 0 : index
    %c17 = arith.constant 17 : index
    %c0_15 = arith.constant 0 : index
    %c0_16 = arith.constant 0 : index
    %23 = vector.load %arg7[%c0_14, %c17, %c0_15, %c0_16] : memref<3x18x16x4xf32, #tpu.memory_space<vmem>>, vector<3x1x16x4xf32>
    tpu.vector_store %arg7[%c0_14, %c17, %c0_15, %c0_16], %21 {strides = array<i32>} : memref<3x18x16x4xf32, #tpu.memory_space<vmem>>, vector<3x1x16x4xf32>,
    %cst_17 = arith.constant 0.000000e+00 : f32
    %24 = vector.broadcast %cst_17 : f32 to vector<16x1x4xf32>
    %c0_18 = arith.constant 0 : index
    %c1 = arith.constant 1 : index
    %c0_19 = arith.constant 0 : index
    %c0_20 = arith.constant 0 : index
    %25 = vector.load %arg7[%c0_18, %c1, %c0_19, %c0_20] : memref<3x18x16x4xf32, #tpu.memory_space<vmem>>, vector<1x16x1x4xf32>
    %26 = vector.shape_cast %25 : vector<1x16x1x4xf32> to vector<16x1x4xf32>
    %27 = vector.shape_cast %24 : vector<16x1x4xf32> to vector<1x16x1x4xf32>
    tpu.vector_store %arg7[%c0_18, %c1, %c0_19, %c0_20], %27 {strides = array<i32>} : memref<3x18x16x4xf32, #tpu.memory_space<vmem>>, vector<1x16x1x4xf32>,
    %c2 = arith.constant 2 : index
    %c1_21 = arith.constant 1 : index
    %c15 = arith.constant 15 : index
    %c0_22 = arith.constant 0 : index
    %28 = vector.load %arg7[%c2, %c1_21, %c15, %c0_22] : memref<3x18x16x4xf32, #tpu.memory_space<vmem>>, vector<1x16x1x4xf32>
    %29 = vector.shape_cast %28 : vector<1x16x1x4xf32> to vector<16x1x4xf32>
    %30 = vector.shape_cast %24 : vector<16x1x4xf32> to vector<1x16x1x4xf32>
    tpu.vector_store %arg7[%c2, %c1_21, %c15, %c0_22], %30 {strides = array<i32>} : memref<3x18x16x4xf32, #tpu.memory_space<vmem>>, vector<1x16x1x4xf32>,
    %c1_23 = arith.constant 1 : index
    %c1_24 = arith.constant 1 : index
    %c0_25 = arith.constant 0 : index
    %c0_26 = arith.constant 0 : index
    %31 = vector.load %arg7[%c1_23, %c1_24, %c0_25, %c0_26] : memref<3x18x16x4xf32, #tpu.memory_space<vmem>>, vector<1x16x16x4xf32>
    %32 = vector.shape_cast %31 : vector<1x16x16x4xf32> to vector<16x16x4xf32>
    %33 = vector.shape_cast %20 : vector<16x16x4xf32> to vector<1x16x16x4xf32>
    tpu.vector_store %arg7[%c1_23, %c1_24, %c0_25, %c0_26], %33 {strides = array<i32>} : memref<3x18x16x4xf32, #tpu.memory_space<vmem>>, vector<1x16x16x4xf32>,
    %c1_27 = arith.constant 1 : index
    %c1_28 = arith.constant 1 : index
    %c0_29 = arith.constant 0 : index
    %c0_30 = arith.constant 0 : index
    %34 = vector.load %arg7[%c1_27, %c1_28, %c0_29, %c0_30] : memref<3x18x16x4xf32, #tpu.memory_space<vmem>>, vector<1x16x15x4xf32>
    %35 = vector.shape_cast %34 : vector<1x16x15x4xf32> to vector<16x15x4xf32>
    %c0_31 = arith.constant 0 : index
    %c1_32 = arith.constant 1 : index
    %c1_33 = arith.constant 1 : index
    %c0_34 = arith.constant 0 : index
    %36 = vector.load %arg7[%c0_31, %c1_32, %c1_33, %c0_34] : memref<3x18x16x4xf32, #tpu.memory_space<vmem>>, vector<1x16x15x4xf32>
    %37 = vector.shape_cast %36 : vector<1x16x15x4xf32> to vector<16x15x4xf32>
    %38 = vector.shape_cast %35 : vector<16x15x4xf32> to vector<1x16x15x4xf32>
    tpu.vector_store %arg7[%c0_31, %c1_32, %c1_33, %c0_34], %38 {strides = array<i32>} : memref<3x18x16x4xf32, #tpu.memory_space<vmem>>, vector<1x16x15x4xf32>,
    %c1_35 = arith.constant 1 : index
    %c1_36 = arith.constant 1 : index
    %c1_37 = arith.constant 1 : index
    %c0_38 = arith.constant 0 : index
    %39 = vector.load %arg7[%c1_35, %c1_36, %c1_37, %c0_38] : memref<3x18x16x4xf32, #tpu.memory_space<vmem>>, vector<1x16x15x4xf32>
    %40 = vector.shape_cast %39 : vector<1x16x15x4xf32> to vector<16x15x4xf32>
    %c2_39 = arith.constant 2 : index
    %c1_40 = arith.constant 1 : index
    %c0_41 = arith.constant 0 : index
    %c0_42 = arith.constant 0 : index
    %41 = vector.load %arg7[%c2_39, %c1_40, %c0_41, %c0_42] : memref<3x18x16x4xf32, #tpu.memory_space<vmem>>, vector<1x16x15x4xf32>
    %42 = vector.shape_cast %41 : vector<1x16x15x4xf32> to vector<16x15x4xf32>
    %43 = vector.shape_cast %40 : vector<16x15x4xf32> to vector<1x16x15x4xf32>
    tpu.vector_store %arg7[%c2_39, %c1_40, %c0_41, %c0_42], %43 {strides = array<i32>} : memref<3x18x16x4xf32, #tpu.memory_space<vmem>>, vector<1x16x15x4xf32>,
    %cst_43 = arith.constant 0.000000e+00 : f32
    %44 = vector.broadcast %cst_43 : f32 to vector<256x4xf32>
    %c0_44 = arith.constant 0 : index
    %c0_45 = arith.constant 0 : index
    %c0_46 = arith.constant 0 : index
    %c0_47 = arith.constant 0 : index
    %45 = vector.load %arg7[%c0_44, %c0_45, %c0_46, %c0_47] : memref<3x18x16x4xf32, #tpu.memory_space<vmem>>, vector<1x16x16x4xf32>
    %46 = vector.shape_cast %45 : vector<1x16x16x4xf32> to vector<16x16x4xf32>
    %47 = vector.shape_cast %46 : vector<16x16x4xf32> to vector<256x4xf32>
    %48 = arith.truncf %47 : vector<256x4xf32> to vector<256x4xbf16>
    %c0_48 = arith.constant 0 : index
    %c0_49 = arith.constant 0 : index
    %c0_50 = arith.constant 0 : index
    %49 = vector.load %arg2[%c0_48, %c0_49, %c0_50] : memref<9x4x4xbf16, #tpu.memory_space<vmem>>, vector<1x4x4xbf16>
    %50 = vector.shape_cast %49 : vector<1x4x4xbf16> to vector<4x4xbf16>
    %cst_51 = arith.constant dense<0.000000e+00> : vector<256x4xf32>
    %51 = tpu.matmul %48, %50, %cst_51 {dimension_numbers = #tpu.dot_dimension_numbers<[1], [0], [0], [1], [0, 0, 1, 1], [], []>} : vector<256x4xbf16>, vector<4x4xbf16>, vector<256x4xf32> -> vector<256x4xf32>
    %52 = arith.addf %44, %51 : vector<256x4xf32>
    %c1_52 = arith.constant 1 : index
    %c0_53 = arith.constant 0 : index
    %c0_54 = arith.constant 0 : index
    %c0_55 = arith.constant 0 : index
    %53 = vector.load %arg7[%c1_52, %c0_53, %c0_54, %c0_55] : memref<3x18x16x4xf32, #tpu.memory_space<vmem>>, vector<1x16x16x4xf32>
    %54 = vector.shape_cast %53 : vector<1x16x16x4xf32> to vector<16x16x4xf32>
    %55 = vector.shape_cast %54 : vector<16x16x4xf32> to vector<256x4xf32>
    %56 = arith.truncf %55 : vector<256x4xf32> to vector<256x4xbf16>
    %c1_56 = arith.constant 1 : index
    %c0_57 = arith.constant 0 : index
    %c0_58 = arith.constant 0 : index
    %57 = vector.load %arg2[%c1_56, %c0_57, %c0_58] : memref<9x4x4xbf16, #tpu.memory_space<vmem>>, vector<1x4x4xbf16>
    %58 = vector.shape_cast %57 : vector<1x4x4xbf16> to vector<4x4xbf16>
    %cst_59 = arith.constant dense<0.000000e+00> : vector<256x4xf32>
    %59 = tpu.matmul %56, %58, %cst_59 {dimension_numbers = #tpu.dot_dimension_numbers<[1], [0], [0], [1], [0, 0, 1, 1], [], []>} : vector<256x4xbf16>, vector<4x4xbf16>, vector<256x4xf32> -> vector<256x4xf32>
    %60 = arith.addf %52, %59 : vector<256x4xf32>
    %c2_60 = arith.constant 2 : index
    %c0_61 = arith.constant 0 : index
    %c0_62 = arith.constant 0 : index
    %c0_63 = arith.constant 0 : index
    %61 = vector.load %arg7[%c2_60, %c0_61, %c0_62, %c0_63] : memref<3x18x16x4xf32, #tpu.memory_space<vmem>>, vector<1x16x16x4xf32>
    %62 = vector.shape_cast %61 : vector<1x16x16x4xf32> to vector<16x16x4xf32>
    %63 = vector.shape_cast %62 : vector<16x16x4xf32> to vector<256x4xf32>
    %64 = arith.truncf %63 : vector<256x4xf32> to vector<256x4xbf16>
    %c2_64 = arith.constant 2 : index
    %c0_65 = arith.constant 0 : index
    %c0_66 = arith.constant 0 : index
    %65 = vector.load %arg2[%c2_64, %c0_65, %c0_66] : memref<9x4x4xbf16, #tpu.memory_space<vmem>>, vector<1x4x4xbf16>
    %66 = vector.shape_cast %65 : vector<1x4x4xbf16> to vector<4x4xbf16>
    %cst_67 = arith.constant dense<0.000000e+00> : vector<256x4xf32>
    %67 = tpu.matmul %64, %66, %cst_67 {dimension_numbers = #tpu.dot_dimension_numbers<[1], [0], [0], [1], [0, 0, 1, 1], [], []>} : vector<256x4xbf16>, vector<4x4xbf16>, vector<256x4xf32> -> vector<256x4xf32>
    %68 = arith.addf %60, %67 : vector<256x4xf32>
    %c0_68 = arith.constant 0 : index
    %c1_69 = arith.constant 1 : index
    %c0_70 = arith.constant 0 : index
    %c0_71 = arith.constant 0 : index
    %69 = vector.load %arg7[%c0_68, %c1_69, %c0_70, %c0_71] : memref<3x18x16x4xf32, #tpu.memory_space<vmem>>, vector<1x16x16x4xf32>
    %70 = vector.shape_cast %69 : vector<1x16x16x4xf32> to vector<16x16x4xf32>
    %71 = vector.shape_cast %70 : vector<16x16x4xf32> to vector<256x4xf32>
    %72 = arith.truncf %71 : vector<256x4xf32> to vector<256x4xbf16>
    %c3 = arith.constant 3 : index
    %c0_72 = arith.constant 0 : index
    %c0_73 = arith.constant 0 : index
    %73 = vector.load %arg2[%c3, %c0_72, %c0_73] : memref<9x4x4xbf16, #tpu.memory_space<vmem>>, vector<1x4x4xbf16>
    %74 = vector.shape_cast %73 : vector<1x4x4xbf16> to vector<4x4xbf16>
    %cst_74 = arith.constant dense<0.000000e+00> : vector<256x4xf32>
    %75 = tpu.matmul %72, %74, %cst_74 {dimension_numbers = #tpu.dot_dimension_numbers<[1], [0], [0], [1], [0, 0, 1, 1], [], []>} : vector<256x4xbf16>, vector<4x4xbf16>, vector<256x4xf32> -> vector<256x4xf32>
    %76 = arith.addf %68, %75 : vector<256x4xf32>
    %c1_75 = arith.constant 1 : index
    %c1_76 = arith.constant 1 : index
    %c0_77 = arith.constant 0 : index
    %c0_78 = arith.constant 0 : index
    %77 = vector.load %arg7[%c1_75, %c1_76, %c0_77, %c0_78] : memref<3x18x16x4xf32, #tpu.memory_space<vmem>>, vector<1x16x16x4xf32>
    %78 = vector.shape_cast %77 : vector<1x16x16x4xf32> to vector<16x16x4xf32>
    %79 = vector.shape_cast %78 : vector<16x16x4xf32> to vector<256x4xf32>
    %80 = arith.truncf %79 : vector<256x4xf32> to vector<256x4xbf16>
    %c4 = arith.constant 4 : index
    %c0_79 = arith.constant 0 : index
    %c0_80 = arith.constant 0 : index
    %81 = vector.load %arg2[%c4, %c0_79, %c0_80] : memref<9x4x4xbf16, #tpu.memory_space<vmem>>, vector<1x4x4xbf16>
    %82 = vector.shape_cast %81 : vector<1x4x4xbf16> to vector<4x4xbf16>
    %cst_81 = arith.constant dense<0.000000e+00> : vector<256x4xf32>
    %83 = tpu.matmul %80, %82, %cst_81 {dimension_numbers = #tpu.dot_dimension_numbers<[1], [0], [0], [1], [0, 0, 1, 1], [], []>} : vector<256x4xbf16>, vector<4x4xbf16>, vector<256x4xf32> -> vector<256x4xf32>
    %84 = arith.addf %76, %83 : vector<256x4xf32>
    %c2_82 = arith.constant 2 : index
    %c1_83 = arith.constant 1 : index
    %c0_84 = arith.constant 0 : index
    %c0_85 = arith.constant 0 : index
    %85 = vector.load %arg7[%c2_82, %c1_83, %c0_84, %c0_85] : memref<3x18x16x4xf32, #tpu.memory_space<vmem>>, vector<1x16x16x4xf32>
    %86 = vector.shape_cast %85 : vector<1x16x16x4xf32> to vector<16x16x4xf32>
    %87 = vector.shape_cast %86 : vector<16x16x4xf32> to vector<256x4xf32>
    %88 = arith.truncf %87 : vector<256x4xf32> to vector<256x4xbf16>
    %c5 = arith.constant 5 : index
    %c0_86 = arith.constant 0 : index
    %c0_87 = arith.constant 0 : index
    %89 = vector.load %arg2[%c5, %c0_86, %c0_87] : memref<9x4x4xbf16, #tpu.memory_space<vmem>>, vector<1x4x4xbf16>
    %90 = vector.shape_cast %89 : vector<1x4x4xbf16> to vector<4x4xbf16>
    %cst_88 = arith.constant dense<0.000000e+00> : vector<256x4xf32>
    %91 = tpu.matmul %88, %90, %cst_88 {dimension_numbers = #tpu.dot_dimension_numbers<[1], [0], [0], [1], [0, 0, 1, 1], [], []>} : vector<256x4xbf16>, vector<4x4xbf16>, vector<256x4xf32> -> vector<256x4xf32>
    %92 = arith.addf %84, %91 : vector<256x4xf32>
    %c0_89 = arith.constant 0 : index
    %c2_90 = arith.constant 2 : index
    %c0_91 = arith.constant 0 : index
    %c0_92 = arith.constant 0 : index
    %93 = vector.load %arg7[%c0_89, %c2_90, %c0_91, %c0_92] : memref<3x18x16x4xf32, #tpu.memory_space<vmem>>, vector<1x16x16x4xf32>
    %94 = vector.shape_cast %93 : vector<1x16x16x4xf32> to vector<16x16x4xf32>
    %95 = vector.shape_cast %94 : vector<16x16x4xf32> to vector<256x4xf32>
    %96 = arith.truncf %95 : vector<256x4xf32> to vector<256x4xbf16>
    %c6 = arith.constant 6 : index
    %c0_93 = arith.constant 0 : index
    %c0_94 = arith.constant 0 : index
    %97 = vector.load %arg2[%c6, %c0_93, %c0_94] : memref<9x4x4xbf16, #tpu.memory_space<vmem>>, vector<1x4x4xbf16>
    %98 = vector.shape_cast %97 : vector<1x4x4xbf16> to vector<4x4xbf16>
    %cst_95 = arith.constant dense<0.000000e+00> : vector<256x4xf32>
    %99 = tpu.matmul %96, %98, %cst_95 {dimension_numbers = #tpu.dot_dimension_numbers<[1], [0], [0], [1], [0, 0, 1, 1], [], []>} : vector<256x4xbf16>, vector<4x4xbf16>, vector<256x4xf32> -> vector<256x4xf32>
    %100 = arith.addf %92, %99 : vector<256x4xf32>
    %c1_96 = arith.constant 1 : index
    %c2_97 = arith.constant 2 : index
    %c0_98 = arith.constant 0 : index
    %c0_99 = arith.constant 0 : index
    %101 = vector.load %arg7[%c1_96, %c2_97, %c0_98, %c0_99] : memref<3x18x16x4xf32, #tpu.memory_space<vmem>>, vector<1x16x16x4xf32>
    %102 = vector.shape_cast %101 : vector<1x16x16x4xf32> to vector<16x16x4xf32>
    %103 = vector.shape_cast %102 : vector<16x16x4xf32> to vector<256x4xf32>
    %104 = arith.truncf %103 : vector<256x4xf32> to vector<256x4xbf16>
    %c7 = arith.constant 7 : index
    %c0_100 = arith.constant 0 : index
    %c0_101 = arith.constant 0 : index
    %105 = vector.load %arg2[%c7, %c0_100, %c0_101] : memref<9x4x4xbf16, #tpu.memory_space<vmem>>, vector<1x4x4xbf16>
    %106 = vector.shape_cast %105 : vector<1x4x4xbf16> to vector<4x4xbf16>
    %cst_102 = arith.constant dense<0.000000e+00> : vector<256x4xf32>
    %107 = tpu.matmul %104, %106, %cst_102 {dimension_numbers = #tpu.dot_dimension_numbers<[1], [0], [0], [1], [0, 0, 1, 1], [], []>} : vector<256x4xbf16>, vector<4x4xbf16>, vector<256x4xf32> -> vector<256x4xf32>
    %108 = arith.addf %100, %107 : vector<256x4xf32>
    %c2_103 = arith.constant 2 : index
    %c2_104 = arith.constant 2 : index
    %c0_105 = arith.constant 0 : index
    %c0_106 = arith.constant 0 : index
    %109 = vector.load %arg7[%c2_103, %c2_104, %c0_105, %c0_106] : memref<3x18x16x4xf32, #tpu.memory_space<vmem>>, vector<1x16x16x4xf32>
    %110 = vector.shape_cast %109 : vector<1x16x16x4xf32> to vector<16x16x4xf32>
    %111 = vector.shape_cast %110 : vector<16x16x4xf32> to vector<256x4xf32>
    %112 = arith.truncf %111 : vector<256x4xf32> to vector<256x4xbf16>
    %c8 = arith.constant 8 : index
    %c0_107 = arith.constant 0 : index
    %c0_108 = arith.constant 0 : index
    %113 = vector.load %arg2[%c8, %c0_107, %c0_108] : memref<9x4x4xbf16, #tpu.memory_space<vmem>>, vector<1x4x4xbf16>
    %114 = vector.shape_cast %113 : vector<1x4x4xbf16> to vector<4x4xbf16>
    %cst_109 = arith.constant dense<0.000000e+00> : vector<256x4xf32>
    %115 = tpu.matmul %112, %114, %cst_109 {dimension_numbers = #tpu.dot_dimension_numbers<[1], [0], [0], [1], [0, 0, 1, 1], [], []>} : vector<256x4xbf16>, vector<4x4xbf16>, vector<256x4xf32> -> vector<256x4xf32>
    %116 = arith.addf %108, %115 : vector<256x4xf32>
    %c0_110 = arith.constant 0 : index
    %c0_111 = arith.constant 0 : index
    %c0_112 = arith.constant 0 : index
    %117 = vector.load %arg5[%c0_110, %c0_111, %c0_112] : memref<1x256x4xf32, #tpu.memory_space<vmem>>, vector<1x256x4xf32>
    %118 = vector.shape_cast %117 : vector<1x256x4xf32> to vector<256x4xf32>
    %119 = vector.shape_cast %116 : vector<256x4xf32> to vector<1x256x4xf32>
    tpu.vector_store %arg5[%c0_110, %c0_111, %c0_112], %119 {strides = array<i32>} : memref<1x256x4xf32, #tpu.memory_space<vmem>>, vector<1x256x4xf32>,
    %cst_113 = arith.constant dense<0.000000e+00> : vector<4xf32>
    %120 = vector.multi_reduction <add>, %116, %cst_113 [0] : vector<256x4xf32> to vector<4xf32>
    %121 = vector.shape_cast %120 : vector<4xf32> to vector<1x4xf32>
    %c0_114 = arith.constant 0 : index
    %c0_115 = arith.constant 0 : index
    %c0_116 = arith.constant 0 : index
    %122 = vector.load %arg6[%c0_114, %c0_115, %c0_116] : memref<1x2x4xf32, #tpu.memory_space<vmem>>, vector<1x1x4xf32>
    %123 = vector.shape_cast %122 : vector<1x1x4xf32> to vector<1x4xf32>
    %124 = vector.shape_cast %121 : vector<1x4xf32> to vector<1x1x4xf32>
    tpu.vector_store %arg6[%c0_114, %c0_115, %c0_116], %124 {strides = array<i32>} : memref<1x2x4xf32, #tpu.memory_space<vmem>>, vector<1x1x4xf32>,
    %125 = arith.mulf %116, %116 : vector<256x4xf32>
    %cst_117 = arith.constant dense<0.000000e+00> : vector<4xf32>
    %126 = vector.multi_reduction <add>, %125, %cst_117 [0] : vector<256x4xf32> to vector<4xf32>
    %127 = vector.shape_cast %126 : vector<4xf32> to vector<1x4xf32>
    %c0_118 = arith.constant 0 : index
    %c1_119 = arith.constant 1 : index
    %c0_120 = arith.constant 0 : index
    %128 = vector.load %arg6[%c0_118, %c1_119, %c0_120] : memref<1x2x4xf32, #tpu.memory_space<vmem>>, vector<1x1x4xf32>
    %129 = vector.shape_cast %128 : vector<1x1x4xf32> to vector<1x4xf32>
    %130 = vector.shape_cast %127 : vector<1x4xf32> to vector<1x1x4xf32>
    tpu.vector_store %arg6[%c0_118, %c1_119, %c0_120], %130 {strides = array<i32>} : memref<1x2x4xf32, #tpu.memory_space<vmem>>, vector<1x1x4xf32>,
    return
  }
  func.func @transform_0(%arg0: i32) -> (i32, i32, i32, i32) {
    %c0_i32 = arith.constant 0 : i32
    %c0_i32_0 = arith.constant 0 : i32
    %c0_i32_1 = arith.constant 0 : i32
    %c0_i32_2 = arith.constant 0 : i32
    return %arg0, %c0_i32, %c0_i32_0, %c0_i32_1 : i32, i32, i32, i32
  }
  func.func @transform_1(%arg0: i32) -> (i32, i32, i32) {
    %c0_i32 = arith.constant 0 : i32
    %c0_i32_0 = arith.constant 0 : i32
    %c0_i32_1 = arith.constant 0 : i32
    %c0_i32_2 = arith.constant 0 : i32
    return %c0_i32, %c0_i32_0, %c0_i32_1 : i32, i32, i32
  }
  func.func @transform_2(%arg0: i32) -> (i32, i32) {
    %c0_i32 = arith.constant 0 : i32
    %c0_i32_0 = arith.constant 0 : i32
    %c0_i32_1 = arith.constant 0 : i32
    return %c0_i32, %c0_i32_0 : i32, i32
  }
  func.func @transform_3(%arg0: i32) -> (i32, i32) {
    %c0_i32 = arith.constant 0 : i32
    %c0_i32_0 = arith.constant 0 : i32
    %c0_i32_1 = arith.constant 0 : i32
    return %c0_i32, %c0_i32_0 : i32, i32
  }
  func.func @transform_4(%arg0: i32) -> (i32, i32, i32) {
    %c0_i32 = arith.constant 0 : i32
    %c0_i32_0 = arith.constant 0 : i32
    %c0_i32_1 = arith.constant 0 : i32
    return %arg0, %c0_i32, %c0_i32_0 : i32, i32, i32
  }
  func.func @transform_5(%arg0: i32) -> (i32, i32, i32) {
    %c0_i32 = arith.constant 0 : i32
    %c0_i32_0 = arith.constant 0 : i32
    %c0_i32_1 = arith.constant 0 : i32
    return %arg0, %c0_i32, %c0_i32_0 : i32, i32, i32
  }
}

</mosaic_0001>

<bundles_post_ra>
// kernel: basic_block_forward.5
= control target key start
LH: loop header
LB: loop body
LE: loop exit
PB: predicated region body
PF: predicated region fallthrough
CT: control target
= control target key end

     0   :  { %s967_s15 = smov 0   ;;  %s1362_s0 = inlined_call_operand.vmem [shape: f32[2,256,4], index: 0, kind: input, shape index: {}]   ;;  %s1363_s1 = inlined_call_operand.vmem [shape: f32[2,256,4], index: 1, kind: input, shape index: {}]   ;;  %s1364_s2 = inlined_call_operand.vmem [shape: f32[1,4], index: 2, kind: input, shape index: {}]   ;;  %s1365_s3 = inlined_call_operand.vmem [shape: f32[1,4], index: 3, kind: input, shape index: {}]   ;;  %s1366_s4 = inlined_call_operand.vmem [shape: f32[2,256,4], index: 4, kind: output, shape index: {}]  }
   0x1 LB: > { %s780_s16 = sadd.s32 4294967295, %s940_s15   ;;  %p784_p0 = scmp.ge.s32.totalorder %s940_s15, 1  ;;  %s940_s15 = sphi %s967_s15, %s14_s15  }
   0x2   : > { %p172_p1 = scmp.lt.s32.totalorder %s940_s15, 3 }
   0x4   : > { %p173_p2 = pnand %p784_p0, %p172_p1 }
   0x5   : > { %p203_p3 = scmp.lt.s32.totalorder (!%p173_p2), %s780_s16, 1  ;;  %v980_v0 = vld [vmem:[%s1364_s2] ss:$0 sm:$0xff] (!%p173_p2)  ;;  %vm680_vm0 = vcmask (!%p173_p2), 31744  }
   0x6   : > { %176 = sbr.rel (%p173_p2) target bundleno = 136 (0x88), region = 36  ;;  %v998_v2 = vld [vmem:[%s1365_s3] ss:$0 sm:$0xff] (!%p173_p2) }
   0xd   : > { %s1368_s16 = smov (!%p203_p3, %s780_s16), 1 }
   0xe   : > { %s975_s17 = sshll.u32 %s1368_s16, 8 }
   0xf   : > { %s986_s22 = scalar_lea.vmem %s1362_s0, %s975_s17  ;;  %s992_s25 = scalar_lea.vmem %s1363_s1, %s975_s17 }
  0x10   : > { %v218_v1 = vld [vmem:[%s986_s22] sm:$0xff]  ;;  %v219_v3 = vld [vmem:[%s986_s22 + $0x8] sm:$0xff]  ;;  %v220_v7 = vld [vmem:[%s986_s22 + $0x10] sm:$0xff]  ;;  %s1141_s30 = scalar_lea.vmem %s1366_s4, %s975_s17 }
  0x11   : > { %v257_v4 = vmul.f32 %v980_v0, %v218_v1  ;;  %v328_v5 = vld [vmem:[%s992_s25] sm:$0xff]  ;;  %v258_v6 = vmul.f32 %v980_v0, %v219_v3  ;;  %v329_v8 = vld [vmem:[%s992_s25 + $0x8] sm:$0xff]  ;;  %v259_v9 = vmul.f32 %v980_v0, %v220_v7  ;;  %v221_v10 = vld [vmem:[%s986_s22 + $0x18] sm:$0xff] }
  0x12   : > { %v222_v11 = vld [vmem:[%s986_s22 + $0x20] sm:$0xff]  ;;  %v330_v14 = vld [vmem:[%s992_s25 + $0x10] sm:$0xff]  ;;  %v260_v15 = vmul.f32 %v980_v0, %v221_v10  ;;  %v331_v16 = vld [vmem:[%s992_s25 + $0x18] sm:$0xff] }
  0x13   : > { %v296_v12 = vadd.f32 %v998_v2, %v257_v4  ;;  %v297_v13 = vadd.f32 %v998_v2, %v258_v6  ;;  %v261_v17 = vmul.f32 %v980_v0, %v222_v11  ;;  %v223_v18 = vld [vmem:[%s986_s22 + $0x28] sm:$0xff]  ;;  %v298_v19 = vadd.f32 %v998_v2, %v259_v9  ;;  %v332_v20 = vld [vmem:[%s992_s25 + $0x20] sm:$0xff]  ;;  %v224_v22 = vld [vmem:[%s986_s22 + $0x30] sm:$0xff] }
  0x14   : > { %v262_v21 = vmul.f32 %v980_v0, %v223_v18  ;;  %v225_v23 = vld [vmem:[%s986_s22 + $0x38] sm:$0xff]  ;;  %v299_v26 = vadd.f32 %v998_v2, %v260_v15  ;;  %v333_v28 = vld [vmem:[%s992_s25 + $0x28] sm:$0xff]  ;;  %v263_v31 = vmul.f32 %v980_v0, %v224_v22  ;;  %v334_v37 = vld [vmem:[%s992_s25 + $0x30] sm:$0xff] }
  0x15   : > { %v1021_v24 = vadd.f32 %v328_v5, %v296_v12  ;;  %v1023_v25 = vadd.f32 %v329_v8, %v297_v13  ;;  %v300_v27 = vadd.f32 %v998_v2, %v261_v17  ;;  %v1028_v29 = vadd.f32 %v330_v14, %v298_v19  ;;  %v335_v38 = vld [vmem:[%s992_s25 + $0x38] sm:$0xff]  ;;  %v226_v43 = vld [vmem:[%s986_s22 + $0x40] sm:$0xff]  ;;  %v227_v52 = vld [vmem:[%s986_s22 + $0x48] sm:$0xff] }
  0x16   : > { %v301_v30 = vadd.f32 %v998_v2, %v262_v21  ;;  %v264_v32 = vmul.f32 %v980_v0, %v225_v23  ;;  %v1035_v35 = vadd.f32 %v331_v16, %v299_v26  ;;  %v302_v41 = vadd.f32 %v998_v2, %v263_v31  ;;  %v228_v53 = vld [vmem:[%s986_s22 + $0x50] sm:$0xff]  ;;  %v229_v57 = vld [vmem:[%s986_s22 + $0x58] sm:$0xff]  ;;  %v336_v61 = vld [vmem:[%s992_s25 + $0x40] sm:$0xff] }
  0x17   : > { %v392_v33 = vmin.f32 %v1021_v24, 20.0  ;;  %v393_v34 = vmin.f32 %v1023_v25, 20.0  ;;  %v1037_v36 = vadd.f32 %v332_v20, %v300_v27  ;;  %v394_v39 = vmin.f32 %v1028_v29, 20.0  ;;  %v230_v3 = vld [vmem:[%s986_s22 + $0x60] sm:$0xff]  ;;  %v231_v4 = vld [vmem:[%s986_s22 + $0x68] sm:$0xff]  ;;  %v338_v8 = vld [vmem:[%s992_s25 + $0x50] sm:$0xff] }
  0x18   : > { %v1042_v40 = vadd.f32 %v333_v28, %v301_v30  ;;  %v303_v42 = vadd.f32 %v998_v2, %v264_v32  ;;  %v395_v46 = vmin.f32 %v1035_v35, 20.0  ;;  %v1050_v50 = vadd.f32 %v334_v37, %v302_v41  ;;  %v337_v7 = vld [vmem:[%s992_s25 + $0x48] sm:$0xff]  ;;  %v339_v13 = vld [vmem:[%s992_s25 + $0x58] sm:$0xff]  ;;  %v232_v17 = vld [vmem:[%s986_s22 + $0x70] sm:$0xff] }
  0x19   : > { %v424_v44 = vmul.f32 1.442695, %v392_v33  ;;  %v426_v45 = vmul.f32 1.442695, %v393_v34  ;;  %v396_v47 = vmin.f32 %v1037_v36, 20.0  ;;  %v265_v56 = vmul.f32 %v980_v0, %v226_v43  ;;  %v340_v21 = vld [vmem:[%s992_s25 + $0x60] sm:$0xff] }
  0x1a   : > { %v428_v48 = vmul.f32 1.442695, %v394_v39  ;;  %v397_v49 = vmin.f32 %v1042_v40, 20.0  ;;  %v1052_v51 = vadd.f32 %v335_v38, %v303_v42  ;;  %v430_v54 = vmul.f32 1.442695, %v395_v46  ;;  %v341_v22 = vld [vmem:[%s992_s25 + $0x68] sm:$0xff] }
  0x1b   : > { %806 = vpow2.f32 %v424_v44  ;;  %v432_v55 = vmul.f32 1.442695, %v396_v47  ;;  %v398_v59 = vmin.f32 %v1050_v50, 20.0  ;;  %v304_v62 = vadd.f32 %v998_v2, %v265_v56  ;;  %v233_v23 = vld [vmem:[%s986_s22 + $0x78] sm:$0xff]  ;;  %v342_v39 = vld [vmem:[%s992_s25 + $0x70] sm:$0xff] }
  0x1c   : > { %808 = vpow2.f32 %v426_v45  ;;  %v434_v58 = vmul.f32 1.442695, %v397_v49  ;;  %v399_v60 = vmin.f32 %v1052_v51, 20.0  ;;  %v266_v63 = vmul.f32 %v980_v0, %v227_v52 }
  0x1d   : > { %810 = vpow2.f32 %v428_v48  ;;  %v267_v1 = vmul.f32 %v980_v0, %v228_v53  ;;  %v436_v5 = vmul.f32 1.442695, %v398_v59  ;;  %v268_v9 = vmul.f32 %v980_v0, %v229_v57 }
  0x1e   : > { %812 = vpow2.f32 %v430_v54  ;;  %v438_v6 = vmul.f32 1.442695, %v399_v60  ;;  %v1069_v10 = vadd.f32 %v336_v61, %v304_v62  ;;  %v305_v11 = vadd.f32 %v998_v2, %v266_v63 }
  0x1f   : > { %814 = vpow2.f32 %v432_v55  ;;  %v306_v12 = vadd.f32 %v998_v2, %v267_v1  ;;  %v307_v14 = vadd.f32 %v998_v2, %v268_v9  ;;  %v269_v15 = vmul.f32 %v980_v0, %v230_v3 }
  0x20   : > { %816 = vpow2.f32 %v434_v58  ;;  %v270_v16 = vmul.f32 %v980_v0, %v231_v4  ;;  %v400_v18 = vmin.f32 %v1069_v10, 20.0  ;;  %v1079_v19 = vadd.f32 %v337_v7, %v305_v11 }
  0x21   : > { %818 = vpow2.f32 %v436_v5  ;;  %v1081_v20 = vadd.f32 %v338_v8, %v306_v12  ;;  %v1086_v26 = vadd.f32 %v339_v13, %v307_v14  ;;  %v308_v27 = vadd.f32 %v998_v2, %v269_v15 }
  0x22   : > { %820 = vpow2.f32 %v438_v6  ;;  %v309_v28 = vadd.f32 %v998_v2, %v270_v16  ;;  %v440_v30 = vmul.f32 1.442695, %v400_v18  ;;  %v401_v31 = vmin.f32 %v1079_v19, 20.0 }
  0x23   : > { %v402_v32 = vmin.f32 %v1081_v20, 20.0  ;;  %v271_v33 = vmul.f32 %v980_v0, %v232_v17  ;;  %v403_v34 = vmin.f32 %v1086_v26, 20.0  ;;  %v1094_v37 = vadd.f32 %v340_v21, %v308_v27  ;;  %v343_v27 = vld [vmem:[%s992_s25 + $0x78] sm:$0xff] }
  0x24   : > { %v1096_v38 = vadd.f32 %v341_v22, %v309_v28  ;;  %v272_v41 = vmul.f32 %v980_v0, %v233_v23  ;;  %822 = vpow2.f32 %v440_v30  ;;  %v442_v43 = vmul.f32 1.442695, %v401_v31 }
  0x25   : > { %v807_v42 = vpop.eup %806  ;;  %v444_v44 = vmul.f32 1.442695, %v402_v32  ;;  %v310_v45 = vadd.f32 %v998_v2, %v271_v33  ;;  %v446_v48 = vmul.f32 1.442695, %v403_v34  ;;  %v404_v49 = vmin.f32 %v1094_v37, 20.0  ;;  %v234_v32 = vld [vmem:[%s986_s22 + $0x80] sm:$0xff] }
  0x26   : > { %v809_v46 = vpop.eup %808  ;;  %v488_v47 = vadd.f32 2.0, %v807_v42  ;;  %v405_v52 = vmin.f32 %v1096_v38, 20.0  ;;  %824 = vpow2.f32 %v442_v43  ;;  %v311_v59 = vadd.f32 %v998_v2, %v272_v41 }
  0x27   : > { %v811_v53 = vpop.eup %810  ;;  %v489_v54 = vadd.f32 2.0, %v809_v46  ;;  %v1103_v55 = vadd.f32 %v342_v39, %v310_v45  ;;  %826 = vpow2.f32 %v444_v44  ;;  %v448_v63 = vmul.f32 1.442695, %v404_v49 }
  0x28   : > { %v813_v56 = vpop.eup %812  ;;  %v520_v57 = vmul.f32 %v807_v42, %v488_v47  ;;  %v490_v58 = vadd.f32 2.0, %v811_v53  ;;  %828 = vpow2.f32 %v446_v48  ;;  %v1106_v6 = vmul.f32 1.442695, %v405_v52 }
  0x29   : > { %v815_v60 = vpop.eup %814  ;;  %v521_v61 = vmul.f32 %v809_v46, %v489_v54  ;;  %v491_v62 = vadd.f32 2.0, %v813_v56  ;;  %v406_v41 = vmin.f32 %v1103_v55, 20.0  ;;  %v1125_v42 = vadd.f32 %v343_v27, %v311_v59  ;;  %v345_v27 = vld [vmem:[%s992_s25 + $0x88] sm:$0xff] }
  0x2a   : > { %v817_v1 = vpop.eup %816  ;;  %v584_v3 = vadd.f32 2.0, %v520_v57  ;;  %v522_v4 = vmul.f32 %v811_v53, %v490_v58  ;;  %v492_v5 = vadd.f32 2.0, %v815_v60  ;;  %v552_v8 = vmul.f32 %v520_v57, %v1021_v24 }
  0x2b   : > { %v819_v7 = vpop.eup %818  ;;  %v585_v9 = vadd.f32 2.0, %v521_v61  ;;  %v523_v11 = vmul.f32 %v813_v56, %v491_v62  ;;  %v493_v12 = vadd.f32 2.0, %v817_v1  ;;  %v553_v14 = vmul.f32 %v521_v61, %v1023_v25 }
  0x2c   : > { %v821_v13 = vpop.eup %820  ;;  %830 = vrcp.f32 %v584_v3  ;;  %v586_v15 = vadd.f32 2.0, %v522_v4  ;;  %v524_v16 = vmul.f32 %v815_v60, %v492_v5  ;;  %v1111_v17 = vmul.f32 %v522_v4, %v1028_v29  ;;  %v344_v3 = vld [vmem:[%s992_s25 + $0x80] sm:$0xff]  ;;  %v235_v4 = vld [vmem:[%s986_s22 + $0x88] sm:$0xff] }
  0x2d   : > { %832 = vrcp.f32 %v585_v9  ;;  %v587_v18 = vadd.f32 2.0, %v523_v11  ;;  %v525_v21 = vmul.f32 %v817_v1, %v493_v12  ;;  %v1114_v24 = vmul.f32 %v523_v11, %v1035_v35  ;;  %v236_v12 = vld [vmem:[%s986_s22 + $0x90] sm:$0xff] }
  0x2e   : > { %834 = vrcp.f32 %v586_v15  ;;  %v588_v22 = vadd.f32 2.0, %v524_v16  ;;  %v494_v23 = vadd.f32 2.0, %v819_v7  ;;  %v823_v28 = vpop.eup %822  ;;  %v1118_v25 = vmul.f32 %v524_v16, %v1037_v36 }
  0x2f   : > { %836 = vrcp.f32 %v587_v18  ;;  %v589_v30 = vadd.f32 2.0, %v525_v21  ;;  %v495_v31 = vadd.f32 2.0, %v821_v13  ;;  %v1122_v29 = vmul.f32 %v525_v21, %v1042_v40 }
  0x30   : > { %838 = vrcp.f32 %v588_v22  ;;  %v526_v33 = vmul.f32 %v819_v7, %v494_v23  ;;  %v496_v34 = vadd.f32 2.0, %v823_v28  ;;  %v825_v39 = vpop.eup %824  ;;  %v273_v46 = vmul.f32 %v980_v0, %v234_v32 }
  0x31   : > { %840 = vrcp.f32 %v589_v30  ;;  %v527_v35 = vmul.f32 %v821_v13, %v495_v31  ;;  %v827_v43 = vpop.eup %826  ;;  %v497_v45 = vadd.f32 2.0, %v825_v39  ;;  %v407_v60 = vmin.f32 %v1125_v42, 20.0 }
  0x32   : > { %v590_v44 = vadd.f32 2.0, %v526_v33  ;;  %v528_v36 = vmul.f32 %v823_v28, %v496_v34  ;;  %v829_v47 = vpop.eup %828  ;;  %v1129_v40 = vmul.f32 %v526_v33, %v1050_v50  ;;  %v498_v49 = vadd.f32 2.0, %v827_v43  ;;  %v346_v33 = vld [vmem:[%s992_s25 + $0x90] sm:$0xff] }
  0x33   : > { %v591_v48 = vadd.f32 2.0, %v527_v35  ;;  %842 = vpow2.f32 %v448_v63  ;;  %v1132_v52 = vmul.f32 %v527_v35, %v1052_v51  ;;  %v529_v54 = vmul.f32 %v825_v39, %v497_v45  ;;  %v348_v45 = vld [vmem:[%s992_s25 + $0xa0] sm:$0xff] }
  0x34   : > { %844 = vrcp.f32 %v590_v44  ;;  %v592_v53 = vadd.f32 2.0, %v528_v36  ;;  %v1135_v56 = vmul.f32 %v528_v36, %v1069_v10  ;;  %v530_v57 = vmul.f32 %v827_v43, %v498_v49 }
  0x35   : > { %846 = vrcp.f32 %v591_v48  ;;  %v499_v58 = vadd.f32 2.0, %v829_v47  ;;  %v593_v50 = vadd.f32 2.0, %v529_v54  ;;  %v452_v51 = vmul.f32 1.442695, %v406_v41 }
  0x36   : > { %v831_v59 = vpop.eup %830  ;;  %848 = vrcp.f32 %v592_v53  ;;  %v1145_v10 = vmul.f32 %v529_v54, %v1079_v19  ;;  %v594_v63 = vadd.f32 2.0, %v530_v57  ;;  %v1152_v9 = vmul.f32 %v530_v57, %v1081_v20 }
  0x37   : > { %v833_v61 = vpop.eup %832  ;;  %v648_v62 = vmul.f32 %v831_v59, %v552_v8  ;;  %v1147_v1 = vmul.f32 %v829_v47, %v499_v58  ;;  %850 = vrcp.f32 %v593_v50  ;;  %v312_v11 = vadd.f32 %v998_v2, %v273_v46  ;;  %v237_v8 = vld [vmem:[%s986_s22 + $0x98] sm:$0xff] }
  0x38   : > { %v835_v5 = vpop.eup %834  ;;  %v649_v7 = vmul.f32 %v833_v61, %v553_v14  ;;  %852 = vrcp.f32 %v594_v63  ;;  %v454_v14 = vmul.f32 1.442695, %v407_v60  ;;  %v274_v21 = vmul.f32 %v980_v0, %v235_v4  ;;  %v240_v63 = vld [vmem:[%s986_s22 + $0xb0] sm:$0xff] }
  0x39   : > { %v837_v19 = vpop.eup %836  ;;  %681 = vst.msk [vmem:[%s1141_s30] sm:$0xff] %vm680_vm0, %v648_v62  ;;  %v650_v13 = vmul.f32 %v835_v5, %v1111_v17  ;;  %v595_v15 = vadd.f32 2.0, %v1147_v1  ;;  %854 = vpow2.f32 %v1106_v6  ;;  %v1165_v18 = vadd.f32 %v344_v3, %v312_v11  ;;  %v238_v17 = vld [vmem:[%s986_s22 + $0xa0] sm:$0xff]  ;;  %v239_v6 = vld [vmem:[%s986_s22 + $0xa8] sm:$0xff] }
  0x3a   : > { %v839_v20 = vpop.eup %838  ;;  %682 = vst.msk [vmem:[%s1141_s30 + $0x8] sm:$0xff] %vm680_vm0, %v649_v7  ;;  %v651_v16 = vmul.f32 %v837_v19, %v1114_v24  ;;  %v275_v28 = vmul.f32 %v980_v0, %v236_v12  ;;  %v276_v24 = vmul.f32 %v980_v0, %v237_v8  ;;  %v313_v32 = vadd.f32 %v998_v2, %v274_v21  ;;  %v349_v62 = vld [vmem:[%s992_s25 + $0xa8] sm:$0xff]  ;;  %v350_v21 = vld [vmem:[%s992_s25 + $0xb0] sm:$0xff] }
  0x3b   : > { %v841_v22 = vpop.eup %840  ;;  %683 = vst.msk [vmem:[%s1141_s30 + $0x10] sm:$0xff] %vm680_vm0, %v650_v13  ;;  %v652_v23 = vmul.f32 %v839_v20, %v1118_v25  ;;  %856 = vrcp.f32 %v595_v15  ;;  %v408_v31 = vmin.f32 %v1165_v18, 20.0  ;;  %v347_v25 = vld [vmem:[%s992_s25 + $0x98] sm:$0xff]  ;;  %v277_v41 = vmul.f32 %v980_v0, %v238_v17 }
  0x3c   : > { %684 = vst.msk [vmem:[%s1141_s30 + $0x18] sm:$0xff] %vm680_vm0, %v651_v16  ;;  %v653_v30 = vmul.f32 %v841_v22, %v1122_v29  ;;  %858 = vpow2.f32 %v452_v51  ;;  %v314_v39 = vadd.f32 %v998_v2, %v275_v28  ;;  %v315_v35 = vadd.f32 %v998_v2, %v276_v24  ;;  %v351_v28 = vld [vmem:[%s992_s25 + $0xb8] sm:$0xff] }
  0x3d   : > { %v843_v34 = vpop.eup %842  ;;  %685 = vst.msk [vmem:[%s1141_s30 + $0x20] sm:$0xff] %vm680_vm0, %v652_v23  ;;  %860 = vpow2.f32 %v454_v14  ;;  %v456_v44 = vmul.f32 1.442695, %v408_v31  ;;  %v1190_v36 = vadd.f32 %v345_v27, %v313_v32  ;;  %v278_v46 = vmul.f32 %v980_v0, %v239_v6  ;;  %v242_v32 = vld [vmem:[%s986_s22 + $0xc0] sm:$0xff] }
  0x3e   : > { %v845_v43 = vpop.eup %844  ;;  %686 = vst.msk [vmem:[%s1141_s30 + $0x28] sm:$0xff] %vm680_vm0, %v653_v30  ;;  %v500_v29 = vadd.f32 2.0, %v843_v34  ;;  %v1195_v49 = vadd.f32 %v346_v33, %v314_v39  ;;  %v1197_v53 = vadd.f32 %v347_v25, %v315_v35  ;;  %v316_v54 = vadd.f32 %v998_v2, %v277_v41 }
  0x3f   : > { %v847_v47 = vpop.eup %846  ;;  %v654_v48 = vmul.f32 %v845_v43, %v1129_v40  ;;  %862 = vpow2.f32 %v456_v44  ;;  %v409_v50 = vmin.f32 %v1190_v36, 20.0  ;;  %v317_v7 = vadd.f32 %v998_v2, %v278_v46  ;;  %v243_v46 = vld [vmem:[%s986_s22 + $0xc8] sm:$0xff] }
  0x40   : > { %v849_v57 = vpop.eup %848  ;;  %v655_v58 = vmul.f32 %v847_v47, %v1132_v52  ;;  %v532_v59 = vmul.f32 %v843_v34, %v500_v29  ;;  %v410_v51 = vmin.f32 %v1195_v49, 20.0  ;;  %v411_v60 = vmin.f32 %v1197_v53, 20.0 }
  0x41   : > { %687 = vst.msk [vmem:[%s1141_s30 + $0x30] sm:$0xff] %vm680_vm0, %v654_v48  ;;  %v656_v40 = vmul.f32 %v849_v57, %v1135_v56  ;;  %v1207_v61 = vadd.f32 %v348_v45, %v316_v54  ;;  %v851_v3 = vpop.eup %850  ;;  %v563_v52 = vmul.f32 %v1147_v1, %v1086_v26  ;;  %v458_v5 = vmul.f32 1.442695, %v409_v50  ;;  %v241_v56 = vld [vmem:[%s986_s22 + $0xb8] sm:$0xff]  ;;  %v244_v57 = vld [vmem:[%s986_s22 + $0xd0] sm:$0xff] }
  0x42   : > { %688 = vst.msk [vmem:[%s1141_s30 + $0x38] sm:$0xff] %vm680_vm0, %v655_v58  ;;  %v596_v4 = vadd.f32 2.0, %v532_v59  ;;  %v853_v11 = vpop.eup %852  ;;  %v657_v12 = vmul.f32 %v851_v3, %v1145_v10  ;;  %v460_v8 = vmul.f32 1.442695, %v410_v51  ;;  %v462_v19 = vmul.f32 1.442695, %v411_v60 }
  0x43   : > { %689 = vst.msk [vmem:[%s1141_s30 + $0x40] sm:$0xff] %vm680_vm0, %v656_v40  ;;  %v412_v13 = vmin.f32 %v1207_v61, 20.0  ;;  %v855_v15 = vpop.eup %854  ;;  %v658_v26 = vmul.f32 %v853_v11, %v1152_v9  ;;  %v1222_v1 = vadd.f32 %v349_v62, %v317_v7  ;;  %v279_v14 = vmul.f32 %v980_v0, %v240_v63  ;;  %v245_v58 = vld [vmem:[%s986_s22 + $0xd8] sm:$0xff]  ;;  %v352_v63 = vld [vmem:[%s992_s25 + $0xc0] sm:$0xff] }
  0x44   : > { %864 = vrcp.f32 %v596_v4  ;;  %690 = vst.msk [vmem:[%s1141_s30 + $0x48] sm:$0xff] %vm680_vm0, %v657_v12  ;;  %v501_v16 = vadd.f32 2.0, %v855_v15  ;;  %v280_v17 = vmul.f32 %v980_v0, %v241_v56  ;;  %v281_v45 = vmul.f32 %v980_v0, %v242_v32  ;;  %v353_v12 = vld [vmem:[%s992_s25 + $0xc8] sm:$0xff] }
  0x45   : > { %v857_v20 = vpop.eup %856  ;;  %866 = vpow2.f32 %v458_v5  ;;  %v464_v10 = vmul.f32 1.442695, %v412_v13  ;;  %691 = vst.msk [vmem:[%s1141_s30 + $0x50] sm:$0xff] %vm680_vm0, %v658_v26  ;;  %v413_v23 = vmin.f32 %v1222_v1, 20.0  ;;  %v318_v27 = vadd.f32 %v998_v2, %v279_v14  ;;  %v354_v26 = vld [vmem:[%s992_s25 + $0xd0] sm:$0xff]  ;;  %v355_v14 = vld [vmem:[%s992_s25 + $0xd8] sm:$0xff] }
  0x46   : > { %v859_v22 = vpop.eup %858  ;;  %v659_v9 = vmul.f32 %v857_v20, %v563_v52  ;;  %868 = vpow2.f32 %v460_v8  ;;  %v533_v6 = vmul.f32 %v855_v15, %v501_v16  ;;  %v319_v31 = vadd.f32 %v998_v2, %v280_v17 }
  0x47   : > { %v861_v24 = vpop.eup %860  ;;  %v502_v30 = vadd.f32 2.0, %v859_v22  ;;  %870 = vpow2.f32 %v462_v19  ;;  %v466_v25 = vmul.f32 1.442695, %v413_v23  ;;  %v1238_v34 = vadd.f32 %v350_v21, %v318_v27 }
  0x48   : > { %692 = vst.msk [vmem:[%s1141_s30 + $0x58] sm:$0xff] %vm680_vm0, %v659_v9  ;;  %v503_v33 = vadd.f32 2.0, %v861_v24  ;;  %872 = vpow2.f32 %v464_v10  ;;  %v597_v39 = vadd.f32 2.0, %v533_v6  ;;  %v1240_v41 = vadd.f32 %v351_v28, %v319_v31 }
  0x49   : > { %v534_v35 = vmul.f32 %v859_v22, %v502_v30  ;;  %v863_v43 = vpop.eup %862  ;;  %874 = vpow2.f32 %v466_v25  ;;  %v414_v44 = vmin.f32 %v1238_v34, 20.0  ;;  %v564_v47 = vmul.f32 %v532_v59, %v1094_v37 }
  0x4a   : > { %v535_v29 = vmul.f32 %v861_v24, %v503_v33  ;;  %876 = vrcp.f32 %v597_v39  ;;  %v504_v54 = vadd.f32 2.0, %v863_v43  ;;  %v415_v51 = vmin.f32 %v1240_v41, 20.0 }
  0x4b   : > { %v598_v48 = vadd.f32 2.0, %v534_v35  ;;  %v468_v40 = vmul.f32 1.442695, %v414_v44  ;;  %v320_v62 = vadd.f32 %v998_v2, %v281_v45  ;;  %v282_v3 = vmul.f32 %v980_v0, %v243_v46 }
  0x4c   : > { %v599_v50 = vadd.f32 2.0, %v535_v29  ;;  %v536_v60 = vmul.f32 %v863_v43, %v504_v54  ;;  %v470_v37 = vmul.f32 1.442695, %v415_v51  ;;  %v283_v59 = vmul.f32 %v980_v0, %v244_v57 }
  0x4d   : > { %878 = vrcp.f32 %v598_v48  ;;  %v284_v4 = vmul.f32 %v980_v0, %v245_v58  ;;  %v565_v56 = vmul.f32 %v533_v6, %v1096_v38  ;;  %v1256_v13 = vadd.f32 %v352_v63, %v320_v62  ;;  %v247_v63 = vld [vmem:[%s986_s22 + $0xe8] sm:$0xff] }
  0x4e   : > { %v865_v52 = vpop.eup %864  ;;  %880 = vrcp.f32 %v599_v50  ;;  %v600_v11 = vadd.f32 2.0, %v536_v60  ;;  %v321_v15 = vadd.f32 %v998_v2, %v282_v3  ;;  %v322_v10 = vadd.f32 %v998_v2, %v283_v59 }
  0x4f   : > { %v867_v5 = vpop.eup %866  ;;  %v660_v7 = vmul.f32 %v865_v52, %v564_v47  ;;  %882 = vpow2.f32 %v468_v40  ;;  %v323_v38 = vadd.f32 %v998_v2, %v284_v4  ;;  %v416_v9 = vmin.f32 %v1256_v13, 20.0  ;;  %v246_v40 = vld [vmem:[%s986_s22 + $0xe0] sm:$0xff] }
  0x50   : > { %v869_v8 = vpop.eup %868  ;;  %v505_v19 = vadd.f32 2.0, %v867_v5  ;;  %884 = vpow2.f32 %v470_v37  ;;  %v1266_v23 = vadd.f32 %v353_v12, %v321_v15  ;;  %v1268_v24 = vadd.f32 %v354_v26, %v322_v10 }
  0x51   : > { %v871_v20 = vpop.eup %870  ;;  %693 = vst.msk [vmem:[%s1141_s30 + $0x60] sm:$0xff] %vm680_vm0, %v660_v7  ;;  %886 = vrcp.f32 %v600_v11  ;;  %v506_v16 = vadd.f32 2.0, %v869_v8  ;;  %v1270_v6 = vadd.f32 %v355_v14, %v323_v38  ;;  %v566_v31 = vmul.f32 %v534_v35, %v1103_v55 }
  0x52   : > { %v873_v21 = vpop.eup %872  ;;  %v537_v17 = vmul.f32 %v867_v5, %v505_v19  ;;  %v507_v22 = vadd.f32 2.0, %v871_v20  ;;  %v567_v32 = vmul.f32 %v535_v29, %v1125_v42  ;;  %v568_v43 = vmul.f32 %v536_v60, %v1165_v18 }
  0x53   : > { %v538_v27 = vmul.f32 %v869_v8, %v506_v16  ;;  %v508_v28 = vadd.f32 2.0, %v873_v21  ;;  %v875_v30 = vpop.eup %874  ;;  %v472_v54 = vmul.f32 1.442695, %v416_v9  ;;  %v417_v29 = vmin.f32 %v1266_v23, 20.0  ;;  %v356_v8 = vld [vmem:[%s992_s25 + $0xe0] sm:$0xff]  ;;  %v249_v16 = vld [vmem:[%s986_s22 + $0xf8] sm:$0xff] }
  0x54   : > { %v601_v33 = vadd.f32 2.0, %v537_v17  ;;  %v539_v25 = vmul.f32 %v871_v20, %v507_v22  ;;  %v877_v39 = vpop.eup %876  ;;  %v509_v46 = vadd.f32 2.0, %v875_v30  ;;  %v569_v58 = vmul.f32 %v537_v17, %v1190_v36  ;;  %v357_v20 = vld [vmem:[%s992_s25 + $0xe8] sm:$0xff] }
  0x55   : > { %v602_v44 = vadd.f32 2.0, %v538_v27  ;;  %v540_v45 = vmul.f32 %v873_v21, %v508_v28  ;;  %v661_v47 = vmul.f32 %v877_v39, %v565_v56  ;;  %v418_v50 = vmin.f32 %v1268_v24, 20.0  ;;  %v248_v56 = vld [vmem:[%s986_s22 + $0xf0] sm:$0xff] }
  0x56   : > { %888 = vrcp.f32 %v601_v33  ;;  %v603_v48 = vadd.f32 2.0, %v539_v25  ;;  %v541_v42 = vmul.f32 %v875_v30, %v509_v46  ;;  %v570_v36 = vmul.f32 %v538_v27, %v1195_v49  ;;  %v358_v28 = vld [vmem:[%s992_s25 + $0xf0] sm:$0xff] }
  0x57   : > { %v879_v57 = vpop.eup %878  ;;  %890 = vrcp.f32 %v602_v44  ;;  %v604_v55 = vadd.f32 2.0, %v540_v45  ;;  %694 = vst.msk [vmem:[%s1141_s30 + $0x68] sm:$0xff] %vm680_vm0, %v661_v47  ;;  %v474_v37 = vmul.f32 1.442695, %v417_v29  ;;  %v476_v59 = vmul.f32 1.442695, %v418_v50 }
  0x58   : > { %v881_v35 = vpop.eup %880  ;;  %v662_v18 = vmul.f32 %v879_v57, %v566_v31  ;;  %892 = vrcp.f32 %v603_v48  ;;  %v605_v62 = vadd.f32 2.0, %v541_v42  ;;  %v419_v5 = vmin.f32 %v1270_v6, 20.0 }
  0x59   : > { %v883_v51 = vpop.eup %882  ;;  %v663_v60 = vmul.f32 %v881_v35, %v567_v32  ;;  %894 = vrcp.f32 %v604_v55  ;;  %v285_v7 = vmul.f32 %v980_v0, %v246_v40  ;;  %v286_v19 = vmul.f32 %v980_v0, %v247_v63 }
  0x5a   : > { %v885_v3 = vpop.eup %884  ;;  %695 = vst.msk [vmem:[%s1141_s30 + $0x70] sm:$0xff] %vm680_vm0, %v662_v18  ;;  %v510_v52 = vadd.f32 2.0, %v883_v51  ;;  %896 = vpow2.f32 %v472_v54  ;;  %v478_v26 = vmul.f32 1.442695, %v419_v5  ;;  %v571_v10 = vmul.f32 %v539_v25, %v1197_v53 }
  0x5b   : > { %v887_v4 = vpop.eup %886  ;;  %696 = vst.msk [vmem:[%s1141_s30 + $0x78] sm:$0xff] %vm680_vm0, %v663_v60  ;;  %898 = vrcp.f32 %v605_v62  ;;  %v511_v49 = vadd.f32 2.0, %v885_v3  ;;  %v324_v14 = vadd.f32 %v998_v2, %v285_v7  ;;  %v325_v21 = vadd.f32 %v998_v2, %v286_v19 }
  0x5c   : > { %v664_v11 = vmul.f32 %v887_v4, %v568_v43  ;;  %v542_v12 = vmul.f32 %v883_v51, %v510_v52  ;;  %900 = vpow2.f32 %v474_v37  ;;  %v287_v17 = vmul.f32 %v980_v0, %v248_v56  ;;  %v359_v43 = vld [vmem:[%s992_s25 + $0xf8] sm:$0xff] }
  0x5d   : > { %v543_v15 = vmul.f32 %v885_v3, %v511_v49  ;;  %902 = vpow2.f32 %v476_v59  ;;  %v572_v22 = vmul.f32 %v540_v45, %v1207_v61  ;;  %v1301_v27 = vadd.f32 %v356_v8, %v324_v14 }
  0x5e   : > { %697 = vst.msk [vmem:[%s1141_s30 + $0x80] sm:$0xff] %vm680_vm0, %v664_v11  ;;  %v606_v38 = vadd.f32 2.0, %v542_v12  ;;  %904 = vpow2.f32 %v478_v26  ;;  %v1304_v31 = vadd.f32 %v357_v20, %v325_v21  ;;  %v326_v53 = vadd.f32 %v998_v2, %v287_v17 }
  0x5f   : > { %v607_v9 = vadd.f32 2.0, %v543_v15  ;;  %v288_v32 = vmul.f32 %v980_v0, %v249_v16  ;;  %v573_v39 = vmul.f32 %v541_v42, %v1222_v1  ;;  %v420_v61 = vmin.f32 %v1301_v27, 20.0 }
  0x60   : > { %v889_v30 = vpop.eup %888  ;;  %906 = vrcp.f32 %v606_v38  ;;  %v421_v46 = vmin.f32 %v1304_v31, 20.0  ;;  %v1312_v47 = vadd.f32 %v358_v28, %v326_v53  ;;  %v575_v3 = vmul.f32 %v543_v15, %v1240_v41 }
  0x61   : > { %v891_v33 = vpop.eup %890  ;;  %v665_v25 = vmul.f32 %v889_v30, %v569_v58  ;;  %908 = vrcp.f32 %v607_v9  ;;  %v327_v48 = vadd.f32 %v998_v2, %v288_v32  ;;  %v480_v57 = vmul.f32 1.442695, %v420_v61 }
  0x62   : > { %v893_v44 = vpop.eup %892  ;;  %v666_v45 = vmul.f32 %v891_v33, %v570_v36  ;;  %v482_v55 = vmul.f32 1.442695, %v421_v46  ;;  %v422_v42 = vmin.f32 %v1312_v47, 20.0  ;;  %v574_v36 = vmul.f32 %v542_v12, %v1238_v34 }
  0x63   : > { %v895_v0 = vpop.eup %894  ;;  %698 = vst.msk [vmem:[%s1141_s30 + $0x88] sm:$0xff] %vm680_vm0, %v665_v25  ;;  %v667_v54 = vmul.f32 %v893_v44, %v571_v10  ;;  %v1320_v35 = vadd.f32 %v359_v43, %v327_v48  ;;  %910 = vpow2.f32 %v480_v57 }
  0x64   : > { %v897_v1 = vpop.eup %896  ;;  %699 = vst.msk [vmem:[%s1141_s30 + $0x90] sm:$0xff] %vm680_vm0, %v666_v45  ;;  %v668_v58 = vmul.f32 %v895_v0, %v572_v22  ;;  %912 = vpow2.f32 %v482_v55  ;;  %v484_v40 = vmul.f32 1.442695, %v422_v42 }
  0x65   : > { %v899_v18 = vpop.eup %898  ;;  %700 = vst.msk [vmem:[%s1141_s30 + $0x98] sm:$0xff] %vm680_vm0, %v667_v54  ;;  %v512_v2 = vadd.f32 2.0, %v897_v1  ;;  %v423_v51 = vmin.f32 %v1320_v35, 20.0 }
  0x66   : > { %v901_v29 = vpop.eup %900  ;;  %701 = vst.msk [vmem:[%s1141_s30 + $0xa0] sm:$0xff] %vm680_vm0, %v668_v58  ;;  %v669_v50 = vmul.f32 %v899_v18, %v573_v39  ;;  %914 = vpow2.f32 %v484_v40 }
  0x67   : > { %v903_v60 = vpop.eup %902  ;;  %v544_v62 = vmul.f32 %v897_v1, %v512_v2  ;;  %v513_v63 = vadd.f32 2.0, %v901_v29  ;;  %v486_v37 = vmul.f32 1.442695, %v423_v51 }
  0x68   : > { %702 = vst.msk [vmem:[%s1141_s30 + $0xa8] sm:$0xff] %vm680_vm0, %v669_v50  ;;  %v514_v52 = vadd.f32 2.0, %v903_v60  ;;  %v905_v59 = vpop.eup %904 }
  0x69   : > { %v608_v4 = vadd.f32 2.0, %v544_v62  ;;  %v545_v49 = vmul.f32 %v901_v29, %v513_v63  ;;  %v515_v56 = vadd.f32 2.0, %v905_v59  ;;  %916 = vpow2.f32 %v486_v37 }
  0x6a   : > { %v907_v5 = vpop.eup %906  ;;  %v546_v7 = vmul.f32 %v903_v60, %v514_v52  ;;  %v576_v38 = vmul.f32 %v544_v62, %v1256_v13 }
  0x6b   : > { %v909_v11 = vpop.eup %908  ;;  %v670_v34 = vmul.f32 %v907_v5, %v574_v36  ;;  %918 = vrcp.f32 %v608_v4  ;;  %v609_v12 = vadd.f32 2.0, %v545_v49  ;;  %v547_v26 = vmul.f32 %v905_v59, %v515_v56 }
  0x6c   : > { %v671_v8 = vmul.f32 %v909_v11, %v575_v3  ;;  %v610_v19 = vadd.f32 2.0, %v546_v7  ;;  %v577_v28 = vmul.f32 %v545_v49, %v1266_v23  ;;  %v578_v32 = vmul.f32 %v546_v7, %v1268_v24 }
  0x6d   : > { %703 = vst.msk [vmem:[%s1141_s30 + $0xb0] sm:$0xff] %vm680_vm0, %v670_v34  ;;  %920 = vrcp.f32 %v609_v12  ;;  %v611_v41 = vadd.f32 2.0, %v547_v26  ;;  %v911_v15 = vpop.eup %910  ;;  %v579_v13 = vmul.f32 %v547_v26, %v1270_v6 }
  0x6e   : > { %704 = vst.msk [vmem:[%s1141_s30 + $0xb8] sm:$0xff] %vm680_vm0, %v671_v8  ;;  %922 = vrcp.f32 %v610_v19  ;;  %v913_v14 = vpop.eup %912  ;;  %v516_v20 = vadd.f32 2.0, %v911_v15 }
  0x6f   : > { %924 = vrcp.f32 %v611_v41  ;;  %v517_v16 = vadd.f32 2.0, %v913_v14 }
  0x70   : > { %v915_v10 = vpop.eup %914  ;;  %v548_v21 = vmul.f32 %v911_v15, %v516_v20 }
  0x71   : > { %v549_v17 = vmul.f32 %v913_v14, %v517_v16  ;;  %v518_v22 = vadd.f32 2.0, %v915_v10 }
  0x72   : > { %v612_v30 = vadd.f32 2.0, %v548_v21  ;;  %v580_v6 = vmul.f32 %v548_v21, %v1301_v27 }
  0x73   : > { %v917_v9 = vpop.eup %916  ;;  %v613_v33 = vadd.f32 2.0, %v549_v17  ;;  %v550_v25 = vmul.f32 %v915_v10, %v518_v22  ;;  %v581_v57 = vmul.f32 %v549_v17, %v1304_v31 }
  0x74   : > { %v519_v39 = vadd.f32 2.0, %v917_v9  ;;  %926 = vrcp.f32 %v612_v30 }
  0x75   : > { %v919_v53 = vpop.eup %918  ;;  %928 = vrcp.f32 %v613_v33  ;;  %v614_v44 = vadd.f32 2.0, %v550_v25  ;;  %v582_v58 = vmul.f32 %v550_v25, %v1312_v47 }
  0x76   : > { %v672_v61 = vmul.f32 %v919_v53, %v576_v38  ;;  %v551_v45 = vmul.f32 %v917_v9, %v519_v39 }
  0x77   : > { %v921_v43 = vpop.eup %920  ;;  %930 = vrcp.f32 %v614_v44 }
  0x78   : > { %v923_v46 = vpop.eup %922  ;;  %705 = vst.msk [vmem:[%s1141_s30 + $0xc0] sm:$0xff] %vm680_vm0, %v672_v61  ;;  %v673_v23 = vmul.f32 %v921_v43, %v577_v28  ;;  %v615_v24 = vadd.f32 2.0, %v551_v45  ;;  %v583_v2 = vmul.f32 %v551_v45, %v1320_v35 }
  0x79   : > { %v674_v48 = vmul.f32 %v923_v46, %v578_v32  ;;  %v925_v0 = vpop.eup %924 }
  0x7a   : > { %706 = vst.msk [vmem:[%s1141_s30 + $0xc8] sm:$0xff] %vm680_vm0, %v673_v23  ;;  %v675_v54 = vmul.f32 %v925_v0, %v579_v13  ;;  %932 = vrcp.f32 %v615_v24 }
  0x7b   : > { %707 = vst.msk [vmem:[%s1141_s30 + $0xd0] sm:$0xff] %vm680_vm0, %v674_v48 }
  0x7c   : > { %708 = vst.msk [vmem:[%s1141_s30 + $0xd8] sm:$0xff] %vm680_vm0, %v675_v54 }
  0x7e   : > { %v927_v1 = vpop.eup %926 }
  0x7f   : > { %v929_v55 = vpop.eup %928  ;;  %v676_v42 = vmul.f32 %v927_v1, %v580_v6 }
  0x80   : > { %v677_v18 = vmul.f32 %v929_v55, %v581_v57 }
  0x81   : > { %v931_v29 = vpop.eup %930  ;;  %709 = vst.msk [vmem:[%s1141_s30 + $0xe0] sm:$0xff] %vm680_vm0, %v676_v42 }
  0x82   : > { %710 = vst.msk [vmem:[%s1141_s30 + $0xe8] sm:$0xff] %vm680_vm0, %v677_v18  ;;  %v678_v50 = vmul.f32 %v931_v29, %v582_v58 }
  0x84   : > { %v933_v40 = vpop.eup %932  ;;  %711 = vst.msk [vmem:[%s1141_s30 + $0xf0] sm:$0xff] %vm680_vm0, %v678_v50 }
  0x85   : > { %v679_v27 = vmul.f32 %v933_v40, %v583_v2 }
  0x87   : > { %712 = vst.msk [vmem:[%s1141_s30 + $0xf8] sm:$0xff] %vm680_vm0, %v679_v27 }
  0x88 PF: > { %s14_s15 = sadd.s32 1, %s940_s15  }
  0x89   : > { %p11_p4 = scmp.ge.s32.totalorder %s14_s15, 4  }
  0x8b   :  { %13 = sbr.rel (!%p11_p4) target bundleno = 1 (0x1), region = 69 }

// kernel: basic_block_forward.3
= control target key start
LH: loop header
LB: loop body
LE: loop exit
PB: predicated region body
PF: predicated region fallthrough
CT: control target
= control target key end

     0   :  { %s4298_s18 = smov 0   ;;  %s5117_s0 = inlined_call_operand.vmem [shape: f32[2,16,16,4], index: 0, kind: input, shape index: {}]   ;;  %s5118_s1 = inlined_call_operand.vmem [shape: bf16[9,4,4], index: 1, kind: input, shape index: {}]   ;;  %s5119_s2 = inlined_call_operand.vmem [shape: f32[1,4], index: 2, kind: input, shape index: {}]   ;;  %s5120_s3 = inlined_call_operand.vmem [shape: f32[1,4], index: 3, kind: input, shape index: {}]   ;;  %s5121_s4 = inlined_call_operand.vmem [shape: f32[2,256,4], index: 4, kind: output, shape index: {0}]   ;;  %s5122_s5 = inlined_call_operand.vmem [shape: f32[2,2,4], index: 5, kind: output, shape index: {1}]  }
   0x1 LB: > { %s3357_s2 = sadd.s32 4294967295, %s4265_s18   ;;  %p3361_p0 = scmp.ge.s32.totalorder %s4265_s18, 1  ;;  %s4265_s18 = sphi %s4298_s18, %s16_s18  }
   0x2   : > { %p190_p1 = scmp.lt.s32.totalorder %s4265_s18, 3 }
   0x4   : > { %p191_p2 = pnand %p3361_p0, %p190_p1 }
   0x5   : > { %v3367_v0 = vld [vmem:[%s5118_s1 + $0x2] sm:$0x3] (!%p191_p2)  ;;  %vm628_vm0 = vcmask (!%p191_p2), 1041408   ;;  %v4312_v1 = vld [vmem:[%s5118_s1 + $0x8] sm:$0x3] (!%p191_p2)  ;;  %vm269_vm1 = vcmask (!%p191_p2), 31744  }
   0x6   : > { %194 = sbr.rel (%p191_p2) target bundleno = 560 (0x230), region = 36  ;;  %4240 = vmatprep.subr.msk.bf16.mxu1 (!%p191_p2), %vm628_vm0, %v3367_v0  ;;  %4244 = vmatprep.subr.msk.bf16.mxu0 (!%p191_p2), %vm628_vm0, %v4312_v1  ;;  %v630_v2 = vsel (!%p191_p2), %vm628_vm0, %v3367_v0, 0  ;;  %v4320_v3 = vsel (!%p191_p2), %vm628_vm0, %v4312_v1, 0  ;;  %p4324_p3 = scmp.lt.s32.totalorder (!%p191_p2), %s3357_s2, 1  ;;  %v4331_v4 = vld [vmem:[%s5118_s1] sm:$0x3] (!%p191_p2) }
   0x7   : > { %3677 = vmatpush3.bf16.msra.mxu1 (!%p191_p2), %v630_v2  ;;  %3813 = vmatpush3.bf16.msra.mxu0 (!%p191_p2), %v4320_v3  ;;  %v4267_v5 = vmov (!%p191_p2), 0.0   ;;  %v4349_v6 = vld [vmem:[%s5118_s1 + $0xa] sm:$0x3] (!%p191_p2)  ;;  %vm284_vm2 = vcmask (!%p191_p2), 24576   ;;  %vm384_vm3 = vcmask (!%p191_p2), 30720   ;;  %v842_v36 = vsel (!%p191_p2), %vm628_vm0, %v4331_v4, 0 }
   0x8   : > { %272 = vst.msk [vmem:[#allocation2 + $0x120] sm:$0xff] (!%p191_p2), %vm269_vm1, %v4267_v5  ;;  %273 = vst.msk [vmem:[#allocation2 + $0x128] sm:$0xff] (!%p191_p2), %vm269_vm1, %v4267_v5  ;;  %4241 = vmatprep.subr.msk.bf16.mxu1 (!%p191_p2), %vm628_vm0, %v4331_v4  ;;  %4246 = vmatprep.subr.msk.bf16.mxu0 (!%p191_p2), %vm628_vm0, %v4349_v6  ;;  %v1987_v41 = vsel (!%p191_p2), %vm628_vm0, %v4349_v6, 0  ;;  %v4460_v47 = vld [vmem:[%s5118_s1 + $0xc] sm:$0x3] (!%p191_p2) }
   0x9   : > { %270 = vst.msk [vmem:[#allocation2] sm:$0xff] (!%p191_p2), %vm269_vm1, %v4267_v5  ;;  %271 = vst.msk [vmem:[#allocation2 + $0x8] sm:$0xff] (!%p191_p2), %vm269_vm1, %v4267_v5  ;;  %v4471_v50 = vld [vmem:[%s5118_s1 + $0x4] sm:$0x3] (!%p191_p2) }
   0xa   : > { %274 = vst.msk [vmem:[#allocation2 + $0x240] sm:$0xff] (!%p191_p2), %vm269_vm1, %v4267_v5  ;;  %275 = vst.msk [vmem:[#allocation2 + $0x248] sm:$0xff] (!%p191_p2), %vm269_vm1, %v4267_v5 }
   0xb   : > { %277 = vst.msk [vmem:[#allocation2 + $0x110] sm:$0xff] (!%p191_p2), %vm269_vm1, %v4267_v5  ;;  %278 = vst.msk [vmem:[#allocation2 + $0x118] sm:$0xff] (!%p191_p2), %vm269_vm1, %v4267_v5 }
   0xc   : > { %279 = vst.msk [vmem:[#allocation2 + $0x230] sm:$0xff] (!%p191_p2), %vm269_vm1, %v4267_v5  ;;  %280 = vst.msk [vmem:[#allocation2 + $0x238] sm:$0xff] (!%p191_p2), %vm269_vm1, %v4267_v5 }
   0xd   : > { %281 = vst.msk [vmem:[#allocation2 + $0x350] sm:$0xff] %vm269_vm1, %v4267_v5  ;;  %282 = vst.msk [vmem:[#allocation2 + $0x358] sm:$0xff] %vm269_vm1, %v4267_v5  ;;  %s5125_s2 = smov (!%p4324_p3, %s3357_s2), 1 }
   0xe   : > { %302 = vst.msk [vmem:[#allocation2 + $0x25f] sm:$0x1] %vm284_vm2, %v4267_v5  ;;  %285 = vst.msk [vmem:[#allocation2 + $0x10] sm:$0x1] %vm284_vm2, %v4267_v5  ;;  %s3521_s27 = sshll.u32 %s5125_s2, 8  ;;  %s3366_s19 = sshll.u32 %s5125_s2, 1 }
   0xf   : > { %286 = vst.msk [vmem:[#allocation2 + $0x20] sm:$0x1] %vm284_vm2, %v4267_v5  ;;  %287 = vst.msk [vmem:[#allocation2 + $0x30] sm:$0x1] %vm284_vm2, %v4267_v5  ;;  %s4399_s30 = scalar_lea.vmem %s5117_s0, %s3521_s27  ;;  %v530_v13 = vld [vmem:[#allocation2 + $0x120] sm:$0xff]  ;;  %v531_v14 = vld [vmem:[#allocation2 + $0x128] sm:$0xff]  ;;  %s4970_s3 = scalar_lea.vmem %s5121_s4, %s3521_s27 }
  0x10   : > { %288 = vst.msk [vmem:[#allocation2 + $0x40] sm:$0x1] %vm284_vm2, %v4267_v5  ;;  %289 = vst.msk [vmem:[#allocation2 + $0x50] sm:$0x1] %vm284_vm2, %v4267_v5  ;;  %v237_v7 = vld [vmem:[%s4399_s30] sm:$0xff]  ;;  %v238_v8 = vld [vmem:[%s4399_s30 + $0x8] sm:$0xff]  ;;  %v562_v16 = vpack.c.bf16 %v531_v14, %v530_v13  ;;  %s235_s22 = scalar_lea.vmem %s5122_s5, %s3366_s19 }
  0x11   : > { %290 = vst.msk [vmem:[#allocation2 + $0x60] sm:$0x1] %vm284_vm2, %v4267_v5  ;;  %291 = vst.msk [vmem:[#allocation2 + $0x70] sm:$0x1] %vm284_vm2, %v4267_v5  ;;  %v239_v9 = vld [vmem:[%s4399_s30 + $0x10] sm:$0xff]  ;;  %v240_v10 = vld [vmem:[%s4399_s30 + $0x18] sm:$0xff] }
  0x12   : > { %292 = vst.msk [vmem:[#allocation2 + $0x80] sm:$0x1] %vm284_vm2, %v4267_v5  ;;  %293 = vst.msk [vmem:[#allocation2 + $0x90] sm:$0x1] %vm284_vm2, %v4267_v5  ;;  %v241_v11 = vld [vmem:[%s4399_s30 + $0x20] sm:$0xff]  ;;  %v242_v12 = vld [vmem:[%s4399_s30 + $0x28] sm:$0xff]  ;;  %3678 = vmatprep.mubr.msk.bf16.mxu1 %vm269_vm1, %v562_v16 }
  0x13   : > { %294 = vst.msk [vmem:[#allocation2 + $0xa0] sm:$0x1] %vm284_vm2, %v4267_v5  ;;  %295 = vst.msk [vmem:[#allocation2 + $0xb0] sm:$0x1] %vm284_vm2, %v4267_v5  ;;  %v243_v15 = vld [vmem:[%s4399_s30 + $0x30] sm:$0xff]  ;;  %v244_v17 = vld [vmem:[%s4399_s30 + $0x38] sm:$0xff] }
  0x14   : > { %296 = vst.msk [vmem:[#allocation2 + $0xc0] sm:$0x1] %vm284_vm2, %v4267_v5  ;;  %297 = vst.msk [vmem:[#allocation2 + $0xd0] sm:$0x1] %vm284_vm2, %v4267_v5  ;;  %v245_v18 = vld [vmem:[%s4399_s30 + $0x40] sm:$0xff]  ;;  %v246_v19 = vld [vmem:[%s4399_s30 + $0x48] sm:$0xff] }
  0x15   : > { %298 = vst.msk [vmem:[#allocation2 + $0xe0] sm:$0x1] %vm284_vm2, %v4267_v5  ;;  %299 = vst.msk [vmem:[#allocation2 + $0xf0] sm:$0x1] %vm284_vm2, %v4267_v5  ;;  %v247_v20 = vld [vmem:[%s4399_s30 + $0x50] sm:$0xff]  ;;  %v248_v21 = vld [vmem:[%s4399_s30 + $0x58] sm:$0xff] }
  0x16   : > { %300 = vst.msk [vmem:[#allocation2 + $0x100] sm:$0x1] %vm284_vm2, %v4267_v5  ;;  %303 = vst.msk [vmem:[#allocation2 + $0x26f] sm:$0x1] %vm284_vm2, %v4267_v5  ;;  %v249_v22 = vld [vmem:[%s4399_s30 + $0x60] sm:$0xff]  ;;  %v250_v23 = vld [vmem:[%s4399_s30 + $0x68] sm:$0xff] }
  0x17   : > { %304 = vst.msk [vmem:[#allocation2 + $0x27f] sm:$0x1] %vm284_vm2, %v4267_v5  ;;  %305 = vst.msk [vmem:[#allocation2 + $0x28f] sm:$0x1] %vm284_vm2, %v4267_v5  ;;  %v251_v24 = vld [vmem:[%s4399_s30 + $0x70] sm:$0xff]  ;;  %v252_v25 = vld [vmem:[%s4399_s30 + $0x78] sm:$0xff] }
  0x18   : > { %306 = vst.msk [vmem:[#allocation2 + $0x29f] sm:$0x1] %vm284_vm2, %v4267_v5  ;;  %307 = vst.msk [vmem:[#allocation2 + $0x2af] sm:$0x1] %vm284_vm2, %v4267_v5  ;;  %v253_v26 = vld [vmem:[%s4399_s30 + $0x80] sm:$0xff]  ;;  %v254_v27 = vld [vmem:[%s4399_s30 + $0x88] sm:$0xff] }
  0x19   : > { %308 = vst.msk [vmem:[#allocation2 + $0x2bf] sm:$0x1] %vm284_vm2, %v4267_v5  ;;  %309 = vst.msk [vmem:[#allocation2 + $0x2cf] sm:$0x1] %vm284_vm2, %v4267_v5  ;;  %v255_v28 = vld [vmem:[%s4399_s30 + $0x90] sm:$0xff]  ;;  %v256_v29 = vld [vmem:[%s4399_s30 + $0x98] sm:$0xff] }
  0x1a   : > { %310 = vst.msk [vmem:[#allocation2 + $0x2df] sm:$0x1] %vm284_vm2, %v4267_v5  ;;  %311 = vst.msk [vmem:[#allocation2 + $0x2ef] sm:$0x1] %vm284_vm2, %v4267_v5  ;;  %v257_v30 = vld [vmem:[%s4399_s30 + $0xa0] sm:$0xff]  ;;  %v258_v31 = vld [vmem:[%s4399_s30 + $0xa8] sm:$0xff] }
  0x1b   : > { %312 = vst.msk [vmem:[#allocation2 + $0x2ff] sm:$0x1] %vm284_vm2, %v4267_v5  ;;  %313 = vst.msk [vmem:[#allocation2 + $0x30f] sm:$0x1] %vm284_vm2, %v4267_v5  ;;  %v259_v2 = vld [vmem:[%s4399_s30 + $0xb0] sm:$0xff]  ;;  %v261_v6 = vld [vmem:[%s4399_s30 + $0xc0] sm:$0xff] }
  0x1c   : > { %314 = vst.msk [vmem:[#allocation2 + $0x31f] sm:$0x1] %vm284_vm2, %v4267_v5  ;;  %315 = vst.msk [vmem:[#allocation2 + $0x32f] sm:$0x1] %vm284_vm2, %v4267_v5  ;;  %v264_v13 = vld [vmem:[%s4399_s30 + $0xd8] sm:$0xff]  ;;  %v266_v16 = vld [vmem:[%s4399_s30 + $0xe8] sm:$0xff] }
  0x1d   : > { %316 = vst.msk [vmem:[#allocation2 + $0x33f] sm:$0x1] %vm284_vm2, %v4267_v5  ;;  %317 = vst.msk [vmem:[#allocation2 + $0x34f] sm:$0x1] %vm284_vm2, %v4267_v5  ;;  %v260_v5 = vld [vmem:[%s4399_s30 + $0xb8] sm:$0xff] }
  0x1e   : > { %319 = vst.msk [vmem:[#allocation2 + $0x130] sm:$0xff] %vm269_vm1, %v237_v7  ;;  %320 = vst.msk [vmem:[#allocation2 + $0x138] sm:$0xff] %vm269_vm1, %v238_v8  ;;  %v262_v7 = vld [vmem:[%s4399_s30 + $0xc8] sm:$0xff] }
  0x1f   : > { %321 = vst.msk [vmem:[#allocation2 + $0x140] sm:$0xff] %vm269_vm1, %v239_v9  ;;  %322 = vst.msk [vmem:[#allocation2 + $0x148] sm:$0xff] %vm269_vm1, %v240_v10 }
  0x20   : > { %323 = vst.msk [vmem:[#allocation2 + $0x150] sm:$0xff] %vm269_vm1, %v241_v11  ;;  %324 = vst.msk [vmem:[#allocation2 + $0x158] sm:$0xff] %vm269_vm1, %v242_v12  ;;  %v263_v12 = vld [vmem:[%s4399_s30 + $0xd0] sm:$0xff] }
  0x21   : > { %325 = vst.msk [vmem:[#allocation2 + $0x160] sm:$0xff] %vm269_vm1, %v243_v15  ;;  %326 = vst.msk [vmem:[#allocation2 + $0x168] sm:$0xff] %vm269_vm1, %v244_v17  ;;  %v265_v15 = vld [vmem:[%s4399_s30 + $0xe0] sm:$0xff] }
  0x22   : > { %327 = vst.msk [vmem:[#allocation2 + $0x170] sm:$0xff] %vm269_vm1, %v245_v18  ;;  %328 = vst.msk [vmem:[#allocation2 + $0x178] sm:$0xff] %vm269_vm1, %v246_v19 }
  0x23   : > { %329 = vst.msk [vmem:[#allocation2 + $0x180] sm:$0xff] %vm269_vm1, %v247_v20  ;;  %330 = vst.msk [vmem:[#allocation2 + $0x188] sm:$0xff] %vm269_vm1, %v248_v21 }
  0x24   : > { %331 = vst.msk [vmem:[#allocation2 + $0x190] sm:$0xff] %vm269_vm1, %v249_v22  ;;  %332 = vst.msk [vmem:[#allocation2 + $0x198] sm:$0xff] %vm269_vm1, %v250_v23 }
  0x25   : > { %333 = vst.msk [vmem:[#allocation2 + $0x1a0] sm:$0xff] %vm269_vm1, %v251_v24  ;;  %334 = vst.msk [vmem:[#allocation2 + $0x1a8] sm:$0xff] %vm269_vm1, %v252_v25  ;;  %v532_v32 = vld [vmem:[#allocation2 + $0x130] sm:$0xff]  ;;  %v533_v33 = vld [vmem:[#allocation2 + $0x138] sm:$0xff] }
  0x26   : > { %335 = vst.msk [vmem:[#allocation2 + $0x1b0] sm:$0xff] %vm269_vm1, %v253_v26  ;;  %336 = vst.msk [vmem:[#allocation2 + $0x1b8] sm:$0xff] %vm269_vm1, %v254_v27  ;;  %v1596_v34 = vld [vmem:[#allocation2 + $0x140] sm:$0xff]  ;;  %v563_v35 = vpack.c.bf16 %v533_v33, %v532_v32  ;;  %v1597_v37 = vld [vmem:[#allocation2 + $0x148] sm:$0xff] }
  0x27   : > { %337 = vst.msk [vmem:[#allocation2 + $0x1c0] sm:$0xff] %vm269_vm1, %v255_v28  ;;  %338 = vst.msk [vmem:[#allocation2 + $0x1c8] sm:$0xff] %vm269_vm1, %v256_v29  ;;  %v536_v38 = vld [vmem:[#allocation2 + $0x150] sm:$0xff]  ;;  %v537_v39 = vld [vmem:[#allocation2 + $0x158] sm:$0xff]  ;;  %v1627_v40 = vpack.c.bf16 %v1597_v37, %v1596_v34 }
  0x28   : > { %339 = vst.msk [vmem:[#allocation2 + $0x1d0] sm:$0xff] %vm269_vm1, %v257_v30  ;;  %340 = vst.msk [vmem:[#allocation2 + $0x1d8] sm:$0xff] %vm269_vm1, %v258_v31  ;;  %v565_v42 = vpack.c.bf16 %v537_v39, %v536_v38  ;;  %v1600_v43 = vld [vmem:[#allocation2 + $0x160] sm:$0xff]  ;;  %v416_v44 = vld [vmem:[#allocation2 + $0x131] sm:$0xff]  ;;  %3679 = vmatmul.mubr.msk.bf16.vlgmr.msra.gmra.mrb[0].mxu1 %vm269_vm1, %v563_v35  ;;  %3814 = vmatprep.mubr.msk.bf16.mxu0 %vm269_vm1, %v563_v35 }
  0x29   : > { %383 = vst.msk [vmem:[#allocation2 + $0x11] sm:$0xff] %vm269_vm1, %v532_v32  ;;  %386 = vst.msk [vmem:[#allocation2 + $0x21] sm:$0xff] %vm269_vm1, %v1596_v34  ;;  %v417_v45 = vld [vmem:[#allocation2 + $0x139] sm:$0x7f]  ;;  %v540_v46 = vld [vmem:[#allocation2 + $0x170] sm:$0xff]  ;;  %3711 = vmatpush3.bf16.msra.mxu1 %v842_v36  ;;  %3815 = vmatmul.mubr.msk.bf16.vlgmr.msra.gmra.mrb[0].mxu0 %vm269_vm1, %v1627_v40 }
  0x2a   : > { %388 = vst.msk [vmem:[#allocation2 + $0x31] sm:$0xff] %vm269_vm1, %v536_v38  ;;  %448 = vst.msk [vmem:[#allocation2 + $0x250] sm:$0xff] %vm269_vm1, %v416_v44  ;;  %v4464_v48 = vld [vmem:[#allocation2 + $0x180] sm:$0xff]  ;;  %3847 = vmatpush3.bf16.msra.mxu0 %v1987_v41  ;;  %3682 = vmatprep.mubr.msk.bf16.mxu1 %vm269_vm1, %v1627_v40  ;;  %v1601_v51 = vld [vmem:[#allocation2 + $0x168] sm:$0xff] }
  0x2b   : > { %449 = vst.msk [vmem:[#allocation2 + $0x258] sm:$0x7f] %vm384_vm3, %v417_v45  ;;  %v4466_v49 = vld [vmem:[#allocation2 + $0x190] sm:$0xff]  ;;  %3818 = vmatprep.mubr.msk.bf16.mxu0 %vm269_vm1, %v565_v42  ;;  %v541_v53 = vld [vmem:[#allocation2 + $0x178] sm:$0xff]  ;;  %4247 = vmatprep.subr.msk.bf16.mxu0 %vm628_vm0, %v4460_v47  ;;  %v418_v55 = vld [vmem:[#allocation2 + $0x141] sm:$0xff]  ;;  %v1629_v58 = vpack.c.bf16 %v1601_v51, %v1600_v43 }
  0x2c   : > { %390 = vst.msk [vmem:[#allocation2 + $0x41] sm:$0xff] %vm269_vm1, %v1600_v43  ;;  %392 = vst.msk [vmem:[#allocation2 + $0x51] sm:$0xff] %vm269_vm1, %v540_v46  ;;  %v4475_v52 = vld [vmem:[#allocation2 + $0x1a0] sm:$0xff]  ;;  %v419_v56 = vld [vmem:[#allocation2 + $0x149] sm:$0x7f]  ;;  %4242 = vmatprep.subr.msk.bf16.mxu1 %vm628_vm0, %v4471_v50  ;;  %v567_v61 = vpack.c.bf16 %v541_v53, %v540_v46 }
  0x2d   : > { %394 = vst.msk [vmem:[#allocation2 + $0x61] sm:$0xff] %vm269_vm1, %v4464_v48  ;;  %396 = vst.msk [vmem:[#allocation2 + $0x71] sm:$0xff] %vm269_vm1, %v4466_v49  ;;  %v4482_v54 = vld [vmem:[#allocation2 + $0x1b0] sm:$0xff]  ;;  %v421_v62 = vld [vmem:[#allocation2 + $0x159] sm:$0x7f] }
  0x2e   : > { %398 = vst.msk [vmem:[#allocation2 + $0x81] sm:$0xff] %vm269_vm1, %v4475_v52  ;;  %450 = vst.msk [vmem:[#allocation2 + $0x260] sm:$0xff] %vm269_vm1, %v418_v55  ;;  %v4489_v57 = vld [vmem:[#allocation2 + $0x1c0] sm:$0xff]  ;;  %v420_v60 = vld [vmem:[#allocation2 + $0x151] sm:$0xff] }
  0x2f   : > { %400 = vst.msk [vmem:[#allocation2 + $0x91] sm:$0xff] %vm269_vm1, %v4482_v54  ;;  %v4496_v59 = vld [vmem:[#allocation2 + $0x1d0] sm:$0xff]  ;;  %402 = vst.msk [vmem:[#allocation2 + $0xa1] sm:$0xff] %vm269_vm1, %v4489_v57  ;;  %v422_v63 = vld [vmem:[#allocation2 + $0x161] sm:$0xff] }
  0x30   : > { %451 = vst.msk [vmem:[#allocation2 + $0x268] sm:$0x7f] %vm384_vm3, %v419_v56  ;;  %v423_v0 = vld [vmem:[#allocation2 + $0x169] sm:$0x7f]  ;;  %453 = vst.msk [vmem:[#allocation2 + $0x278] sm:$0x7f] %vm384_vm3, %v421_v62  ;;  %3683 = vmatmul.mubr.msk.bf16.gmra.mrb[4].mxu1 %vm269_vm1, %v565_v42 }
  0x31   : > { %452 = vst.msk [vmem:[#allocation2 + $0x270] sm:$0xff] %vm269_vm1, %v420_v60  ;;  %404 = vst.msk [vmem:[#allocation2 + $0xb1] sm:$0xff] %vm269_vm1, %v4496_v59  ;;  %v1605_v4 = vld [vmem:[#allocation2 + $0x188] sm:$0xff]  ;;  %3819 = vmatmul.mubr.msk.bf16.gmra.mrb[4].mxu0 %vm269_vm1, %v1629_v58  ;;  %3686 = vmatprep.mubr.msk.bf16.mxu1 %vm269_vm1, %v1629_v58  ;;  %v424_v8 = vld [vmem:[#allocation2 + $0x171] sm:$0xff] }
  0x32   : > { %454 = vst.msk [vmem:[#allocation2 + $0x280] sm:$0xff] %vm269_vm1, %v422_v63  ;;  %341 = vst.msk [vmem:[#allocation2 + $0x1e0] sm:$0xff] %vm269_vm1, %v259_v2  ;;  %v425_v9 = vld [vmem:[#allocation2 + $0x179] sm:$0x7f]  ;;  %v426_v10 = vld [vmem:[#allocation2 + $0x181] sm:$0xff]  ;;  %3822 = vmatprep.mubr.msk.bf16.mxu0 %vm269_vm1, %v567_v61  ;;  %v1631_v19 = vpack.c.bf16 %v1605_v4, %v4464_v48  ;;  %v2282_v2 = vsel %vm628_vm0, %v4460_v47, 0 }
  0x33   : > { %455 = vst.msk [vmem:[#allocation2 + $0x288] sm:$0x7f] %vm384_vm3, %v423_v0  ;;  %457 = vst.msk [vmem:[#allocation2 + $0x298] sm:$0x7f] %vm384_vm3, %v425_v9  ;;  %v427_v11 = vld [vmem:[#allocation2 + $0x189] sm:$0x7f] }
  0x34   : > { %342 = vst.msk [vmem:[#allocation2 + $0x1e8] sm:$0xff] %vm269_vm1, %v260_v5  ;;  %343 = vst.msk [vmem:[#allocation2 + $0x1f0] sm:$0xff] %vm269_vm1, %v261_v6  ;;  %v545_v14 = vld [vmem:[#allocation2 + $0x198] sm:$0xff]  ;;  %v430_v20 = vld [vmem:[#allocation2 + $0x1a1] sm:$0xff] }
  0x35   : > { %344 = vst.msk [vmem:[#allocation2 + $0x1f8] sm:$0xff] %vm269_vm1, %v262_v7  ;;  %456 = vst.msk [vmem:[#allocation2 + $0x290] sm:$0xff] %vm269_vm1, %v424_v8  ;;  %v428_v17 = vld [vmem:[#allocation2 + $0x191] sm:$0xff]  ;;  %v429_v18 = vld [vmem:[#allocation2 + $0x199] sm:$0x7f]  ;;  %v569_v22 = vpack.c.bf16 %v545_v14, %v4466_v49 }
  0x36   : > { %458 = vst.msk [vmem:[#allocation2 + $0x2a0] sm:$0xff] %vm269_vm1, %v426_v10  ;;  %345 = vst.msk [vmem:[#allocation2 + $0x200] sm:$0xff] %vm269_vm1, %v263_v12  ;;  %v431_v21 = vld [vmem:[#allocation2 + $0x1a9] sm:$0x7f]  ;;  %v1888_v26 = vld [vmem:[#allocation2 + $0x250] sm:$0xff] }
  0x37   : > { %459 = vst.msk [vmem:[#allocation2 + $0x2a8] sm:$0x7f] %vm384_vm3, %v427_v11  ;;  %461 = vst.msk [vmem:[#allocation2 + $0x2b8] sm:$0x7f] %vm384_vm3, %v429_v18  ;;  %v1609_v25 = vld [vmem:[#allocation2 + $0x1a8] sm:$0xff]  ;;  %v1889_v28 = vld [vmem:[#allocation2 + $0x258] sm:$0xff] }
  0x38   : > { %346 = vst.msk [vmem:[#allocation2 + $0x208] sm:$0xff] %vm269_vm1, %v264_v13  ;;  %347 = vst.msk [vmem:[#allocation2 + $0x210] sm:$0xff] %vm269_vm1, %v265_v15  ;;  %3687 = vmatmul.mubr.msk.bf16.gmra.mrb[8].mxu1 %vm269_vm1, %v567_v61  ;;  %v352_v30 = vld [vmem:[#allocation2 + $0x138] sm:$0x7f]  ;;  %v1633_v31 = vpack.c.bf16 %v1609_v25, %v4475_v52  ;;  %v4558_v33 = vpack.c.bf16 %v1889_v28, %v1888_v26  ;;  %v434_v35 = vld [vmem:[#allocation2 + $0x1c1] sm:$0xff] }
  0x39   : > { %348 = vst.msk [vmem:[#allocation2 + $0x218] sm:$0xff] %vm269_vm1, %v266_v16  ;;  %460 = vst.msk [vmem:[#allocation2 + $0x2b0] sm:$0xff] %vm269_vm1, %v428_v17  ;;  %v4536_v23 = vld [vmem:[#allocation2 + $0x1e0] sm:$0xff]  ;;  %3823 = vmatmul.mubr.msk.bf16.gmra.mrb[8].mxu0 %vm269_vm1, %v1631_v19  ;;  %3690 = vmatprep.mubr.msk.bf16.mxu1 %vm269_vm1, %v1631_v19  ;;  %v432_v32 = vld [vmem:[#allocation2 + $0x1b1] sm:$0xff] }
  0x3a   : > { %462 = vst.msk [vmem:[#allocation2 + $0x2c0] sm:$0xff] %vm269_vm1, %v430_v20  ;;  %406 = vst.msk [vmem:[#allocation2 + $0xc1] sm:$0xff] %vm269_vm1, %v4536_v23  ;;  %3826 = vmatprep.mubr.msk.bf16.mxu0 %vm269_vm1, %v569_v22  ;;  %v433_v34 = vld [vmem:[#allocation2 + $0x1b9] sm:$0x7f]  ;;  %v435_v36 = vld [vmem:[#allocation2 + $0x1c9] sm:$0x7f] }
  0x3b   : > { %463 = vst.msk [vmem:[#allocation2 + $0x2c8] sm:$0x7f] %vm384_vm3, %v431_v21  ;;  %v4539_v24 = vld [vmem:[#allocation2 + $0x1f0] sm:$0xff]  ;;  %385 = vst.msk [vmem:[#allocation2 + $0x19] sm:$0x7f] %vm384_vm3, %v352_v30  ;;  %v549_v37 = vld [vmem:[#allocation2 + $0x1b8] sm:$0xff] }
  0x3c   : > { %408 = vst.msk [vmem:[#allocation2 + $0xd1] sm:$0xff] %vm269_vm1, %v4539_v24  ;;  %464 = vst.msk [vmem:[#allocation2 + $0x2d0] sm:$0xff] %vm269_vm1, %v432_v32  ;;  %v354_v38 = vld [vmem:[#allocation2 + $0x148] sm:$0x7f]  ;;  %v356_v39 = vld [vmem:[#allocation2 + $0x158] sm:$0x7f]  ;;  %v571_v56 = vpack.c.bf16 %v549_v37, %v4482_v54 }
  0x3d   : > { %v4548_v27 = vld [vmem:[#allocation2 + $0x200] sm:$0xff]  ;;  %465 = vst.msk [vmem:[#allocation2 + $0x2d8] sm:$0x7f] %vm384_vm3, %v433_v34  ;;  %467 = vst.msk [vmem:[#allocation2 + $0x2e8] sm:$0x7f] %vm384_vm3, %v435_v36  ;;  %v551_v41 = vld [vmem:[#allocation2 + $0x1c8] sm:$0xff] }
  0x3e   : > { %410 = vst.msk [vmem:[#allocation2 + $0xe1] sm:$0xff] %vm269_vm1, %v4548_v27  ;;  %466 = vst.msk [vmem:[#allocation2 + $0x2e0] sm:$0xff] %vm269_vm1, %v434_v35  ;;  %v1890_v40 = vld [vmem:[#allocation2 + $0x260] sm:$0xff]  ;;  %v436_v42 = vld [vmem:[#allocation2 + $0x1d1] sm:$0xff]  ;;  %v4583_v63 = vpack.c.bf16 %v551_v41, %v4489_v57 }
  0x3f   : > { %v4550_v29 = vld [vmem:[#allocation2 + $0x210] sm:$0xff]  ;;  %387 = vst.msk [vmem:[#allocation2 + $0x29] sm:$0x7f] %vm384_vm3, %v354_v38  ;;  %389 = vst.msk [vmem:[#allocation2 + $0x39] sm:$0x7f] %vm384_vm3, %v356_v39  ;;  %v438_v44 = vld [vmem:[#allocation2 + $0x1e1] sm:$0xff] }
  0x40   : > { %412 = vst.msk [vmem:[#allocation2 + $0xf1] sm:$0xff] %vm269_vm1, %v4550_v29  ;;  %3691 = vmatmul.mubr.msk.bf16.gmra.mrb[12].mxu1 %vm269_vm1, %v569_v22  ;;  %v437_v43 = vld [vmem:[#allocation2 + $0x1d9] sm:$0x7f]  ;;  %468 = vst.msk [vmem:[#allocation2 + $0x2f0] sm:$0xff] %vm269_vm1, %v436_v42  ;;  %v439_v45 = vld [vmem:[#allocation2 + $0x1e9] sm:$0x7f] }
  0x41   : > { %3827 = vmatmul.mubr.msk.bf16.gmra.mrb[12].mxu0 %vm269_vm1, %v1633_v31  ;;  %3694 = vmatprep.mubr.msk.bf16.mxu1 %vm269_vm1, %v1633_v31  ;;  %469 = vst.msk [vmem:[#allocation2 + $0x2f8] sm:$0x7f] %vm384_vm3, %v437_v43  ;;  %v358_v46 = vld [vmem:[#allocation2 + $0x168] sm:$0x7f]  ;;  %v1892_v49 = vld [vmem:[#allocation2 + $0x270] sm:$0xff]  ;;  %v1893_v52 = vld [vmem:[#allocation2 + $0x278] sm:$0xff] }
  0x42   : > { %3848 = vmatprep.mubr.msk.bf16.mxu0 %vm269_vm1, %v4558_v33  ;;  %v1891_v48 = vld [vmem:[#allocation2 + $0x268] sm:$0xff]  ;;  %470 = vst.msk [vmem:[#allocation2 + $0x300] sm:$0xff] %vm269_vm1, %v438_v44  ;;  %v360_v51 = vld [vmem:[#allocation2 + $0x178] sm:$0x7f]  ;;  %v4588_v54 = vpack.c.bf16 %v1893_v52, %v1892_v49  ;;  %v1894_v6 = vld [vmem:[#allocation2 + $0x280] sm:$0xff] }
  0x43   : > { %471 = vst.msk [vmem:[#allocation2 + $0x308] sm:$0x7f] %vm384_vm3, %v439_v45  ;;  %391 = vst.msk [vmem:[#allocation2 + $0x49] sm:$0x7f] %vm384_vm3, %v358_v46  ;;  %v440_v53 = vld [vmem:[#allocation2 + $0x1f1] sm:$0xff]  ;;  %v442_v58 = vld [vmem:[#allocation2 + $0x201] sm:$0xff]  ;;  %v4580_v62 = vpack.c.bf16 %v1891_v48, %v1890_v40 }
  0x44   : > { %393 = vst.msk [vmem:[#allocation2 + $0x59] sm:$0x7f] %vm384_vm3, %v360_v51  ;;  %v441_v55 = vld [vmem:[#allocation2 + $0x1f9] sm:$0x7f]  ;;  %v443_v60 = vld [vmem:[#allocation2 + $0x209] sm:$0x7f] }
  0x45   : > { %472 = vst.msk [vmem:[#allocation2 + $0x310] sm:$0xff] %vm269_vm1, %v440_v53  ;;  %v362_v61 = vld [vmem:[#allocation2 + $0x188] sm:$0x7f]  ;;  %474 = vst.msk [vmem:[#allocation2 + $0x320] sm:$0xff] %vm269_vm1, %v442_v58  ;;  %v364_v0 = vld [vmem:[#allocation2 + $0x198] sm:$0x7f] }
  0x46   : > { %473 = vst.msk [vmem:[#allocation2 + $0x318] sm:$0x7f] %vm384_vm3, %v441_v55  ;;  %475 = vst.msk [vmem:[#allocation2 + $0x328] sm:$0x7f] %vm384_vm3, %v443_v60  ;;  %v444_v4 = vld [vmem:[#allocation2 + $0x211] sm:$0xff]  ;;  %v1895_v7 = vld [vmem:[#allocation2 + $0x288] sm:$0xff] }
  0x47   : > { %395 = vst.msk [vmem:[#allocation2 + $0x69] sm:$0x7f] %vm384_vm3, %v362_v61  ;;  %397 = vst.msk [vmem:[#allocation2 + $0x79] sm:$0x7f] %vm384_vm3, %v364_v0  ;;  %v4597_v57 = vld [vmem:[%s5118_s1 + $0xe] sm:$0x3]  ;;  %v4616_v14 = vpack.c.bf16 %v1895_v7, %v1894_v6 }
  0x48   : > { %3695 = vmatmul.mubr.msk.bf16.gmra.mrb[16].mxu1 %vm269_vm1, %v571_v56  ;;  %v553_v5 = vld [vmem:[#allocation2 + $0x1d8] sm:$0xff]  ;;  %476 = vst.msk [vmem:[#allocation2 + $0x330] sm:$0xff] %vm269_vm1, %v444_v4  ;;  %v555_v47 = vld [vmem:[#allocation2 + $0x1e8] sm:$0xff]  ;;  %v267_v9 = vld [vmem:[%s4399_s30 + $0xf0] sm:$0xff] }
  0x49   : > { %3849 = vmatmul.mubr.msk.bf16.vlgmr.msra.gmra.mrb[0].mxu0 %vm269_vm1, %v4580_v62  ;;  %3698 = vmatprep.mubr.msk.bf16.mxu1 %vm269_vm1, %v4583_v63  ;;  %v445_v8 = vld [vmem:[#allocation2 + $0x219] sm:$0x7f]  ;;  %v1896_v10 = vld [vmem:[#allocation2 + $0x290] sm:$0xff]  ;;  %349 = vst.msk [vmem:[#allocation2 + $0x220] sm:$0xff] %vm269_vm1, %v267_v9  ;;  %v4613_v13 = vpack.c.bf16 %v553_v5, %v4496_v59  ;;  %v4619_v15 = vpack.c.bf16 %v555_v47, %v4536_v23  ;;  %v366_v16 = vld [vmem:[#allocation2 + $0x1a8] sm:$0x7f] }
  0x4a   : > { %3881 = vmatpush3.bf16.msra.mxu0 %v2282_v2  ;;  %3852 = vmatprep.mubr.msk.bf16.mxu0 %vm269_vm1, %v4588_v54  ;;  %v1897_v11 = vld [vmem:[#allocation2 + $0x298] sm:$0xff]  ;;  %477 = vst.msk [vmem:[#allocation2 + $0x338] sm:$0x7f] %vm384_vm3, %v445_v8  ;;  %399 = vst.msk [vmem:[#allocation2 + $0x89] sm:$0x7f] %vm384_vm3, %v366_v16  ;;  %v1898_v21 = vld [vmem:[#allocation2 + $0x2a0] sm:$0xff] }
  0x4b   : > { %v268_v12 = vld [vmem:[%s4399_s30 + $0xf8] sm:$0xff]  ;;  %4248 = vmatprep.subr.msk.bf16.mxu0 %vm628_vm0, %v4597_v57  ;;  %v4621_v17 = vpack.c.bf16 %v1897_v11, %v1896_v10  ;;  %v370_v19 = vld [vmem:[#allocation2 + $0x1c8] sm:$0x7f]  ;;  %v1900_v30 = vld [vmem:[#allocation2 + $0x2b0] sm:$0xff]  ;;  %v1105_v5 = vsel %vm628_vm0, %v4471_v50, 0 }
  0x4c   : > { %350 = vst.msk [vmem:[#allocation2 + $0x228] sm:$0xff] %vm269_vm1, %v268_v12  ;;  %v368_v18 = vld [vmem:[#allocation2 + $0x1b8] sm:$0x7f]  ;;  %v374_v22 = vld [vmem:[#allocation2 + $0x1e8] sm:$0x7f]  ;;  %v1902_v42 = vld [vmem:[#allocation2 + $0x2c0] sm:$0xff] }
  0x4d   : > { %401 = vst.msk [vmem:[#allocation2 + $0x99] sm:$0x7f] %vm384_vm3, %v368_v18  ;;  %403 = vst.msk [vmem:[#allocation2 + $0xa9] sm:$0x7f] %vm384_vm3, %v370_v19  ;;  %v372_v59 = vld [vmem:[#allocation2 + $0x1d8] sm:$0x7f] }
  0x4e   : > { %v557_v20 = vld [vmem:[#allocation2 + $0x1f8] sm:$0xff]  ;;  %405 = vst.msk [vmem:[#allocation2 + $0xb9] sm:$0x7f] %vm384_vm3, %v372_v59  ;;  %v1899_v23 = vld [vmem:[#allocation2 + $0x2a8] sm:$0xff]  ;;  %407 = vst.msk [vmem:[#allocation2 + $0xc9] sm:$0x7f] %vm384_vm3, %v374_v22 }
  0x4f   : > { %v376_v25 = vld [vmem:[#allocation2 + $0x1f8] sm:$0x7f]  ;;  %v378_v26 = vld [vmem:[#allocation2 + $0x208] sm:$0x7f]  ;;  %v4640_v36 = vpack.c.bf16 %v557_v20, %v4539_v24  ;;  %v4644_v37 = vpack.c.bf16 %v1899_v23, %v1898_v21  ;;  %v1904_v45 = vld [vmem:[#allocation2 + $0x2d0] sm:$0xff] }
  0x50   : > { %3699 = vmatmul.mubr.msk.bf16.gmra.mrb[20].mxu1 %vm269_vm1, %v4613_v13  ;;  %v559_v28 = vld [vmem:[#allocation2 + $0x208] sm:$0xff]  ;;  %409 = vst.msk [vmem:[#allocation2 + $0xd9] sm:$0x7f] %vm384_vm3, %v376_v25  ;;  %411 = vst.msk [vmem:[#allocation2 + $0xe9] sm:$0x7f] %vm384_vm3, %v378_v26  ;;  %v1901_v32 = vld [vmem:[#allocation2 + $0x2b8] sm:$0xff] }
  0x51   : > { %3853 = vmatmul.mubr.msk.bf16.gmra.mrb[4].mxu0 %vm269_vm1, %v4616_v14  ;;  %3702 = vmatprep.mubr.msk.bf16.mxu1 %vm269_vm1, %v4619_v15  ;;  %v380_v31 = vld [vmem:[#allocation2 + $0x218] sm:$0x7f]  ;;  %v4647_v38 = vpack.c.bf16 %v559_v28, %v4548_v27  ;;  %v4649_v39 = vld [vmem:[#allocation2 + $0x220] sm:$0xff]  ;;  %v4651_v41 = vpack.c.bf16 %v1901_v32, %v1900_v30  ;;  %v1903_v43 = vld [vmem:[#allocation2 + $0x2c8] sm:$0xff] }
  0x52   : > { %3856 = vmatprep.mubr.msk.bf16.mxu0 %vm269_vm1, %v4621_v17  ;;  %413 = vst.msk [vmem:[#allocation2 + $0xf9] sm:$0x7f] %vm384_vm3, %v380_v31  ;;  %v561_v24 = vld [vmem:[#allocation2 + $0x218] sm:$0xff]  ;;  %v480_v27 = vld [vmem:[#allocation2] sm:$0xff]  ;;  %v481_v44 = vld [vmem:[#allocation2 + $0x8] sm:$0xff]  ;;  %v4667_v49 = vpack.c.bf16 %v1903_v43, %v1902_v42 }
  0x53   : > { %v446_v34 = vld [vmem:[#allocation2 + $0x221] sm:$0xff]  ;;  %v447_v35 = vld [vmem:[#allocation2 + $0x229] sm:$0x7f]  ;;  %414 = vst.msk [vmem:[#allocation2 + $0x101] sm:$0xff] %vm269_vm1, %v4649_v39  ;;  %v1905_v46 = vld [vmem:[#allocation2 + $0x2d8] sm:$0xff]  ;;  %v4665_v48 = vpack.c.bf16 %v561_v24, %v4550_v29  ;;  %v512_v51 = vpack.c.bf16 %v481_v44, %v480_v27 }
  0x54   : > { %478 = vst.msk [vmem:[#allocation2 + $0x340] sm:$0xff] %vm269_vm1, %v446_v34  ;;  %v382_v40 = vld [vmem:[#allocation2 + $0x228] sm:$0x7f]  ;;  %v4669_v52 = vpack.c.bf16 %v1905_v46, %v1904_v45  ;;  %v482_v53 = vld [vmem:[#allocation2 + $0x10] sm:$0xff]  ;;  %v483_v55 = vld [vmem:[#allocation2 + $0x18] sm:$0xff] }
  0x55   : > { %479 = vst.msk [vmem:[#allocation2 + $0x348] sm:$0x7f] %vm384_vm3, %v447_v35  ;;  %415 = vst.msk [vmem:[#allocation2 + $0x109] sm:$0x7f] %vm384_vm3, %v382_v40  ;;  %v1906_v29 = vld [vmem:[#allocation2 + $0x2e0] sm:$0xff]  ;;  %v1907_v56 = vld [vmem:[#allocation2 + $0x2e8] sm:$0xff]  ;;  %v4678_v2 = vpack.c.bf16 %v483_v55, %v482_v53 }
  0x56   : > { %v484_v58 = vld [vmem:[#allocation2 + $0x20] sm:$0xff]  ;;  %v485_v60 = vld [vmem:[#allocation2 + $0x28] sm:$0xff]  ;;  %v1908_v61 = vld [vmem:[#allocation2 + $0x2f0] sm:$0xff]  ;;  %v4680_v4 = vpack.c.bf16 %v1907_v56, %v1906_v29 }
  0x57   : > { %v1909_v0 = vld [vmem:[#allocation2 + $0x2f8] sm:$0xff]  ;;  %v4684_v6 = vpack.c.bf16 %v485_v60, %v484_v58  ;;  %v4693_v47 = vld [vmem:[%s5118_s1 + $0x6] sm:$0x3]  ;;  %v486_v8 = vld [vmem:[#allocation2 + $0x30] sm:$0xff] }
  0x58   : > { %3703 = vmatmul.mubr.msk.bf16.gmra.mrb[24].mxu1 %vm269_vm1, %v4640_v36  ;;  %v4686_v7 = vpack.c.bf16 %v1909_v0, %v1908_v61  ;;  %v487_v9 = vld [vmem:[#allocation2 + $0x38] sm:$0xff]  ;;  %v488_v10 = vld [vmem:[#allocation2 + $0x40] sm:$0xff]  ;;  %v1911_v11 = vld [vmem:[#allocation2 + $0x308] sm:$0xff] }
  0x59   : > { %3857 = vmatmul.mubr.msk.bf16.gmra.mrb[8].mxu0 %vm269_vm1, %v4644_v37  ;;  %3706 = vmatprep.mubr.msk.bf16.mxu1 %vm269_vm1, %v4647_v38  ;;  %v1910_v50 = vld [vmem:[#allocation2 + $0x300] sm:$0xff]  ;;  %v489_v12 = vld [vmem:[#allocation2 + $0x48] sm:$0xff]  ;;  %v1912_v16 = vld [vmem:[#allocation2 + $0x310] sm:$0xff]  ;;  %v4703_v19 = vpack.c.bf16 %v487_v9, %v486_v8 }
  0x5a   : > { %3860 = vmatprep.mubr.msk.bf16.mxu0 %vm269_vm1, %v4651_v41  ;;  %v1913_v18 = vld [vmem:[#allocation2 + $0x318] sm:$0xff]  ;;  %v4705_v59 = vpack.c.bf16 %v1911_v11, %v1910_v50  ;;  %v4707_v20 = vpack.c.bf16 %v489_v12, %v488_v10  ;;  %v490_v22 = vld [vmem:[#allocation2 + $0x50] sm:$0xff]  ;;  %v492_v25 = vld [vmem:[#allocation2 + $0x60] sm:$0xff] }
  0x5b   : > { %v4709_v21 = vpack.c.bf16 %v1913_v18, %v1912_v16  ;;  %v491_v23 = vld [vmem:[#allocation2 + $0x58] sm:$0xff]  ;;  %v1914_v26 = vld [vmem:[#allocation2 + $0x320] sm:$0xff]  ;;  %v1915_v28 = vld [vmem:[#allocation2 + $0x328] sm:$0xff] }
  0x5c   : > { %v493_v30 = vld [vmem:[#allocation2 + $0x68] sm:$0xff]  ;;  %v1916_v31 = vld [vmem:[#allocation2 + $0x330] sm:$0xff]  ;;  %v1917_v32 = vld [vmem:[#allocation2 + $0x338] sm:$0xff]  ;;  %v4719_v34 = vpack.c.bf16 %v491_v23, %v490_v22  ;;  %v4721_v35 = vpack.c.bf16 %v1915_v28, %v1914_v26 }
  0x5d   : > { %v4723_v40 = vpack.c.bf16 %v493_v30, %v492_v25  ;;  %v4725_v24 = vpack.c.bf16 %v1917_v32, %v1916_v31  ;;  %v494_v27 = vld [vmem:[#allocation2 + $0x70] sm:$0xff]  ;;  %v495_v42 = vld [vmem:[#allocation2 + $0x78] sm:$0xff]  ;;  %v496_v43 = vld [vmem:[#allocation2 + $0x80] sm:$0xff] }
  0x5e   : > { %v1918_v44 = vld [vmem:[#allocation2 + $0x340] sm:$0xff]  ;;  %v1919_v45 = vld [vmem:[#allocation2 + $0x348] sm:$0xff]  ;;  %v498_v29 = vld [vmem:[#allocation2 + $0x90] sm:$0xff] }
  0x5f   : > { %v497_v46 = vld [vmem:[#allocation2 + $0x88] sm:$0xff]  ;;  %v4737_v53 = vpack.c.bf16 %v1919_v45, %v1918_v44  ;;  %v499_v56 = vld [vmem:[#allocation2 + $0x98] sm:$0xff]  ;;  %v500_v58 = vld [vmem:[#allocation2 + $0xa0] sm:$0xff] }
  0x60   : > { %3707 = vmatmul.mubr.msk.bf16.gmra.mrb[28].mxu1 %vm269_vm1, %v4665_v48  ;;  %v4739_v55 = vpack.c.bf16 %v497_v46, %v496_v43  ;;  %v501_v60 = vld [vmem:[#allocation2 + $0xa8] sm:$0xff]  ;;  %v4749_v61 = vpack.c.bf16 %v499_v56, %v498_v29  ;;  %v4760_v8 = vld [vmem:[%s5118_s1 + $0x10] sm:$0x3]  ;;  %v503_v10 = vld [vmem:[#allocation2 + $0xb8] sm:$0xff]  ;;  %v1399_v43 = vsel %vm628_vm0, %v4693_v47, 0 }
  0x61   : > { %3861 = vmatmul.mubr.msk.bf16.gmra.mrb[12].mxu0 %vm269_vm1, %v4667_v49  ;;  %3712 = vmatprep.mubr.msk.bf16.mxu1 %vm269_vm1, %v512_v51  ;;  %v4735_v51 = vpack.c.bf16 %v495_v42, %v494_v27  ;;  %v4751_v0 = vpack.c.bf16 %v501_v60, %v500_v58  ;;  %v502_v9 = vld [vmem:[#allocation2 + $0xb0] sm:$0xff]  ;;  %v505_v50 = vld [vmem:[#allocation2 + $0xc8] sm:$0xff]  ;;  %v507_v18 = vld [vmem:[#allocation2 + $0xd8] sm:$0xff] }
  0x62   : > { %3864 = vmatprep.mubr.msk.bf16.mxu0 %vm269_vm1, %v4669_v52  ;;  %v4770_v11 = vpack.c.bf16 %v503_v10, %v502_v9  ;;  %v506_v16 = vld [vmem:[#allocation2 + $0xd0] sm:$0xff]  ;;  %v508_v22 = vld [vmem:[#allocation2 + $0xe0] sm:$0xff]  ;;  %v509_v23 = vld [vmem:[#allocation2 + $0xe8] sm:$0xff]  ;;  %v2872_v9 = vsel %vm628_vm0, %v4760_v8, 0 }
  0x63   : > { %v4782_v25 = vpack.c.bf16 %v507_v18, %v506_v16  ;;  %v4784_v26 = vpack.c.bf16 %v509_v23, %v508_v22  ;;  %v510_v28 = vld [vmem:[#allocation2 + $0xf0] sm:$0xff]  ;;  %v511_v30 = vld [vmem:[#allocation2 + $0xf8] sm:$0xff]  ;;  %v1006_v31 = vld [vmem:[#allocation2 + $0x240] sm:$0xff] }
  0x64   : > { %v1007_v32 = vld [vmem:[#allocation2 + $0x248] sm:$0xff]  ;;  %v4794_v27 = vpack.c.bf16 %v511_v30, %v510_v28  ;;  %v2481_v29 = vld [vmem:[#allocation2 + $0x158] sm:$0xff]  ;;  %v2482_v56 = vld [vmem:[#allocation2 + $0x160] sm:$0xff] }
  0x65   : > { %v1038_v42 = vpack.c.bf16 %v1007_v32, %v1006_v31  ;;  %v2479_v44 = vld [vmem:[#allocation2 + $0x148] sm:$0xff]  ;;  %v2484_v10 = vld [vmem:[#allocation2 + $0x170] sm:$0xff]  ;;  %v2489_v23 = vld [vmem:[#allocation2 + $0x198] sm:$0xff] }
  0x66   : > { %v2483_v58 = vld [vmem:[#allocation2 + $0x168] sm:$0xff]  ;;  %v2490_v28 = vld [vmem:[#allocation2 + $0x1a0] sm:$0xff] }
  0x67   : > { %v2487_v16 = vld [vmem:[#allocation2 + $0x188] sm:$0xff] }
  0x68   : > { %3713 = vmatmul.mubr.msk.bf16.vlgmr.msra.gmra.mrb[0].mxu1 %vm269_vm1, %v4678_v2  ;;  %v2491_v30 = vld [vmem:[#allocation2 + $0x1a8] sm:$0xff] }
  0x69   : > { %3745 = vmatpush3.bf16.msra.mxu1 %v1105_v5  ;;  %3865 = vmatmul.mubr.msk.bf16.gmra.mrb[16].mxu0 %vm269_vm1, %v4680_v4  ;;  %v2577_v5 = vsel %vm628_vm0, %v4597_v57, 0  ;;  %v504_v57 = vld [vmem:[#allocation2 + $0xc0] sm:$0xff]  ;;  %v2516_v32 = vpack.c.bf16 %v2491_v30, %v2490_v28 }
  0x6a   : > { %3716 = vmatprep.mubr.msk.bf16.mxu1 %vm269_vm1, %v4684_v6  ;;  %3868 = vmatprep.mubr.msk.bf16.mxu0 %vm269_vm1, %v4686_v7  ;;  %v4772_v12 = vpack.c.bf16 %v505_v50, %v504_v57  ;;  %v2485_v57 = vld [vmem:[#allocation2 + $0x178] sm:$0xff]  ;;  %v2486_v50 = vld [vmem:[#allocation2 + $0x180] sm:$0xff] }
  0x6b   : > { %4243 = vmatprep.subr.msk.bf16.mxu1 %vm628_vm0, %v4693_v47  ;;  %v2513_v18 = vpack.c.bf16 %v2485_v57, %v2484_v10  ;;  %v2514_v22 = vpack.c.bf16 %v2487_v16, %v2486_v50 }
  0x70   : > { %3717 = vmatmul.mubr.msk.bf16.gmra.mrb[4].mxu1 %vm269_vm1, %v4703_v19 }
  0x71   : > { %3869 = vmatmul.mubr.msk.bf16.gmra.mrb[20].mxu0 %vm269_vm1, %v4705_v59  ;;  %3720 = vmatprep.mubr.msk.bf16.mxu1 %vm269_vm1, %v4707_v20 }
  0x72   : > { %3872 = vmatprep.mubr.msk.bf16.mxu0 %vm269_vm1, %v4709_v21 }
  0x78   : > { %3721 = vmatmul.mubr.msk.bf16.gmra.mrb[8].mxu1 %vm269_vm1, %v4719_v34 }
  0x79   : > { %3873 = vmatmul.mubr.msk.bf16.gmra.mrb[24].mxu0 %vm269_vm1, %v4721_v35  ;;  %3724 = vmatprep.mubr.msk.bf16.mxu1 %vm269_vm1, %v4723_v40 }
  0x7a   : > { %3876 = vmatprep.mubr.msk.bf16.mxu0 %vm269_vm1, %v4725_v24 }
  0x80   : > { %3725 = vmatmul.mubr.msk.bf16.gmra.mrb[12].mxu1 %vm269_vm1, %v4735_v51 }
  0x81   : > { %3877 = vmatmul.mubr.msk.bf16.gmra.mrb[28].mxu0 %vm269_vm1, %v4737_v53  ;;  %3728 = vmatprep.mubr.msk.bf16.mxu1 %vm269_vm1, %v4739_v55 }
  0x82   : > { %3882 = vmatprep.mubr.msk.bf16.mxu0 %vm269_vm1, %v4684_v6 }
  0x88   : > { %3729 = vmatmul.mubr.msk.bf16.gmra.mrb[16].mxu1 %vm269_vm1, %v4749_v61 }
  0x89   : > { %3883 = vmatmul.mubr.msk.bf16.vlgmr.msra.gmra.mrb[0].mxu0 %vm269_vm1, %v4703_v19  ;;  %3732 = vmatprep.mubr.msk.bf16.mxu1 %vm269_vm1, %v4751_v0 }
  0x8a   : > { %3915 = vmatpush3.bf16.msra.mxu0 %v2577_v5  ;;  %3886 = vmatprep.mubr.msk.bf16.mxu0 %vm269_vm1, %v4707_v20  ;;  %v2512_v5 = vpack.c.bf16 %v2483_v58, %v2482_v56 }
  0x8b   : > { %4249 = vmatprep.subr.msk.bf16.mxu0 %vm628_vm0, %v4760_v8  ;;  %v2488_v8 = vld [vmem:[#allocation2 + $0x190] sm:$0xff] }
  0x8c   : > { %v2515_v31 = vpack.c.bf16 %v2489_v23, %v2488_v8 }
  0x90   : > { %3733 = vmatmul.mubr.msk.bf16.gmra.mrb[20].mxu1 %vm269_vm1, %v4770_v11 }
  0x91   : > { %3887 = vmatmul.mubr.msk.bf16.gmra.mrb[4].mxu0 %vm269_vm1, %v4719_v34  ;;  %3736 = vmatprep.mubr.msk.bf16.mxu1 %vm269_vm1, %v4772_v12 }
  0x92   : > { %3890 = vmatprep.mubr.msk.bf16.mxu0 %vm269_vm1, %v4723_v40 }
  0x98   : > { %3737 = vmatmul.mubr.msk.bf16.gmra.mrb[24].mxu1 %vm269_vm1, %v4782_v25 }
  0x99   : > { %3891 = vmatmul.mubr.msk.bf16.gmra.mrb[8].mxu0 %vm269_vm1, %v4735_v51  ;;  %3740 = vmatprep.mubr.msk.bf16.mxu1 %vm269_vm1, %v4784_v26 }
  0x9a   : > { %3894 = vmatprep.mubr.msk.bf16.mxu0 %vm269_vm1, %v4739_v55 }
  0xa0   : > { %3741 = vmatmul.mubr.msk.bf16.gmra.mrb[28].mxu1 %vm269_vm1, %v4794_v27 }
  0xa1   : > { %3895 = vmatmul.mubr.msk.bf16.gmra.mrb[12].mxu0 %vm269_vm1, %v4749_v61  ;;  %3746 = vmatprep.mubr.msk.bf16.mxu1 %vm269_vm1, %v1038_v42  ;;  %v2492_v42 = vld [vmem:[#allocation2 + $0x1b0] sm:$0xff] }
  0xa2   : > { %3898 = vmatprep.mubr.msk.bf16.mxu0 %vm269_vm1, %v4751_v0 }
  0xa8   : > { %3747 = vmatmul.mubr.msk.bf16.vlgmr.msra.gmra.mrb[0].mxu1 %vm269_vm1, %v4558_v33  ;;  %v2211_v33 = vld [vmem:[#allocation2 + $0x100] sm:$0xff] }
  0xa9   : > { %3779 = vmatpush3.bf16.msra.mxu1 %v1399_v43  ;;  %3899 = vmatmul.mubr.msk.bf16.gmra.mrb[16].mxu0 %vm269_vm1, %v4770_v11  ;;  %v2493_v43 = vld [vmem:[#allocation2 + $0x1b8] sm:$0xff] }
  0xaa   : > { %3750 = vmatprep.mubr.msk.bf16.mxu1 %vm269_vm1, %v4580_v62  ;;  %3902 = vmatprep.mubr.msk.bf16.mxu0 %vm269_vm1, %v4772_v12  ;;  %v2212_v62 = vld [vmem:[#allocation2 + $0x108] sm:$0xff] }
  0xab   : > { %4245 = vmatprep.subr.msk.bf16.mxu1 %vm628_vm0, %v4312_v1  ;;  %v4823_v47 = vpack.c.bf16 %v2212_v62, %v2211_v33  ;;  %v2213_v1 = vld [vmem:[#allocation2 + $0x110] sm:$0xff]  ;;  %v2517_v33 = vpack.c.bf16 %v2493_v43, %v2492_v42 }
  0xb0   : > { %3751 = vmatmul.mubr.msk.bf16.gmra.mrb[4].mxu1 %vm269_vm1, %v4588_v54  ;;  %v2214_v54 = vld [vmem:[#allocation2 + $0x118] sm:$0xff] }
  0xb1   : > { %3903 = vmatmul.mubr.msk.bf16.gmra.mrb[20].mxu0 %vm269_vm1, %v4782_v25  ;;  %3754 = vmatprep.mubr.msk.bf16.mxu1 %vm269_vm1, %v4616_v14  ;;  %v2478_v14 = vld [vmem:[#allocation2 + $0x140] sm:$0xff]  ;;  %v2230_v45 = vpack.c.bf16 %v2214_v54, %v2213_v1  ;;  %v1622_v1 = vld [vmem:[#allocation2 + $0x210] sm:$0xff]  ;;  %v1623_v54 = vld [vmem:[#allocation2 + $0x218] sm:$0xff] }
  0xb2   : > { %3906 = vmatprep.mubr.msk.bf16.mxu0 %vm269_vm1, %v4784_v26  ;;  %v2510_v46 = vpack.c.bf16 %v2479_v44, %v2478_v14  ;;  %v2804_v44 = vld [vmem:[#allocation2 + $0x358] sm:$0xff] }
  0xb8   : > { %3755 = vmatmul.mubr.msk.bf16.gmra.mrb[8].mxu1 %vm269_vm1, %v4621_v17 }
  0xb9   : > { %3907 = vmatmul.mubr.msk.bf16.gmra.mrb[24].mxu0 %vm269_vm1, %v4794_v27  ;;  %3758 = vmatprep.mubr.msk.bf16.mxu1 %vm269_vm1, %v4644_v37  ;;  %v2480_v37 = vld [vmem:[#allocation2 + $0x150] sm:$0xff] }
  0xba   : > { %3910 = vmatprep.mubr.msk.bf16.mxu0 %vm269_vm1, %v4823_v47  ;;  %v2511_v60 = vpack.c.bf16 %v2481_v29, %v2480_v37 }
  0xc0   : > { %3759 = vmatmul.mubr.msk.bf16.gmra.mrb[12].mxu1 %vm269_vm1, %v4651_v41 }
  0xc1   : > { %3911 = vmatmul.mubr.msk.bf16.gmra.mrb[28].mxu0 %vm269_vm1, %v2230_v45  ;;  %3762 = vmatprep.mubr.msk.bf16.mxu1 %vm269_vm1, %v4667_v49 }
  0xc2   : > { %3916 = vmatprep.mubr.msk.bf16.mxu0 %vm269_vm1, %v2510_v46 }
  0xc8   : > { %3763 = vmatmul.mubr.msk.bf16.gmra.mrb[16].mxu1 %vm269_vm1, %v4669_v52 }
  0xc9   : > { %3917 = vmatmul.mubr.msk.bf16.vlgmr.msra.gmra.mrb[0].mxu0 %vm269_vm1, %v2511_v60  ;;  %3766 = vmatprep.mubr.msk.bf16.mxu1 %vm269_vm1, %v4680_v4 }
  0xca   : > { %3949 = vmatpush3.bf16.msra.mxu0 %v2872_v9  ;;  %3920 = vmatprep.mubr.msk.bf16.mxu0 %vm269_vm1, %v2512_v5 }
  0xd0   : > { %3767 = vmatmul.mubr.msk.bf16.gmra.mrb[20].mxu1 %vm269_vm1, %v4686_v7 }
  0xd1   : > { %3921 = vmatmul.mubr.msk.bf16.gmra.mrb[4].mxu0 %vm269_vm1, %v2513_v18  ;;  %3770 = vmatprep.mubr.msk.bf16.mxu1 %vm269_vm1, %v4705_v59 }
  0xd2   : > { %3924 = vmatprep.mubr.msk.bf16.mxu0 %vm269_vm1, %v2514_v22 }
  0xd8   : > { %3771 = vmatmul.mubr.msk.bf16.gmra.mrb[24].mxu1 %vm269_vm1, %v4709_v21 }
  0xd9   : > { %3925 = vmatmul.mubr.msk.bf16.gmra.mrb[8].mxu0 %vm269_vm1, %v2515_v31  ;;  %3774 = vmatprep.mubr.msk.bf16.mxu1 %vm269_vm1, %v4721_v35 }
  0xda   : > { %3928 = vmatprep.mubr.msk.bf16.mxu0 %vm269_vm1, %v2516_v32 }
  0xe0   : > { %3775 = vmatmul.mubr.msk.bf16.gmra.mrb[28].mxu1 %vm269_vm1, %v4725_v24 }
  0xe1   : > { %3929 = vmatmul.mubr.msk.bf16.gmra.mrb[12].mxu0 %vm269_vm1, %v2517_v33  ;;  %3780 = vmatprep.mubr.msk.bf16.mxu1 %vm269_vm1, %v4678_v2 }
  0xe2   : > { %3932 = vmatprep.mubr.msk.bf16.mxu0 %vm269_vm1, %v4583_v63 }
  0xe8   : > { %3781 = vmatmul.mubr.msk.bf16.vlgmr.msra.gmra.mrb[0].mxu1 %vm269_vm1, %v4684_v6 }
  0xe9   : > { %3983 = vmatpush3.bf16.msra.mxu1 %v4320_v3  ;;  %3933 = vmatmul.mubr.msk.bf16.gmra.mrb[16].mxu0 %vm269_vm1, %v4613_v13  ;;  %v2507_v3 = vld [vmem:[#allocation2 + $0x228] sm:$0xff]  ;;  %v2508_v13 = vld [vmem:[#allocation2 + $0x230] sm:$0xff] }
  0xea   : > { %3784 = vmatprep.mubr.msk.bf16.mxu1 %vm269_vm1, %v4703_v19  ;;  %3936 = vmatprep.mubr.msk.bf16.mxu0 %vm269_vm1, %v4619_v15  ;;  %v4884_v63 = vpack.c.bf16 %v2507_v3, %v4649_v39  ;;  %v2509_v15 = vld [vmem:[#allocation2 + $0x238] sm:$0xff]  ;;  %v2775_v39 = vld [vmem:[#allocation2 + $0x270] sm:$0xff]  ;;  %v2777_v19 = vld [vmem:[#allocation2 + $0x280] sm:$0xff] }
  0xeb   : > { %v2525_v2 = vpack.c.bf16 %v2509_v15, %v2508_v13 }
  0xf0   : > { %3785 = vmatmul.mubr.msk.bf16.gmra.mrb[4].mxu1 %vm269_vm1, %v4707_v20  ;;  %v2778_v20 = vld [vmem:[#allocation2 + $0x288] sm:$0xff] }
  0xf1   : > { %3937 = vmatmul.mubr.msk.bf16.gmra.mrb[20].mxu0 %vm269_vm1, %v4640_v36  ;;  %3788 = vmatprep.mubr.msk.bf16.mxu1 %vm269_vm1, %v4719_v34  ;;  %v2773_v36 = vld [vmem:[#allocation2 + $0x260] sm:$0xff] }
  0xf2   : > { %3940 = vmatprep.mubr.msk.bf16.mxu0 %vm269_vm1, %v4647_v38  ;;  %v2774_v38 = vld [vmem:[#allocation2 + $0x268] sm:$0xff] }
  0xf3   : > { %v2805_v6 = vpack.c.bf16 %v2774_v38, %v2773_v36 }
  0xf8   : > { %3789 = vmatmul.mubr.msk.bf16.gmra.mrb[8].mxu1 %vm269_vm1, %v4723_v40  ;;  %v2807_v40 = vpack.c.bf16 %v2778_v20, %v2777_v19 }
  0xf9   : > { %3941 = vmatmul.mubr.msk.bf16.gmra.mrb[24].mxu0 %vm269_vm1, %v4665_v48  ;;  %3792 = vmatprep.mubr.msk.bf16.mxu1 %vm269_vm1, %v4735_v51  ;;  %v2776_v48 = vld [vmem:[#allocation2 + $0x278] sm:$0xff]  ;;  %v2781_v51 = vld [vmem:[#allocation2 + $0x2a0] sm:$0xff] }
  0xfa   : > { %3944 = vmatprep.mubr.msk.bf16.mxu0 %vm269_vm1, %v4884_v63  ;;  %v2806_v34 = vpack.c.bf16 %v2776_v48, %v2775_v39 }
 0x100   : > { %3793 = vmatmul.mubr.msk.bf16.gmra.mrb[12].mxu1 %vm269_vm1, %v4739_v55  ;;  %v2782_v55 = vld [vmem:[#allocation2 + $0x2a8] sm:$0xff] }
 0x101   : > { %3945 = vmatmul.mubr.msk.bf16.gmra.mrb[28].mxu0 %vm269_vm1, %v2525_v2  ;;  %3796 = vmatprep.mubr.msk.bf16.mxu1 %vm269_vm1, %v4749_v61  ;;  %v2809_v61 = vpack.c.bf16 %v2782_v55, %v2781_v51 }
 0x102   : > { %3950 = vmatprep.mubr.msk.bf16.mxu0 %vm269_vm1, %v2805_v6 }
 0x108   : > { %3797 = vmatmul.mubr.msk.bf16.gmra.mrb[16].mxu1 %vm269_vm1, %v4751_v0  ;;  %v1613_v0 = vld [vmem:[#allocation2 + $0x1c8] sm:$0xff] }
 0x109   : > { %3951 = vmatmul.mubr.msk.bf16.vlgmr.msra.gmra.mrb[0].mxu0 %vm269_vm1, %v2806_v34  ;;  %3800 = vmatprep.mubr.msk.bf16.mxu1 %vm269_vm1, %v4770_v11  ;;  %v1615_v11 = vld [vmem:[#allocation2 + $0x1d8] sm:$0xff] }
 0x10a   : > { %3954 = vmatprep.mubr.msk.bf16.mxu0 %vm269_vm1, %v2807_v40 }
 0x110   : > { %3801 = vmatmul.mubr.msk.bf16.gmra.mrb[20].mxu1 %vm269_vm1, %v4772_v12 }
 0x111   : > { %3955 = vmatmul.mubr.msk.bf16.gmra.mrb[4].mxu0 %vm269_vm1, %v4621_v17  ;;  %3804 = vmatprep.mubr.msk.bf16.mxu1 %vm269_vm1, %v4782_v25  ;;  %v1612_v17 = vld [vmem:[#allocation2 + $0x1c0] sm:$0xff] }
 0x112   : > { %3958 = vmatprep.mubr.msk.bf16.mxu0 %vm269_vm1, %v2809_v61  ;;  %v1635_v12 = vpack.c.bf16 %v1613_v0, %v1612_v17 }
 0x118   : > { %3805 = vmatmul.mubr.msk.bf16.gmra.mrb[24].mxu1 %vm269_vm1, %v4784_v26  ;;  %v1618_v26 = vld [vmem:[#allocation2 + $0x1f0] sm:$0xff] }
 0x119   : > { %3959 = vmatmul.mubr.msk.bf16.gmra.mrb[8].mxu0 %vm269_vm1, %v4651_v41  ;;  %3808 = vmatprep.mubr.msk.bf16.mxu1 %vm269_vm1, %v4794_v27  ;;  %v1614_v41 = vld [vmem:[#allocation2 + $0x1d0] sm:$0xff]  ;;  %v1619_v27 = vld [vmem:[#allocation2 + $0x1f8] sm:$0xff] }
 0x11a   : > { %3962 = vmatprep.mubr.msk.bf16.mxu0 %vm269_vm1, %v4667_v49  ;;  %v1636_v25 = vpack.c.bf16 %v1615_v11, %v1614_v41  ;;  %v1616_v49 = vld [vmem:[#allocation2 + $0x1e0] sm:$0xff] }
 0x120   : > { %3809 = vmatmul.mubr.msk.bf16.gmra.mrb[28].mxu1 %vm269_vm1, %v4823_v47  ;;  %v1620_v47 = vld [vmem:[#allocation2 + $0x200] sm:$0xff] }
 0x121   : > { %3963 = vmatmul.mubr.msk.bf16.gmra.mrb[12].mxu0 %vm269_vm1, %v4669_v52  ;;  %3830 = vmatprep.mubr.msk.bf16.mxu1 %vm269_vm1, %v2517_v33  ;;  %v1617_v52 = vld [vmem:[#allocation2 + $0x1e8] sm:$0xff] }
 0x122   : > { %3966 = vmatprep.mubr.msk.bf16.mxu0 %vm269_vm1, %v4680_v4  ;;  %v1637_v62 = vpack.c.bf16 %v1617_v52, %v1616_v49  ;;  %v1638_v4 = vpack.c.bf16 %v1619_v27, %v1618_v26 }
 0x128   : > { %3831 = vmatmul.mubr.msk.bf16.vlgmr.msra.gmra.mrb[16].mxu1 %vm269_vm1, %v1635_v12 }
 0x129   : > { %3967 = vmatmul.mubr.msk.bf16.gmra.mrb[16].mxu0 %vm269_vm1, %v4686_v7  ;;  %3834 = vmatprep.mubr.msk.bf16.mxu1 %vm269_vm1, %v1636_v25  ;;  %v1621_v7 = vld [vmem:[#allocation2 + $0x208] sm:$0xff] }
 0x12a   : > { %3970 = vmatprep.mubr.msk.bf16.mxu0 %vm269_vm1, %v4705_v59  ;;  %v1639_v14 = vpack.c.bf16 %v1621_v7, %v1620_v47  ;;  %v1640_v59 = vpack.c.bf16 %v1623_v54, %v1622_v1 }
 0x130   : > { %3835 = vmatmul.mubr.msk.bf16.gmra.mrb[20].mxu1 %vm269_vm1, %v1637_v62 }
 0x131   : > { %3971 = vmatmul.mubr.msk.bf16.gmra.mrb[20].mxu0 %vm269_vm1, %v4709_v21  ;;  %3838 = vmatprep.mubr.msk.bf16.mxu1 %vm269_vm1, %v1638_v4  ;;  %v2803_v21 = vld [vmem:[#allocation2 + $0x350] sm:$0xff] }
 0x132   : > { %3974 = vmatprep.mubr.msk.bf16.mxu0 %vm269_vm1, %v4721_v35  ;;  %v2820_v45 = vpack.c.bf16 %v2804_v44, %v2803_v21 }
 0x138   : > { %3839 = vmatmul.mubr.msk.bf16.gmra.mrb[24].mxu1 %vm269_vm1, %v1639_v14 }
 0x139   : > { %3975 = vmatmul.mubr.msk.bf16.gmra.mrb[24].mxu0 %vm269_vm1, %v4725_v24  ;;  %3842 = vmatprep.mubr.msk.bf16.mxu1 %vm269_vm1, %v1640_v59 }
 0x13a   : > { %3978 = vmatprep.mubr.msk.bf16.mxu0 %vm269_vm1, %v4737_v53 }
 0x140   : > { %3843 = vmatmul.mubr.msk.bf16.gmra.mrb[28].mxu1 %vm269_vm1, %v4884_v63 }
 0x141   : > { %3979 = vmatmul.mubr.msk.bf16.gmra.mrb[28].mxu0 %vm269_vm1, %v2820_v45 }
 0x1bb   : > { %v3782_v35 = vpop.f32.mrb[0].mxu1 }
 0x1bc   : > { %v1435_v46 = vpop.f32.mrb[1].mxu1 }
 0x1bd   : > { %v3783_v37 = vpop.f32.mrb[2].mxu1 }
 0x1be   : > { %v1438_v29 = vpop.f32.mrb[3].mxu1 }
 0x1c3   : > { %v3786_v56 = vpop.f32.mrb[4].mxu1 }
 0x1c4   : > { %v1451_v24 = vpop.f32.mrb[5].mxu1 }
 0x1c5   : > { %v3787_v58 = vpop.f32.mrb[6].mxu1 }
 0x1c6   : > { %v1454_v60 = vpop.f32.mrb[7].mxu1 }
 0x1cb   : > { %v4949_v5 = vpop.f32.mrb[8].mxu1 }
 0x1cc   : > { %v4951_v53 = vpop.f32.mrb[9].mxu1 }
 0x1cd   : > { %v4953_v9 = vpop.f32.mrb[10].mxu1 }
 0x1ce   : > { %v4955_v10 = vpop.f32.mrb[11].mxu1 }
 0x1d3   : > { %v4957_v57 = vpop.f32.mrb[12].mxu1 }
 0x1d4   : > { %v4959_v50 = vpop.f32.mrb[13].mxu1 }
 0x1d5   : > { %v4961_v16 = vpop.f32.mrb[14].mxu1 }
 0x1d6   : > { %v4963_v18 = vpop.f32.mrb[15].mxu1 }
 0x1dc   : > { %v3952_v22 = vpop.f32.mrb[0].mxu0 }
 0x1dd   : > { %v3984_v8 = vadd.f32 %v3952_v22, %v3782_v35  ;;  %v2908_v23 = vpop.f32.mrb[1].mxu0 }
 0x1de   : > { %v3985_v28 = vadd.f32 %v2908_v23, %v1435_v46  ;;  %v3953_v30 = vpop.f32.mrb[2].mxu0 }
 0x1df   : > { %3069 = vst.msk [vmem:[%s4970_s3 + $0x10] sm:$0xff] %vm269_vm1, %v3984_v8  ;;  %v3986_v31 = vadd.f32 %v3953_v30, %v3783_v37  ;;  %v2911_v32 = vpop.f32.mrb[3].mxu0  ;;  %v3171_v33 = vmul.f32 %v3984_v8, %v3984_v8  ;;  %v3102_v38 = vsel %vm269_vm1, %v3984_v8, 0.0 }
 0x1e0   : > { %3067 = vst.msk [vmem:[%s4970_s3] sm:$0xff] %vm269_vm1, %v3985_v28  ;;  %v3169_v42 = vmul.f32 %v3985_v28, %v3985_v28  ;;  %v3987_v43 = vadd.f32 %v2911_v32, %v1438_v29  ;;  %v3099_v3 = vsel %vm269_vm1, %v3985_v28, 0.0 }
 0x1e1   : > { %3070 = vst.msk [vmem:[%s4970_s3 + $0x18] sm:$0xff] %vm269_vm1, %v3986_v31  ;;  %v3172_v15 = vmul.f32 %v3986_v31, %v3986_v31  ;;  %v3204_v40 = vsel %vm269_vm1, %v3171_v33, 0.0  ;;  %v3104_v51 = vsel %vm269_vm1, %v3986_v31, 0.0 }
 0x1e2   : > { %3068 = vst.msk [vmem:[%s4970_s3 + $0x8] sm:$0xff] %vm269_vm1, %v3987_v43  ;;  %v3100_v63 = vsel %vm269_vm1, %v3987_v43, 0.0  ;;  %v3170_v13 = vmul.f32 %v3987_v43, %v3987_v43  ;;  %v3201_v2 = vsel %vm269_vm1, %v3169_v42, 0.0 }
 0x1e3   : > { %v3101_v36 = vadd.f32 %v3100_v63, %v3099_v3  ;;  %v3206_v17 = vsel %vm269_vm1, %v3172_v15, 0.0 }
 0x1e4   : > { %v3202_v6 = vsel %vm269_vm1, %v3170_v13, 0.0  ;;  %v3956_v39 = vpop.f32.mrb[4].mxu0 }
 0x1e5   : > { %v3103_v48 = vadd.f32 %v3102_v38, %v3101_v36  ;;  %v3203_v19 = vadd.f32 %v3202_v6, %v3201_v2  ;;  %v3988_v20 = vadd.f32 %v3956_v39, %v3786_v56  ;;  %v2924_v34 = vpop.f32.mrb[5].mxu0 }
 0x1e6   : > { %v3989_v55 = vadd.f32 %v2924_v34, %v1451_v24  ;;  %v3957_v61 = vpop.f32.mrb[6].mxu0 }
 0x1e7   : > { %v3205_v0 = vadd.f32 %v3204_v40, %v3203_v19  ;;  %3073 = vst.msk [vmem:[%s4970_s3 + $0x30] sm:$0xff] %vm269_vm1, %v3988_v20  ;;  %v3105_v41 = vadd.f32 %v3104_v51, %v3103_v48  ;;  %v2927_v11 = vpop.f32.mrb[7].mxu0  ;;  %v3990_v49 = vadd.f32 %v3957_v61, %v3787_v58  ;;  %v3175_v47 = vmul.f32 %v3988_v20, %v3988_v20 }
 0x1e8   : > { %3071 = vst.msk [vmem:[%s4970_s3 + $0x20] sm:$0xff] %vm269_vm1, %v3989_v55  ;;  %v3106_v12 = vsel %vm269_vm1, %v3989_v55, 0.0  ;;  %v3173_v25 = vmul.f32 %v3989_v55, %v3989_v55  ;;  %v3991_v52 = vadd.f32 %v2927_v11, %v1454_v60  ;;  %v3110_v14 = vsel %vm269_vm1, %v3988_v20, 0.0 }
 0x1e9   : > { %v3107_v26 = vadd.f32 %v3106_v12, %v3105_v41  ;;  %v3207_v27 = vadd.f32 %v3206_v17, %v3205_v0  ;;  %3074 = vst.msk [vmem:[%s4970_s3 + $0x38] sm:$0xff] %vm269_vm1, %v3990_v49  ;;  %v3176_v21 = vmul.f32 %v3990_v49, %v3990_v49  ;;  %v3112_v37 = vsel %vm269_vm1, %v3990_v49, 0.0 }
 0x1ea   : > { %v3208_v62 = vsel %vm269_vm1, %v3173_v25, 0.0  ;;  %3072 = vst.msk [vmem:[%s4970_s3 + $0x28] sm:$0xff] %vm269_vm1, %v3991_v52  ;;  %v3108_v4 = vsel %vm269_vm1, %v3991_v52, 0.0  ;;  %v3174_v54 = vmul.f32 %v3991_v52, %v3991_v52  ;;  %v3212_v58 = vsel %vm269_vm1, %v3175_v47, 0.0 }
 0x1eb   : > { %v3209_v7 = vadd.f32 %v3208_v62, %v3207_v27  ;;  %v3109_v1 = vadd.f32 %v3108_v4, %v3107_v26 }
 0x1ec   : > { %v3960_v59 = vpop.f32.mrb[8].mxu0  ;;  %v3210_v45 = vsel %vm269_vm1, %v3174_v54, 0.0 }
 0x1ed   : > { %v3111_v44 = vadd.f32 %v3110_v14, %v3109_v1  ;;  %v3992_v35 = vadd.f32 %v3960_v59, %v4949_v5  ;;  %v2940_v46 = vpop.f32.mrb[9].mxu0  ;;  %v3211_v29 = vadd.f32 %v3210_v45, %v3209_v7 }
 0x1ee   : > { %v3993_v56 = vadd.f32 %v2940_v46, %v4951_v53  ;;  %v3961_v24 = vpop.f32.mrb[10].mxu0  ;;  %v3214_v53 = vsel %vm269_vm1, %v3176_v21, 0.0 }
 0x1ef   : > { %3077 = vst.msk [vmem:[%s4970_s3 + $0x50] sm:$0xff] %vm269_vm1, %v3992_v35  ;;  %v3113_v60 = vadd.f32 %v3112_v37, %v3111_v44  ;;  %v3994_v22 = vadd.f32 %v3961_v24, %v4953_v9  ;;  %v2943_v8 = vpop.f32.mrb[11].mxu0  ;;  %v3213_v23 = vadd.f32 %v3212_v58, %v3211_v29  ;;  %v3179_v33 = vmul.f32 %v3992_v35, %v3992_v35 }
 0x1f0   : > { %3075 = vst.msk [vmem:[%s4970_s3 + $0x40] sm:$0xff] %vm269_vm1, %v3993_v56  ;;  %v3114_v5 = vsel %vm269_vm1, %v3993_v56, 0.0  ;;  %v3177_v28 = vmul.f32 %v3993_v56, %v3993_v56  ;;  %v3995_v30 = vadd.f32 %v2943_v8, %v4955_v10  ;;  %v3118_v63 = vsel %vm269_vm1, %v3992_v35, 0.0 }
 0x1f1   : > { %v3115_v31 = vadd.f32 %v3114_v5, %v3113_v60  ;;  %3078 = vst.msk [vmem:[%s4970_s3 + $0x58] sm:$0xff] %vm269_vm1, %v3994_v22  ;;  %v3215_v32 = vadd.f32 %v3214_v53, %v3213_v23  ;;  %v3180_v36 = vmul.f32 %v3994_v22, %v3994_v22  ;;  %v3120_v39 = vsel %vm269_vm1, %v3994_v22, 0.0 }
 0x1f2   : > { %v3216_v42 = vsel %vm269_vm1, %v3177_v28, 0.0  ;;  %3076 = vst.msk [vmem:[%s4970_s3 + $0x48] sm:$0xff] %vm269_vm1, %v3995_v30  ;;  %v3116_v9 = vsel %vm269_vm1, %v3995_v30, 0.0  ;;  %v3178_v43 = vmul.f32 %v3995_v30, %v3995_v30  ;;  %v3220_v34 = vsel %vm269_vm1, %v3179_v33, 0.0 }
 0x1f3   : > { %v3117_v3 = vadd.f32 %v3116_v9, %v3115_v31  ;;  %v3217_v13 = vadd.f32 %v3216_v42, %v3215_v32 }
 0x1f4   : > { %v3218_v10 = vsel %vm269_vm1, %v3178_v43, 0.0  ;;  %v3964_v15 = vpop.f32.mrb[12].mxu0 }
 0x1f5   : > { %v3119_v38 = vadd.f32 %v3118_v63, %v3117_v3  ;;  %v3996_v2 = vadd.f32 %v3964_v15, %v4957_v57  ;;  %v2956_v6 = vpop.f32.mrb[13].mxu0  ;;  %v3219_v48 = vadd.f32 %v3218_v10, %v3217_v13 }
 0x1f6   : > { %v3997_v19 = vadd.f32 %v2956_v6, %v4959_v50  ;;  %v3965_v20 = vpop.f32.mrb[14].mxu0  ;;  %v3222_v50 = vsel %vm269_vm1, %v3180_v36, 0.0 }
 0x1f7   : > { %3081 = vst.msk [vmem:[%s4970_s3 + $0x70] sm:$0xff] %vm269_vm1, %v3996_v2  ;;  %v3121_v40 = vadd.f32 %v3120_v39, %v3119_v38  ;;  %v3998_v51 = vadd.f32 %v3965_v20, %v4961_v16  ;;  %v2959_v55 = vpop.f32.mrb[15].mxu0  ;;  %v3221_v61 = vadd.f32 %v3220_v34, %v3219_v48  ;;  %v3183_v49 = vmul.f32 %v3996_v2, %v3996_v2 }
 0x1f8   : > { %3079 = vst.msk [vmem:[%s4970_s3 + $0x60] sm:$0xff] %vm269_vm1, %v3997_v19  ;;  %v3122_v57 = vsel %vm269_vm1, %v3997_v19, 0.0  ;;  %v3181_v17 = vmul.f32 %v3997_v19, %v3997_v19  ;;  %v3999_v0 = vadd.f32 %v2959_v55, %v4963_v18  ;;  %v3126_v27 = vsel %vm269_vm1, %v3996_v2, 0.0 }
 0x1f9   : > { %v3123_v41 = vadd.f32 %v3122_v57, %v3121_v40  ;;  %3082 = vst.msk [vmem:[%s4970_s3 + $0x78] sm:$0xff] %vm269_vm1, %v3998_v51  ;;  %v3223_v11 = vadd.f32 %v3222_v50, %v3221_v61  ;;  %v3184_v7 = vmul.f32 %v3998_v51, %v3998_v51  ;;  %v3128_v21 = vsel %vm269_vm1, %v3998_v51, 0.0 }
 0x1fa   : > { %v3224_v12 = vsel %vm269_vm1, %v3181_v17, 0.0  ;;  %3080 = vst.msk [vmem:[%s4970_s3 + $0x68] sm:$0xff] %vm269_vm1, %v3999_v0  ;;  %v3124_v16 = vsel %vm269_vm1, %v3999_v0, 0.0  ;;  %v3182_v25 = vmul.f32 %v3999_v0, %v3999_v0  ;;  %v3228_v37 = vsel %vm269_vm1, %v3183_v49, 0.0 }
 0x1fb   : > { %v3125_v52 = vadd.f32 %v3124_v16, %v3123_v41  ;;  %v3832_v26 = vpop.f32.mrb[16].mxu1  ;;  %v3225_v18 = vadd.f32 %v3224_v12, %v3223_v11  ;;  %v3230_v23 = vsel %vm269_vm1, %v3184_v7, 0.0 }
 0x1fc   : > { %v3226_v62 = vsel %vm269_vm1, %v3182_v25, 0.0  ;;  %v1793_v4 = vpop.f32.mrb[17].mxu1  ;;  %v3968_v47 = vpop.f32.mrb[16].mxu0 }
 0x1fd   : > { %v3127_v1 = vadd.f32 %v3126_v27, %v3125_v52  ;;  %v4000_v54 = vadd.f32 %v3968_v47, %v3832_v26  ;;  %v3833_v14 = vpop.f32.mrb[18].mxu1  ;;  %v2972_v59 = vpop.f32.mrb[17].mxu0  ;;  %v3227_v44 = vadd.f32 %v3226_v62, %v3225_v18 }
 0x1fe   : > { %v4001_v45 = vadd.f32 %v2972_v59, %v1793_v4  ;;  %v1796_v35 = vpop.f32.mrb[19].mxu1  ;;  %v3969_v46 = vpop.f32.mrb[18].mxu0 }
 0x1ff   : > { %3085 = vst.msk [vmem:[%s4970_s3 + $0x90] sm:$0xff] %vm269_vm1, %v4000_v54  ;;  %v3129_v29 = vadd.f32 %v3128_v21, %v3127_v1  ;;  %v4002_v56 = vadd.f32 %v3969_v46, %v3833_v14  ;;  %v2975_v24 = vpop.f32.mrb[19].mxu0  ;;  %v3229_v58 = vadd.f32 %v3228_v37, %v3227_v44  ;;  %v3187_v32 = vmul.f32 %v4000_v54, %v4000_v54 }
 0x200   : > { %3083 = vst.msk [vmem:[%s4970_s3 + $0x80] sm:$0xff] %vm269_vm1, %v4001_v45  ;;  %v3130_v60 = vsel %vm269_vm1, %v4001_v45, 0.0  ;;  %v3185_v22 = vmul.f32 %v4001_v45, %v4001_v45  ;;  %v4003_v8 = vadd.f32 %v2975_v24, %v1796_v35  ;;  %v3134_v43 = vsel %vm269_vm1, %v4000_v54, 0.0 }
 0x201   : > { %v3131_v5 = vadd.f32 %v3130_v60, %v3129_v29  ;;  %3086 = vst.msk [vmem:[%s4970_s3 + $0x98] sm:$0xff] %vm269_vm1, %v4002_v56  ;;  %v3231_v28 = vadd.f32 %v3230_v23, %v3229_v58  ;;  %v3188_v10 = vmul.f32 %v4002_v56, %v4002_v56  ;;  %v3136_v6 = vsel %vm269_vm1, %v4002_v56, 0.0 }
 0x202   : > { %v3232_v30 = vsel %vm269_vm1, %v3185_v22, 0.0  ;;  %3084 = vst.msk [vmem:[%s4970_s3 + $0x88] sm:$0xff] %vm269_vm1, %v4003_v8  ;;  %v3132_v53 = vsel %vm269_vm1, %v4003_v8, 0.0  ;;  %v3186_v31 = vmul.f32 %v4003_v8, %v4003_v8  ;;  %v3236_v34 = vsel %vm269_vm1, %v3187_v32, 0.0 }
 0x203   : > { %v3133_v42 = vadd.f32 %v3132_v53, %v3131_v5  ;;  %v3836_v9 = vpop.f32.mrb[20].mxu1  ;;  %v3233_v33 = vadd.f32 %v3232_v30, %v3231_v28  ;;  %v3238_v50 = vsel %vm269_vm1, %v3188_v10, 0.0 }
 0x204   : > { %v3234_v3 = vsel %vm269_vm1, %v3186_v31, 0.0  ;;  %v1809_v63 = vpop.f32.mrb[21].mxu1  ;;  %v3972_v13 = vpop.f32.mrb[20].mxu0 }
 0x205   : > { %v3135_v15 = vadd.f32 %v3134_v43, %v3133_v42  ;;  %v4004_v36 = vadd.f32 %v3972_v13, %v3836_v9  ;;  %v3837_v38 = vpop.f32.mrb[22].mxu1  ;;  %v2988_v2 = vpop.f32.mrb[21].mxu0  ;;  %v3235_v39 = vadd.f32 %v3234_v3, %v3233_v33 }
 0x206   : > { %v4005_v48 = vadd.f32 %v2988_v2, %v1809_v63  ;;  %v1812_v19 = vpop.f32.mrb[23].mxu1  ;;  %v3973_v20 = vpop.f32.mrb[22].mxu0 }
 0x207   : > { %3089 = vst.msk [vmem:[%s4970_s3 + $0xb0] sm:$0xff] %vm269_vm1, %v4004_v36  ;;  %v3137_v40 = vadd.f32 %v3136_v6, %v3135_v15  ;;  %v4006_v51 = vadd.f32 %v3973_v20, %v3837_v38  ;;  %v2991_v55 = vpop.f32.mrb[23].mxu0  ;;  %v3237_v61 = vadd.f32 %v3236_v34, %v3235_v39  ;;  %v3191_v49 = vmul.f32 %v4004_v36, %v4004_v36 }
 0x208   : > { %3087 = vst.msk [vmem:[%s4970_s3 + $0xa0] sm:$0xff] %vm269_vm1, %v4005_v48  ;;  %v3138_v57 = vsel %vm269_vm1, %v4005_v48, 0.0  ;;  %v3189_v17 = vmul.f32 %v4005_v48, %v4005_v48  ;;  %v4007_v0 = vadd.f32 %v2991_v55, %v1812_v19  ;;  %v3142_v27 = vsel %vm269_vm1, %v4004_v36, 0.0 }
 0x209   : > { %v3139_v41 = vadd.f32 %v3138_v57, %v3137_v40  ;;  %3090 = vst.msk [vmem:[%s4970_s3 + $0xb8] sm:$0xff] %vm269_vm1, %v4006_v51  ;;  %v3239_v11 = vadd.f32 %v3238_v50, %v3237_v61  ;;  %v3192_v7 = vmul.f32 %v4006_v51, %v4006_v51  ;;  %v3144_v21 = vsel %vm269_vm1, %v4006_v51, 0.0 }
 0x20a   : > { %v3240_v12 = vsel %vm269_vm1, %v3189_v17, 0.0  ;;  %3088 = vst.msk [vmem:[%s4970_s3 + $0xa8] sm:$0xff] %vm269_vm1, %v4007_v0  ;;  %v3140_v16 = vsel %vm269_vm1, %v4007_v0, 0.0  ;;  %v3190_v25 = vmul.f32 %v4007_v0, %v4007_v0  ;;  %v3244_v37 = vsel %vm269_vm1, %v3191_v49, 0.0 }
 0x20b   : > { %v3141_v52 = vadd.f32 %v3140_v16, %v3139_v41  ;;  %v3840_v26 = vpop.f32.mrb[24].mxu1  ;;  %v3241_v18 = vadd.f32 %v3240_v12, %v3239_v11  ;;  %v3246_v23 = vsel %vm269_vm1, %v3192_v7, 0.0 }
 0x20c   : > { %v3242_v62 = vsel %vm269_vm1, %v3190_v25, 0.0  ;;  %v1825_v4 = vpop.f32.mrb[25].mxu1  ;;  %v3976_v47 = vpop.f32.mrb[24].mxu0 }
 0x20d   : > { %v3143_v1 = vadd.f32 %v3142_v27, %v3141_v52  ;;  %v4008_v54 = vadd.f32 %v3976_v47, %v3840_v26  ;;  %v3841_v14 = vpop.f32.mrb[26].mxu1  ;;  %v3004_v59 = vpop.f32.mrb[25].mxu0  ;;  %v3243_v44 = vadd.f32 %v3242_v62, %v3241_v18 }
 0x20e   : > { %v4009_v45 = vadd.f32 %v3004_v59, %v1825_v4  ;;  %v1828_v35 = vpop.f32.mrb[27].mxu1  ;;  %v3977_v46 = vpop.f32.mrb[26].mxu0 }
 0x20f   : > { %3093 = vst.msk [vmem:[%s4970_s3 + $0xd0] sm:$0xff] %vm269_vm1, %v4008_v54  ;;  %v3145_v29 = vadd.f32 %v3144_v21, %v3143_v1  ;;  %v4010_v56 = vadd.f32 %v3977_v46, %v3841_v14  ;;  %v3007_v24 = vpop.f32.mrb[27].mxu0  ;;  %v3245_v58 = vadd.f32 %v3244_v37, %v3243_v44  ;;  %v3195_v32 = vmul.f32 %v4008_v54, %v4008_v54 }
 0x210   : > { %3091 = vst.msk [vmem:[%s4970_s3 + $0xc0] sm:$0xff] %vm269_vm1, %v4009_v45  ;;  %v3146_v60 = vsel %vm269_vm1, %v4009_v45, 0.0  ;;  %v3193_v22 = vmul.f32 %v4009_v45, %v4009_v45  ;;  %v4011_v8 = vadd.f32 %v3007_v24, %v1828_v35  ;;  %v3150_v43 = vsel %vm269_vm1, %v4008_v54, 0.0 }
 0x211   : > { %v3147_v5 = vadd.f32 %v3146_v60, %v3145_v29  ;;  %3094 = vst.msk [vmem:[%s4970_s3 + $0xd8] sm:$0xff] %vm269_vm1, %v4010_v56  ;;  %v3247_v28 = vadd.f32 %v3246_v23, %v3245_v58  ;;  %v3196_v10 = vmul.f32 %v4010_v56, %v4010_v56  ;;  %v3152_v6 = vsel %vm269_vm1, %v4010_v56, 0.0 }
 0x212   : > { %v3248_v30 = vsel %vm269_vm1, %v3193_v22, 0.0  ;;  %3092 = vst.msk [vmem:[%s4970_s3 + $0xc8] sm:$0xff] %vm269_vm1, %v4011_v8  ;;  %v3148_v53 = vsel %vm269_vm1, %v4011_v8, 0.0  ;;  %v3194_v31 = vmul.f32 %v4011_v8, %v4011_v8  ;;  %v3252_v34 = vsel %vm269_vm1, %v3195_v32, 0.0 }
 0x213   : > { %v3149_v42 = vadd.f32 %v3148_v53, %v3147_v5  ;;  %v3844_v9 = vpop.f32.mrb[28].mxu1  ;;  %v3249_v33 = vadd.f32 %v3248_v30, %v3247_v28  ;;  %v3254_v50 = vsel %vm269_vm1, %v3196_v10, 0.0 }
 0x214   : > { %v3250_v3 = vsel %vm269_vm1, %v3194_v31, 0.0  ;;  %v1841_v63 = vpop.f32.mrb[29].mxu1  ;;  %v3980_v13 = vpop.f32.mrb[28].mxu0 }
 0x215   : > { %v3151_v15 = vadd.f32 %v3150_v43, %v3149_v42  ;;  %v4012_v36 = vadd.f32 %v3980_v13, %v3844_v9  ;;  %v3845_v38 = vpop.f32.mrb[30].mxu1  ;;  %v3020_v2 = vpop.f32.mrb[29].mxu0  ;;  %v3251_v39 = vadd.f32 %v3250_v3, %v3249_v33 }
 0x216   : > { %v4013_v48 = vadd.f32 %v3020_v2, %v1841_v63  ;;  %v1844_v19 = vpop.f32.mrb[31].mxu1  ;;  %v3981_v20 = vpop.f32.mrb[30].mxu0 }
 0x217   : > { %3097 = vst.msk [vmem:[%s4970_s3 + $0xf0] sm:$0xff] %vm269_vm1, %v4012_v36  ;;  %v3153_v40 = vadd.f32 %v3152_v6, %v3151_v15  ;;  %v4014_v51 = vadd.f32 %v3981_v20, %v3845_v38  ;;  %v3023_v55 = vpop.f32.mrb[31].mxu0  ;;  %v3253_v61 = vadd.f32 %v3252_v34, %v3251_v39  ;;  %v3199_v49 = vmul.f32 %v4012_v36, %v4012_v36 }
 0x218   : > { %3095 = vst.msk [vmem:[%s4970_s3 + $0xe0] sm:$0xff] %vm269_vm1, %v4013_v48  ;;  %v3154_v57 = vsel %vm269_vm1, %v4013_v48, 0.0  ;;  %v3197_v17 = vmul.f32 %v4013_v48, %v4013_v48  ;;  %v4015_v0 = vadd.f32 %v3023_v55, %v1844_v19  ;;  %v3158_v26 = vsel %vm269_vm1, %v4012_v36, 0.0 }
 0x219   : > { %v3155_v41 = vadd.f32 %v3154_v57, %v3153_v40  ;;  %3098 = vst.msk [vmem:[%s4970_s3 + $0xf8] sm:$0xff] %vm269_vm1, %v4014_v51  ;;  %v3255_v11 = vadd.f32 %v3254_v50, %v3253_v61  ;;  %v3200_v62 = vmul.f32 %v4014_v51, %v4014_v51  ;;  %v3160_v47 = vsel %vm269_vm1, %v4014_v51, 0.0 }
 0x21a   : > { %v3256_v12 = vsel %vm269_vm1, %v3197_v17, 0.0  ;;  %3096 = vst.msk [vmem:[%s4970_s3 + $0xe8] sm:$0xff] %vm269_vm1, %v4015_v0  ;;  %v3156_v16 = vsel %vm269_vm1, %v4015_v0, 0.0  ;;  %v3198_v25 = vmul.f32 %v4015_v0, %v4015_v0  ;;  %v3260_v1 = vsel %vm269_vm1, %v3199_v49, 0.0 }
 0x21b   : > { %v3157_v52 = vadd.f32 %v3156_v16, %v3155_v41  ;;  %v3257_v27 = vadd.f32 %v3256_v12, %v3255_v11  ;;  %v3262_v59 = vsel %vm269_vm1, %v3200_v62, 0.0 }
 0x21c   : > { %v3258_v18 = vsel %vm269_vm1, %v3198_v25, 0.0 }
 0x21d   : > { %v3159_v4 = vadd.f32 %v3158_v26, %v3157_v52  ;;  %v3259_v7 = vadd.f32 %v3258_v18, %v3257_v27 }
 0x21f   : > { %v3161_v54 = vadd.f32 %v3160_v47, %v3159_v4  ;;  %v3261_v14 = vadd.f32 %v3260_v1, %v3259_v7 }
 0x221   : > { %v3162_v21 = vrot.slane %v3161_v54, 4  ;;  %v3263_v44 = vadd.f32 %v3262_v59, %v3261_v14 }
 0x223   : > { %v3163_v45 = vadd.f32 %v3162_v21, %v3161_v54  ;;  %v3264_v35 = vrot.slane %v3263_v44, 4 }
 0x225   : > { %v3164_v46 = vrot.slane %v3163_v45, 2  ;;  %v3265_v37 = vadd.f32 %v3264_v35, %v3263_v44 }
 0x227   : > { %v3165_v29 = vadd.f32 %v3164_v46, %v3163_v45  ;;  %v3266_v56 = vrot.slane %v3265_v37, 2 }
 0x229   : > { %v3166_v24 = vrot.slane %v3165_v29, 1  ;;  %v3267_v58 = vadd.f32 %v3266_v56, %v3265_v37 }
 0x22b   : > { %v3167_v60 = vadd.f32 %v3166_v24, %v3165_v29  ;;  %v3268_v22 = vrot.slane %v3267_v58, 1 }
 0x22d   : > { %3168 = vst.msk [vmem:[%s235_s22] sm:$0x1] %vm284_vm2, %v3167_v60  ;;  %v3269_v8 = vadd.f32 %v3268_v22, %v3267_v58 }
 0x22f   : > { %3270 = vst.msk [vmem:[%s235_s22 + $0x1] sm:$0x1] %vm284_vm2, %v3269_v8 }
 0x230 PF: > { %s16_s18 = sadd.s32 1, %s4265_s18  }
 0x231   : > { %p13_p4 = scmp.ge.s32.totalorder %s16_s18, 4  }
 0x233   :  { %15 = sbr.rel (!%p13_p4) target bundleno = 1 (0x1), region = 95 }

// kernel: basic_block_forward.4
= control target key start
LH: loop header
LB: loop body
LE: loop exit
PB: predicated region body
PF: predicated region fallthrough
CT: control target
= control target key end

     0   :  { %s4797_s18 = smov 0   ;;  %s5880_s0 = inlined_call_operand.vmem [shape: f32[2,16,16,4], index: 0, kind: input, shape index: {}]   ;;  %s5881_s1 = inlined_call_operand.vmem [shape: bf16[9,4,4], index: 1, kind: input, shape index: {}]   ;;  %s5882_s2 = inlined_call_operand.vmem [shape: f32[1,4], index: 2, kind: input, shape index: {}]   ;;  %s5883_s3 = inlined_call_operand.vmem [shape: f32[1,4], index: 3, kind: input, shape index: {}]   ;;  %s5884_s4 = inlined_call_operand.vmem [shape: f32[2,256,4], index: 4, kind: output, shape index: {0}]   ;;  %s5885_s5 = inlined_call_operand.vmem [shape: f32[2,2,4], index: 5, kind: output, shape index: {1}]  }
   0x1 LB: > { %s3723_s19 = sadd.s32 4294967295, %s4764_s18   ;;  %p3727_p0 = scmp.ge.s32.totalorder %s4764_s18, 1  ;;  %s4764_s18 = sphi %s4797_s18, %s16_s18  }
   0x2   : > { %p190_p1 = scmp.lt.s32.totalorder %s4764_s18, 3 }
   0x4   : > { %p191_p2 = pnand %p3727_p0, %p190_p1 }
   0x5   : > { %v3735_v0 = vld [vmem:[%s5881_s1 + $0x2] sm:$0x3] (!%p191_p2)  ;;  %vm994_vm0 = vcmask (!%p191_p2), 1041408   ;;  %v3802_v1 = vld [vmem:[%s5881_s1 + $0x8] sm:$0x3] (!%p191_p2)  ;;  %vm635_vm1 = vcmask (!%p191_p2), 31744  }
   0x6   : > { %194 = sbr.rel (%p191_p2) target bundleno = 608 (0x260), region = 36  ;;  %4608 = vmatprep.subr.msk.bf16.mxu1 (!%p191_p2), %vm994_vm0, %v3735_v0  ;;  %4612 = vmatprep.subr.msk.bf16.mxu0 (!%p191_p2), %vm994_vm0, %v3802_v1  ;;  %v996_v2 = vsel (!%p191_p2), %vm994_vm0, %v3735_v0, 0  ;;  %v4815_v3 = vsel (!%p191_p2), %vm994_vm0, %v3802_v1, 0  ;;  %p4819_p3 = scmp.lt.s32.totalorder (!%p191_p2), %s3723_s19, 1  ;;  %v4766_v4 = vmov (!%p191_p2), 0.0   ;;  %vm650_vm2 = vcmask (!%p191_p2), 24576  }
   0x7   : > { %4045 = vmatpush3.bf16.msra.mxu1 (!%p191_p2), %v996_v2  ;;  %4181 = vmatpush3.bf16.msra.mxu0 (!%p191_p2), %v4815_v3  ;;  %638 = vst.msk [vmem:[#allocation2 + $0x120] sm:$0xff] (!%p191_p2), %vm635_vm1, %v4766_v4  ;;  %639 = vst.msk [vmem:[#allocation2 + $0x128] sm:$0xff] (!%p191_p2), %vm635_vm1, %v4766_v4  ;;  %v894_v5 = vld [vmem:[%s5881_s1] sm:$0x3] (!%p191_p2)  ;;  %v3819_v6 = vld [vmem:[%s5881_s1 + $0xa] sm:$0x3] (!%p191_p2) }
   0x8   : > { %636 = vst.msk [vmem:[#allocation2] sm:$0xff] (!%p191_p2), %vm635_vm1, %v4766_v4  ;;  %637 = vst.msk [vmem:[#allocation2 + $0x8] sm:$0xff] (!%p191_p2), %vm635_vm1, %v4766_v4  ;;  %4609 = vmatprep.subr.msk.bf16.mxu1 (!%p191_p2), %vm994_vm0, %v894_v5  ;;  %4614 = vmatprep.subr.msk.bf16.mxu0 (!%p191_p2), %vm994_vm0, %v3819_v6  ;;  %v4886_v7 = vld [vmem:[%s5882_s2] ss:$0 sm:$0xff] (!%p191_p2)  ;;  %v4906_v14 = vsel (!%p191_p2), %vm994_vm0, %v894_v5, 0  ;;  %v4914_v22 = vsel (!%p191_p2), %vm994_vm0, %v3819_v6, 0 }
   0x9   : > { %640 = vst.msk [vmem:[#allocation2 + $0x240] sm:$0xff] (!%p191_p2), %vm635_vm1, %v4766_v4  ;;  %641 = vst.msk [vmem:[#allocation2 + $0x248] sm:$0xff] (!%p191_p2), %vm635_vm1, %v4766_v4  ;;  %v4898_v8 = vld [vmem:[%s5883_s3] ss:$0 sm:$0xff] (!%p191_p2)  ;;  %vm750_vm3 = vcmask (!%p191_p2), 30720  }
   0xa   : > { %643 = vst.msk [vmem:[#allocation2 + $0x110] sm:$0xff] (!%p191_p2), %vm635_vm1, %v4766_v4  ;;  %644 = vst.msk [vmem:[#allocation2 + $0x118] sm:$0xff] (!%p191_p2), %vm635_vm1, %v4766_v4 }
   0xb   : > { %645 = vst.msk [vmem:[#allocation2 + $0x230] sm:$0xff] (!%p191_p2), %vm635_vm1, %v4766_v4  ;;  %646 = vst.msk [vmem:[#allocation2 + $0x238] sm:$0xff] (!%p191_p2), %vm635_vm1, %v4766_v4 }
   0xc   : > { %647 = vst.msk [vmem:[#allocation2 + $0x350] sm:$0xff] (!%p191_p2), %vm635_vm1, %v4766_v4  ;;  %648 = vst.msk [vmem:[#allocation2 + $0x358] sm:$0xff] (!%p191_p2), %vm635_vm1, %v4766_v4 }
   0xd   : > { %s5888_s19 = smov (!%p4819_p3, %s3723_s19), 1  ;;  %668 = vst.msk [vmem:[#allocation2 + $0x25f] sm:$0x1] %vm650_vm2, %v4766_v4  ;;  %651 = vst.msk [vmem:[#allocation2 + $0x10] sm:$0x1] %vm650_vm2, %v4766_v4 }
   0xe   : > { %652 = vst.msk [vmem:[#allocation2 + $0x20] sm:$0x1] %vm650_vm2, %v4766_v4  ;;  %653 = vst.msk [vmem:[#allocation2 + $0x30] sm:$0x1] %vm650_vm2, %v4766_v4  ;;  %s3889_s29 = sshll.u32 %s5888_s19, 8  ;;  %v896_v19 = vld [vmem:[#allocation2 + $0x120] sm:$0xff] }
   0xf   : > { %654 = vst.msk [vmem:[#allocation2 + $0x40] sm:$0x1] %vm650_vm2, %v4766_v4  ;;  %655 = vst.msk [vmem:[#allocation2 + $0x50] sm:$0x1] %vm650_vm2, %v4766_v4  ;;  %s4893_s9 = scalar_lea.vmem %s5880_s0, %s3889_s29  ;;  %v897_v20 = vld [vmem:[#allocation2 + $0x128] sm:$0xff]  ;;  %s5725_s8 = scalar_lea.vmem %s5884_s4, %s3889_s29 }
  0x10   : > { %656 = vst.msk [vmem:[#allocation2 + $0x60] sm:$0x1] %vm650_vm2, %v4766_v4  ;;  %657 = vst.msk [vmem:[#allocation2 + $0x70] sm:$0x1] %vm650_vm2, %v4766_v4  ;;  %v237_v9 = vld [vmem:[%s4893_s9] sm:$0xff]  ;;  %v238_v10 = vld [vmem:[%s4893_s9 + $0x8] sm:$0xff]  ;;  %v928_v26 = vpack.c.bf16 %v897_v20, %v896_v19 }
  0x11   : > { %658 = vst.msk [vmem:[#allocation2 + $0x80] sm:$0x1] %vm650_vm2, %v4766_v4  ;;  %659 = vst.msk [vmem:[#allocation2 + $0x90] sm:$0x1] %vm650_vm2, %v4766_v4  ;;  %v239_v11 = vld [vmem:[%s4893_s9 + $0x10] sm:$0xff]  ;;  %v276_v12 = vmul.f32 %v4886_v7, %v237_v9  ;;  %v277_v13 = vmul.f32 %v4886_v7, %v238_v10  ;;  %v240_v15 = vld [vmem:[%s4893_s9 + $0x18] sm:$0xff] }
  0x12   : > { %660 = vst.msk [vmem:[#allocation2 + $0xa0] sm:$0x1] %vm650_vm2, %v4766_v4  ;;  %661 = vst.msk [vmem:[#allocation2 + $0xb0] sm:$0x1] %vm650_vm2, %v4766_v4  ;;  %v278_v16 = vmul.f32 %v4886_v7, %v239_v11  ;;  %v241_v17 = vld [vmem:[%s4893_s9 + $0x20] sm:$0xff]  ;;  %v242_v18 = vld [vmem:[%s4893_s9 + $0x28] sm:$0xff]  ;;  %v279_v21 = vmul.f32 %v4886_v7, %v240_v15  ;;  %4046 = vmatprep.mubr.msk.bf16.mxu1 %vm635_vm1, %v928_v26 }
  0x13   : > { %662 = vst.msk [vmem:[#allocation2 + $0xc0] sm:$0x1] %vm650_vm2, %v4766_v4  ;;  %663 = vst.msk [vmem:[#allocation2 + $0xd0] sm:$0x1] %vm650_vm2, %v4766_v4  ;;  %v280_v23 = vmul.f32 %v4886_v7, %v241_v17  ;;  %v281_v24 = vmul.f32 %v4886_v7, %v242_v18  ;;  %v243_v25 = vld [vmem:[%s4893_s9 + $0x30] sm:$0xff]  ;;  %v4920_v27 = vadd.f32 %v4898_v8, %v276_v12  ;;  %v244_v30 = vld [vmem:[%s4893_s9 + $0x38] sm:$0xff] }
  0x14   : > { %664 = vst.msk [vmem:[#allocation2 + $0xe0] sm:$0x1] %vm650_vm2, %v4766_v4  ;;  %665 = vst.msk [vmem:[#allocation2 + $0xf0] sm:$0x1] %vm650_vm2, %v4766_v4  ;;  %v4923_v28 = vadd.f32 %v4898_v8, %v277_v13  ;;  %v4926_v29 = vadd.f32 %v4898_v8, %v278_v16  ;;  %v4930_v31 = vadd.f32 %v4898_v8, %v279_v21  ;;  %v245_v39 = vld [vmem:[%s4893_s9 + $0x40] sm:$0xff]  ;;  %v246_v44 = vld [vmem:[%s4893_s9 + $0x48] sm:$0xff] }
  0x15   : > { %666 = vst.msk [vmem:[#allocation2 + $0x100] sm:$0x1] %vm650_vm2, %v4766_v4  ;;  %669 = vst.msk [vmem:[#allocation2 + $0x26f] sm:$0x1] %vm650_vm2, %v4766_v4  ;;  %v4933_v32 = vadd.f32 %v4898_v8, %v280_v23  ;;  %v4936_v33 = vadd.f32 %v4898_v8, %v281_v24  ;;  %v282_v34 = vmul.f32 %v4886_v7, %v243_v25  ;;  %v347_v35 = vmin.f32 %v4920_v27, 20.0  ;;  %v247_v45 = vld [vmem:[%s4893_s9 + $0x50] sm:$0xff] }
  0x16   : > { %670 = vst.msk [vmem:[#allocation2 + $0x27f] sm:$0x1] %vm650_vm2, %v4766_v4  ;;  %671 = vst.msk [vmem:[#allocation2 + $0x28f] sm:$0x1] %vm650_vm2, %v4766_v4  ;;  %v348_v36 = vmin.f32 %v4923_v28, 20.0  ;;  %v349_v37 = vmin.f32 %v4926_v29, 20.0  ;;  %v283_v38 = vmul.f32 %v4886_v7, %v244_v30  ;;  %v284_v54 = vmul.f32 %v4886_v7, %v245_v39 }
  0x17   : > { %672 = vst.msk [vmem:[#allocation2 + $0x29f] sm:$0x1] %vm650_vm2, %v4766_v4  ;;  %673 = vst.msk [vmem:[#allocation2 + $0x2af] sm:$0x1] %vm650_vm2, %v4766_v4  ;;  %v350_v40 = vmin.f32 %v4930_v31, 20.0  ;;  %v351_v41 = vmin.f32 %v4933_v32, 20.0  ;;  %v4949_v43 = vadd.f32 %v4898_v8, %v282_v34  ;;  %v285_v57 = vmul.f32 %v4886_v7, %v246_v44 }
  0x18   : > { %674 = vst.msk [vmem:[#allocation2 + $0x2bf] sm:$0x1] %vm650_vm2, %v4766_v4  ;;  %675 = vst.msk [vmem:[#allocation2 + $0x2cf] sm:$0x1] %vm650_vm2, %v4766_v4  ;;  %v352_v42 = vmin.f32 %v4936_v33, 20.0  ;;  %v248_v46 = vld [vmem:[%s4893_s9 + $0x58] sm:$0xff]  ;;  %v4955_v50 = vadd.f32 %v4898_v8, %v283_v38  ;;  %v4962_v58 = vadd.f32 %v4898_v8, %v284_v54  ;;  %v286_v59 = vmul.f32 %v4886_v7, %v247_v45 }
  0x19   : > { %676 = vst.msk [vmem:[#allocation2 + $0x2df] sm:$0x1] %vm650_vm2, %v4766_v4  ;;  %677 = vst.msk [vmem:[#allocation2 + $0x2ef] sm:$0x1] %vm650_vm2, %v4766_v4  ;;  %v379_v47 = vmul.f32 1.442695, %v347_v35  ;;  %v287_v60 = vmul.f32 %v4886_v7, %v248_v46  ;;  %v4969_v1 = vadd.f32 %v4898_v8, %v285_v57 }
  0x1a   : > { %678 = vst.msk [vmem:[#allocation2 + $0x2ff] sm:$0x1] %vm650_vm2, %v4766_v4  ;;  %679 = vst.msk [vmem:[#allocation2 + $0x30f] sm:$0x1] %vm650_vm2, %v4766_v4  ;;  %v381_v48 = vmul.f32 1.442695, %v348_v36 }
  0x1b   : > { %680 = vst.msk [vmem:[#allocation2 + $0x31f] sm:$0x1] %vm650_vm2, %v4766_v4  ;;  %681 = vst.msk [vmem:[#allocation2 + $0x32f] sm:$0x1] %vm650_vm2, %v4766_v4  ;;  %v383_v49 = vmul.f32 1.442695, %v349_v37  ;;  %4627 = vpow2.f32 %v379_v47  ;;  %v4976_v5 = vadd.f32 %v4898_v8, %v287_v60 }
  0x1c   : > { %682 = vst.msk [vmem:[#allocation2 + $0x33f] sm:$0x1] %vm650_vm2, %v4766_v4  ;;  %683 = vst.msk [vmem:[#allocation2 + $0x34f] sm:$0x1] %vm650_vm2, %v4766_v4  ;;  %v385_v51 = vmul.f32 1.442695, %v350_v40  ;;  %4629 = vpow2.f32 %v381_v48  ;;  %v4973_v4 = vadd.f32 %v4898_v8, %v286_v59 }
  0x1d   : > { %v387_v52 = vmul.f32 1.442695, %v351_v41  ;;  %v389_v53 = vmul.f32 1.442695, %v352_v42  ;;  %v353_v55 = vmin.f32 %v4949_v43, 20.0  ;;  %v354_v56 = vmin.f32 %v4955_v50, 20.0 }
  0x1e   : > { %v249_v61 = vld [vmem:[%s4893_s9 + $0x60] sm:$0xff]  ;;  %v250_v62 = vld [vmem:[%s4893_s9 + $0x68] sm:$0xff]  ;;  %4631 = vpow2.f32 %v383_v49  ;;  %v355_v2 = vmin.f32 %v4962_v58, 20.0  ;;  %v356_v6 = vmin.f32 %v4969_v1, 20.0  ;;  %v251_v11 = vld [vmem:[%s4893_s9 + $0x70] sm:$0xff]  ;;  %v357_v13 = vmin.f32 %v4973_v4, 20.0 }
  0x1f   : > { %v391_v63 = vmul.f32 1.442695, %v353_v55  ;;  %v393_v0 = vmul.f32 1.442695, %v354_v56  ;;  %4633 = vpow2.f32 %v385_v51  ;;  %v288_v9 = vmul.f32 %v4886_v7, %v249_v61  ;;  %v252_v16 = vld [vmem:[%s4893_s9 + $0x78] sm:$0xff]  ;;  %v253_v20 = vld [vmem:[%s4893_s9 + $0x80] sm:$0xff] }
  0x20   : > { %4635 = vpow2.f32 %v387_v52  ;;  %v289_v10 = vmul.f32 %v4886_v7, %v250_v62  ;;  %v395_v12 = vmul.f32 1.442695, %v355_v2  ;;  %v358_v15 = vmin.f32 %v4976_v5, 20.0  ;;  %v254_v21 = vld [vmem:[%s4893_s9 + $0x88] sm:$0xff]  ;;  %s3732_s29 = sshll.u32 %s5888_s19, 1 }
  0x21   : > { %4637 = vpow2.f32 %v389_v53  ;;  %v397_v17 = vmul.f32 1.442695, %v356_v6  ;;  %v4986_v18 = vadd.f32 %v4898_v8, %v288_v9  ;;  %v399_v23 = vmul.f32 1.442695, %v357_v13  ;;  %s235_s11 = scalar_lea.vmem %s5885_s5, %s3732_s29 }
  0x22   : > { %4639 = vpow2.f32 %v391_v63  ;;  %v4989_v19 = vadd.f32 %v4898_v8, %v289_v10  ;;  %v401_v24 = vmul.f32 1.442695, %v358_v15  ;;  %v290_v25 = vmul.f32 %v4886_v7, %v251_v11 }
  0x23   : > { %4641 = vpow2.f32 %v393_v0  ;;  %v359_v26 = vmin.f32 %v4986_v18, 20.0  ;;  %v291_v34 = vmul.f32 %v4886_v7, %v252_v16  ;;  %v292_v36 = vmul.f32 %v4886_v7, %v253_v20 }
  0x24   : > { %4643 = vpow2.f32 %v395_v12  ;;  %v360_v30 = vmin.f32 %v4989_v19, 20.0  ;;  %v4998_v35 = vadd.f32 %v4898_v8, %v290_v25  ;;  %v293_v37 = vmul.f32 %v4886_v7, %v254_v21 }
  0x25   : > { %4645 = vpow2.f32 %v397_v17  ;;  %v4628_v38 = vpop.eup %4627  ;;  %v403_v39 = vmul.f32 1.442695, %v359_v26  ;;  %v5003_v41 = vadd.f32 %v4898_v8, %v291_v34  ;;  %v5007_v46 = vadd.f32 %v4898_v8, %v292_v36 }
  0x26   : > { %4647 = vpow2.f32 %v399_v23  ;;  %v405_v40 = vmul.f32 1.442695, %v360_v30  ;;  %v4630_v42 = vpop.eup %4629  ;;  %v443_v44 = vadd.f32 2.0, %v4628_v38  ;;  %v361_v45 = vmin.f32 %v4998_v35, 20.0 }
  0x27   : > { %4649 = vpow2.f32 %v401_v24  ;;  %v444_v48 = vadd.f32 2.0, %v4630_v42  ;;  %v362_v49 = vmin.f32 %v5003_v41, 20.0  ;;  %v5011_v51 = vadd.f32 %v4898_v8, %v293_v37 }
  0x28   : > { %v4632_v47 = vpop.eup %4631  ;;  %4651 = vpow2.f32 %v403_v39  ;;  %v475_v53 = vmul.f32 %v4628_v38, %v443_v44  ;;  %v5013_v55 = vmul.f32 1.442695, %v361_v45  ;;  %v363_v61 = vmin.f32 %v5007_v46, 20.0 }
  0x29   : > { %v4634_v52 = vpop.eup %4633  ;;  %v445_v54 = vadd.f32 2.0, %v4632_v47  ;;  %4653 = vpow2.f32 %v405_v40  ;;  %v476_v57 = vmul.f32 %v4630_v42, %v444_v48  ;;  %v5015_v60 = vmul.f32 1.442695, %v362_v49 }
  0x2a   : > { %v4636_v56 = vpop.eup %4635  ;;  %v446_v59 = vadd.f32 2.0, %v4634_v52  ;;  %v507_v63 = vmul.f32 %v475_v53, %v4920_v27  ;;  %v539_v0 = vadd.f32 2.0, %v475_v53 }
  0x2b   : > { %v4638_v62 = vpop.eup %4637  ;;  %v477_v2 = vmul.f32 %v4632_v47, %v445_v54  ;;  %v447_v6 = vadd.f32 2.0, %v4636_v56  ;;  %v5020_v10 = vmul.f32 %v476_v57, %v4923_v28  ;;  %v540_v11 = vadd.f32 2.0, %v476_v57 }
  0x2c   : > { %v4640_v9 = vpop.eup %4639  ;;  %v478_v12 = vmul.f32 %v4634_v52, %v446_v59  ;;  %v448_v13 = vadd.f32 2.0, %v4638_v62  ;;  %4655 = vrcp.f32 %v539_v0 }
  0x2d   : > { %v4642_v15 = vpop.eup %4641  ;;  %v5023_v16 = vmul.f32 %v477_v2, %v4926_v29  ;;  %v541_v17 = vadd.f32 2.0, %v477_v2  ;;  %v479_v20 = vmul.f32 %v4636_v56, %v447_v6  ;;  %4657 = vrcp.f32 %v540_v11 }
  0x2e   : > { %v4644_v21 = vpop.eup %4643  ;;  %v5026_v27 = vmul.f32 %v478_v12, %v4930_v31  ;;  %v542_v23 = vadd.f32 2.0, %v478_v12  ;;  %v480_v24 = vmul.f32 %v4638_v62, %v448_v13  ;;  %v449_v30 = vadd.f32 2.0, %v4640_v9 }
  0x2f   : > { %v4646_v25 = vpop.eup %4645  ;;  %4659 = vrcp.f32 %v541_v17  ;;  %v5029_v28 = vmul.f32 %v479_v20, %v4933_v32  ;;  %v543_v26 = vadd.f32 2.0, %v479_v20  ;;  %v450_v37 = vadd.f32 2.0, %v4642_v15 }
  0x30   : > { %v4648_v34 = vpop.eup %4647  ;;  %4661 = vrcp.f32 %v542_v23  ;;  %v5032_v29 = vmul.f32 %v480_v24, %v4936_v33  ;;  %v544_v36 = vadd.f32 2.0, %v480_v24  ;;  %v481_v31 = vmul.f32 %v4640_v9, %v449_v30 }
  0x31   : > { %v4650_v38 = vpop.eup %4649  ;;  %4663 = vrcp.f32 %v543_v26  ;;  %v451_v39 = vadd.f32 2.0, %v4644_v21  ;;  %v452_v40 = vadd.f32 2.0, %v4646_v25  ;;  %v482_v44 = vmul.f32 %v4642_v15, %v450_v37  ;;  %v256_v26 = vld [vmem:[%s4893_s9 + $0x98] sm:$0xff]  ;;  %v258_v37 = vld [vmem:[%s4893_s9 + $0xa8] sm:$0xff] }
  0x32   : > { %v4652_v42 = vpop.eup %4651  ;;  %4665 = vrcp.f32 %v544_v36  ;;  %v453_v45 = vadd.f32 2.0, %v4648_v34  ;;  %v454_v32 = vadd.f32 2.0, %v4650_v38  ;;  %v5035_v48 = vmul.f32 %v481_v31, %v4949_v43  ;;  %v257_v36 = vld [vmem:[%s4893_s9 + $0xa0] sm:$0xff] }
  0x33   : > { %v4654_v47 = vpop.eup %4653  ;;  %v545_v49 = vadd.f32 2.0, %v481_v31  ;;  %v483_v52 = vmul.f32 %v4644_v21, %v451_v39  ;;  %v484_v33 = vmul.f32 %v4646_v25, %v452_v40  ;;  %v5038_v53 = vmul.f32 %v482_v44, %v4955_v50  ;;  %v255_v25 = vld [vmem:[%s4893_s9 + $0x90] sm:$0xff] }
  0x34   : > { %v546_v54 = vadd.f32 2.0, %v482_v44  ;;  %v485_v56 = vmul.f32 %v4648_v34, %v453_v45  ;;  %v486_v57 = vmul.f32 %v4650_v38, %v454_v32  ;;  %v455_v12 = vadd.f32 2.0, %v4652_v42 }
  0x35   : > { %4667 = vrcp.f32 %v545_v49  ;;  %v5041_v59 = vmul.f32 %v483_v52, %v4962_v58  ;;  %v5044_v62 = vmul.f32 %v484_v33, %v4969_v1  ;;  %v547_v0 = vadd.f32 2.0, %v483_v52 }
  0x36   : > { %4669 = vrcp.f32 %v546_v54  ;;  %v548_v43 = vadd.f32 2.0, %v484_v33  ;;  %v5047_v2 = vmul.f32 %v485_v56, %v4973_v4  ;;  %v5050_v6 = vmul.f32 %v486_v57, %v4976_v5  ;;  %v4656_v50 = vpop.eup %4655  ;;  %v261_v54 = vld [vmem:[%s4893_s9 + $0xc0] sm:$0xff] }
  0x37   : > { %4671 = vrcp.f32 %v547_v0  ;;  %v549_v9 = vadd.f32 2.0, %v485_v56  ;;  %v550_v11 = vadd.f32 2.0, %v486_v57  ;;  %v4658_v13 = vpop.eup %4657  ;;  %v603_v58 = vmul.f32 %v4656_v50, %v507_v63 }
  0x38   : > { %4673 = vrcp.f32 %v548_v43  ;;  %v456_v1 = vadd.f32 2.0, %v4654_v47  ;;  %v364_v15 = vmin.f32 %v5011_v51, 20.0  ;;  %v604_v4 = vmul.f32 %v4658_v13, %v5020_v10 }
  0x39   : > { %v4660_v17 = vpop.eup %4659  ;;  %4675 = vrcp.f32 %v549_v9  ;;  %v487_v5 = vmul.f32 %v4652_v42, %v455_v12  ;;  %v411_v20 = vmul.f32 1.442695, %v363_v61  ;;  %685 = vst.msk [vmem:[#allocation2 + $0x130] sm:$0xff] %vm635_vm1, %v603_v58  ;;  %v295_v42 = vmul.f32 %v4886_v7, %v256_v26 }
  0x3a   : > { %v4662_v21 = vpop.eup %4661  ;;  %v605_v63 = vmul.f32 %v4660_v17, %v5023_v16  ;;  %4677 = vrcp.f32 %v550_v11  ;;  %v488_v23 = vmul.f32 %v4654_v47, %v456_v1  ;;  %v413_v24 = vmul.f32 1.442695, %v364_v15  ;;  %686 = vst.msk [vmem:[#allocation2 + $0x138] sm:$0xff] %vm635_vm1, %v604_v4  ;;  %v259_v16 = vld [vmem:[%s4893_s9 + $0xb0] sm:$0xff] }
  0x3b   : > { %v4664_v10 = vpop.eup %4663  ;;  %v606_v30 = vmul.f32 %v4662_v21, %v5026_v27  ;;  %v5063_v61 = vmul.f32 %v487_v5, %v4986_v18  ;;  %v551_v34 = vadd.f32 2.0, %v487_v5  ;;  %4679 = vpow2.f32 %v5013_v55  ;;  %v260_v27 = vld [vmem:[%s4893_s9 + $0xb8] sm:$0xff] }
  0x3c   : > { %v4666_v38 = vpop.eup %4665  ;;  %687 = vst.msk [vmem:[#allocation2 + $0x140] sm:$0xff] %vm635_vm1, %v605_v63  ;;  %v607_v31 = vmul.f32 %v4664_v10, %v5029_v28  ;;  %v5072_v39 = vmul.f32 %v488_v23, %v4989_v19  ;;  %v552_v40 = vadd.f32 2.0, %v488_v23  ;;  %4681 = vpow2.f32 %v5015_v60 }
  0x3d   : > { %688 = vst.msk [vmem:[#allocation2 + $0x148] sm:$0xff] %vm635_vm1, %v606_v30  ;;  %v608_v18 = vmul.f32 %v4666_v38, %v5032_v29  ;;  %4683 = vrcp.f32 %v551_v34  ;;  %v294_v55 = vmul.f32 %v4886_v7, %v255_v25  ;;  %v296_v19 = vmul.f32 %v4886_v7, %v257_v36 }
  0x3e   : > { %689 = vst.msk [vmem:[#allocation2 + $0x150] sm:$0xff] %vm635_vm1, %v607_v31  ;;  %4685 = vrcp.f32 %v552_v40  ;;  %v297_v28 = vmul.f32 %v4886_v7, %v258_v37  ;;  %v298_v60 = vmul.f32 %v4886_v7, %v259_v16  ;;  %v5089_v45 = vadd.f32 %v4898_v8, %v295_v42 }
  0x3f   : > { %v4668_v44 = vpop.eup %4667  ;;  %690 = vst.msk [vmem:[#allocation2 + $0x158] sm:$0xff] %vm635_vm1, %v608_v18  ;;  %4687 = vpow2.f32 %v411_v20  ;;  %v5086_v29 = vadd.f32 %v4898_v8, %v294_v55  ;;  %v299_v32 = vmul.f32 %v4886_v7, %v260_v27  ;;  %v5094_v52 = vadd.f32 %v4898_v8, %v296_v19 }
  0x40   : > { %v4670_v47 = vpop.eup %4669  ;;  %v609_v49 = vmul.f32 %v4668_v44, %v5035_v48  ;;  %4689 = vpow2.f32 %v413_v24  ;;  %v5097_v33 = vadd.f32 %v4898_v8, %v297_v28  ;;  %v898_v57 = vld [vmem:[#allocation2 + $0x130] sm:$0xff]  ;;  %v366_v50 = vmin.f32 %v5089_v45, 20.0  ;;  %v262_v48 = vld [vmem:[%s4893_s9 + $0xc8] sm:$0xff]  ;;  %v5122_v24 = vld [vmem:[%s5881_s1 + $0x4] sm:$0x3] }
  0x41   : > { %v4672_v56 = vpop.eup %4671  ;;  %v610_v0 = vmul.f32 %v4670_v47, %v5038_v53  ;;  %v365_v43 = vmin.f32 %v5086_v29, 20.0  ;;  %v5104_v9 = vadd.f32 %v4898_v8, %v298_v60  ;;  %v717_v11 = vld [vmem:[#allocation2 + $0x130] sm:$0xff]  ;;  %v899_v13 = vld [vmem:[#allocation2 + $0x138] sm:$0xff]  ;;  %v367_v17 = vmin.f32 %v5094_v52, 20.0 }
  0x42   : > { %v4674_v12 = vpop.eup %4673  ;;  %691 = vst.msk [vmem:[#allocation2 + $0x160] sm:$0xff] %vm635_vm1, %v609_v49  ;;  %v611_v58 = vmul.f32 %v4672_v56, %v5041_v59  ;;  %v782_v1 = vld [vmem:[#allocation2 + $0x131] sm:$0xff]  ;;  %v783_v15 = vld [vmem:[#allocation2 + $0x139] sm:$0x7f]  ;;  %v368_v53 = vmin.f32 %v5097_v33, 20.0  ;;  %v5112_v4 = vadd.f32 %v4898_v8, %v299_v32  ;;  %749 = vst.msk [vmem:[#allocation2 + $0x11] sm:$0xff] %vm635_vm1, %v717_v11  ;;  %v929_v20 = vpack.c.bf16 %v899_v13, %v898_v57 }
  0x43   : > { %v4676_v5 = vpop.eup %4675  ;;  %v1962_v21 = vld [vmem:[#allocation2 + $0x140] sm:$0xff]  ;;  %692 = vst.msk [vmem:[#allocation2 + $0x168] sm:$0xff] %vm635_vm1, %v610_v0  ;;  %v612_v63 = vmul.f32 %v4674_v12, %v5044_v62  ;;  %814 = vst.msk [vmem:[#allocation2 + $0x250] sm:$0xff] %vm635_vm1, %v782_v1  ;;  %v415_v59 = vmul.f32 1.442695, %v365_v43  ;;  %v300_v16 = vmul.f32 %v4886_v7, %v261_v54  ;;  %v301_v38 = vmul.f32 %v4886_v7, %v262_v48 }
  0x44   : > { %815 = vst.msk [vmem:[#allocation2 + $0x258] sm:$0x7f] %vm750_vm3, %v783_v15  ;;  %v417_v23 = vmul.f32 1.442695, %v366_v50  ;;  %v5124_v25 = vld [vmem:[#allocation2 + $0x140] sm:$0xff]  ;;  %v4678_v26 = vpop.eup %4677  ;;  %v1963_v10 = vld [vmem:[#allocation2 + $0x148] sm:$0xff]  ;;  %v613_v30 = vmul.f32 %v4676_v5, %v5047_v2  ;;  %4047 = vmatmul.mubr.msk.bf16.vlgmr.msra.gmra.mrb[0].mxu1 %vm635_vm1, %v929_v20  ;;  %4182 = vmatprep.mubr.msk.bf16.mxu0 %vm635_vm1, %v929_v20 }
  0x45   : > { %693 = vst.msk [vmem:[#allocation2 + $0x170] sm:$0xff] %vm635_vm1, %v611_v58  ;;  %v5131_v62 = vld [vmem:[%s5881_s1 + $0xc] sm:$0x3]  ;;  %v784_v34 = vld [vmem:[#allocation2 + $0x141] sm:$0xff]  ;;  %v419_v37 = vmul.f32 1.442695, %v367_v17  ;;  %v4680_v31 = vpop.eup %4679  ;;  %v1993_v2 = vpack.c.bf16 %v1963_v10, %v1962_v21  ;;  %v614_v27 = vmul.f32 %v4678_v26, %v5050_v6  ;;  %4691 = vpow2.f32 %v415_v59  ;;  %4079 = vmatpush3.bf16.msra.mxu1 %v4906_v14 }
  0x46   : > { %v785_v36 = vld [vmem:[#allocation2 + $0x149] sm:$0x7f]  ;;  %752 = vst.msk [vmem:[#allocation2 + $0x21] sm:$0xff] %vm635_vm1, %v5124_v25  ;;  %v902_v40 = vld [vmem:[#allocation2 + $0x150] sm:$0xff]  ;;  %694 = vst.msk [vmem:[#allocation2 + $0x178] sm:$0xff] %vm635_vm1, %v612_v63  ;;  %v4682_v19 = vpop.eup %4681  ;;  %v457_v60 = vadd.f32 2.0, %v4680_v31  ;;  %4693 = vpow2.f32 %v417_v23  ;;  %v5149_v47 = vadd.f32 %v4898_v8, %v300_v16  ;;  %4610 = vmatprep.subr.msk.bf16.mxu1 %vm994_vm0, %v5122_v24  ;;  %v5179_v20 = vadd.f32 %v4898_v8, %v301_v38 }
  0x47   : > { %816 = vst.msk [vmem:[#allocation2 + $0x260] sm:$0xff] %vm635_vm1, %v784_v34  ;;  %v421_v18 = vmul.f32 1.442695, %v368_v53  ;;  %v718_v55 = vld [vmem:[#allocation2 + $0x138] sm:$0x7f]  ;;  %v5143_v42 = vld [vmem:[#allocation2 + $0x150] sm:$0xff]  ;;  %v4684_v49 = vpop.eup %4683  ;;  %4183 = vmatmul.mubr.msk.bf16.vlgmr.msra.gmra.mrb[0].mxu0 %vm635_vm1, %v1993_v2  ;;  %4050 = vmatprep.mubr.msk.bf16.mxu1 %vm635_vm1, %v1993_v2  ;;  %4695 = vpow2.f32 %v419_v37 }
  0x48   : > { %817 = vst.msk [vmem:[#allocation2 + $0x268] sm:$0x7f] %vm750_vm3, %v785_v36  ;;  %v903_v28 = vld [vmem:[#allocation2 + $0x158] sm:$0xff]  ;;  %v369_v6 = vmin.f32 %v5104_v9, 20.0  ;;  %751 = vst.msk [vmem:[#allocation2 + $0x19] sm:$0x7f] %vm750_vm3, %v718_v55  ;;  %v4686_v43 = vpop.eup %4685  ;;  %4215 = vmatpush3.bf16.msra.mxu0 %v4914_v22  ;;  %v615_v50 = vmul.f32 %v4684_v49, %v5063_v61  ;;  %v5162_v48 = vmul.f32 %v4680_v31, %v457_v60 }
  0x49   : > { %695 = vst.msk [vmem:[#allocation2 + $0x180] sm:$0xff] %vm635_vm1, %v613_v30  ;;  %v786_v44 = vld [vmem:[#allocation2 + $0x151] sm:$0xff]  ;;  %v787_v32 = vld [vmem:[#allocation2 + $0x159] sm:$0x7f]  ;;  %754 = vst.msk [vmem:[#allocation2 + $0x31] sm:$0xff] %vm635_vm1, %v5143_v42  ;;  %v931_v14 = vpack.c.bf16 %v903_v28, %v902_v40  ;;  %v458_v54 = vadd.f32 2.0, %v4682_v19  ;;  %4697 = vpow2.f32 %v421_v18  ;;  %v4688_v12 = vpop.eup %4687  ;;  %v616_v58 = vmul.f32 %v4686_v43, %v5072_v39  ;;  %4615 = vmatprep.subr.msk.bf16.mxu0 %vm994_vm0, %v5131_v62 }
  0x4a   : > { %696 = vst.msk [vmem:[#allocation2 + $0x188] sm:$0xff] %vm635_vm1, %v614_v27  ;;  %818 = vst.msk [vmem:[#allocation2 + $0x270] sm:$0xff] %vm635_vm1, %v786_v44  ;;  %v370_v56 = vmin.f32 %v5112_v4, 20.0  ;;  %v720_v57 = vld [vmem:[#allocation2 + $0x148] sm:$0x7f]  ;;  %v1966_v13 = vld [vmem:[#allocation2 + $0x160] sm:$0xff]  ;;  %v4690_v15 = vpop.eup %4689 }
  0x4b   : > { %819 = vst.msk [vmem:[#allocation2 + $0x278] sm:$0x7f] %vm750_vm3, %v787_v32  ;;  %v722_v0 = vld [vmem:[#allocation2 + $0x158] sm:$0x7f]  ;;  %v423_v11 = vmul.f32 1.442695, %v369_v6  ;;  %4186 = vmatprep.mubr.msk.bf16.mxu0 %vm635_vm1, %v931_v14  ;;  %v5170_v22 = vmul.f32 %v4682_v19, %v458_v54  ;;  %v521_v54 = vmul.f32 %v5162_v48, %v4998_v35 }
  0x4c   : > { %753 = vst.msk [vmem:[#allocation2 + $0x29] sm:$0x7f] %vm750_vm3, %v720_v57  ;;  %755 = vst.msk [vmem:[#allocation2 + $0x39] sm:$0x7f] %vm750_vm3, %v722_v0  ;;  %v425_v61 = vmul.f32 1.442695, %v370_v56  ;;  %4051 = vmatmul.mubr.msk.bf16.gmra.mrb[4].mxu1 %vm635_vm1, %v931_v14 }
  0x4d   : > { %v5174_v1 = vld [vmem:[#allocation2 + $0x160] sm:$0xff]  ;;  %v1967_v17 = vld [vmem:[#allocation2 + $0x168] sm:$0xff]  ;;  %697 = vst.msk [vmem:[#allocation2 + $0x190] sm:$0xff] %vm635_vm1, %v615_v50  ;;  %v553_v53 = vadd.f32 2.0, %v5162_v48  ;;  %v459_v5 = vadd.f32 2.0, %v4688_v12  ;;  %4699 = vpow2.f32 %v423_v11  ;;  %v906_v21 = vld [vmem:[#allocation2 + $0x170] sm:$0xff]  ;;  %v522_v11 = vmul.f32 %v5170_v22, %v5003_v41 }
  0x4e   : > { %756 = vst.msk [vmem:[#allocation2 + $0x41] sm:$0xff] %vm635_vm1, %v5174_v1  ;;  %v1995_v39 = vpack.c.bf16 %v1967_v17, %v1966_v13  ;;  %698 = vst.msk [vmem:[#allocation2 + $0x198] sm:$0xff] %vm635_vm1, %v616_v58  ;;  %v554_v63 = vadd.f32 2.0, %v5170_v22  ;;  %v460_v59 = vadd.f32 2.0, %v4690_v15  ;;  %v788_v23 = vld [vmem:[#allocation2 + $0x161] sm:$0xff]  ;;  %v907_v10 = vld [vmem:[#allocation2 + $0x178] sm:$0xff] }
  0x4f   : > { %v789_v26 = vld [vmem:[#allocation2 + $0x169] sm:$0x7f]  ;;  %4701 = vrcp.f32 %v553_v53  ;;  %v5185_v30 = vmul.f32 %v4688_v12, %v459_v5  ;;  %820 = vst.msk [vmem:[#allocation2 + $0x280] sm:$0xff] %vm635_vm1, %v788_v23  ;;  %v371_v34 = vmin.f32 %v5149_v47, 20.0  ;;  %758 = vst.msk [vmem:[#allocation2 + $0x51] sm:$0xff] %vm635_vm1, %v906_v21  ;;  %v933_v36 = vpack.c.bf16 %v907_v10, %v906_v21  ;;  %v790_v38 = vld [vmem:[#allocation2 + $0x171] sm:$0xff]  ;;  %v4692_v27 = vpop.eup %4691 }
  0x50   : > { %821 = vst.msk [vmem:[#allocation2 + $0x288] sm:$0x7f] %vm750_vm3, %v789_v26  ;;  %v1970_v37 = vld [vmem:[#allocation2 + $0x180] sm:$0xff]  ;;  %4703 = vrcp.f32 %v554_v63  ;;  %v5192_v16 = vmul.f32 %v4690_v15, %v460_v59  ;;  %v791_v31 = vld [vmem:[#allocation2 + $0x179] sm:$0x7f]  ;;  %4054 = vmatprep.mubr.msk.bf16.mxu1 %vm635_vm1, %v1995_v39  ;;  %v372_v40 = vmin.f32 %v5179_v20, 20.0  ;;  %4187 = vmatmul.mubr.msk.bf16.gmra.mrb[4].mxu0 %vm635_vm1, %v1995_v39  ;;  %v4694_v28 = vpop.eup %4693 }
  0x51   : > { %v555_v2 = vadd.f32 2.0, %v5185_v30  ;;  %4705 = vpow2.f32 %v425_v61  ;;  %822 = vst.msk [vmem:[#allocation2 + $0x290] sm:$0xff] %vm635_vm1, %v790_v38  ;;  %760 = vst.msk [vmem:[#allocation2 + $0x61] sm:$0xff] %vm635_vm1, %v1970_v37  ;;  %v792_v55 = vld [vmem:[#allocation2 + $0x181] sm:$0xff]  ;;  %v793_v19 = vld [vmem:[#allocation2 + $0x189] sm:$0x7f]  ;;  %4190 = vmatprep.mubr.msk.bf16.mxu0 %vm635_vm1, %v933_v36  ;;  %v4696_v49 = vpop.eup %4695 }
  0x52   : > { %823 = vst.msk [vmem:[#allocation2 + $0x298] sm:$0x7f] %vm750_vm3, %v791_v31  ;;  %v556_v18 = vadd.f32 2.0, %v5192_v16  ;;  %v1971_v60 = vld [vmem:[#allocation2 + $0x188] sm:$0xff]  ;;  %v461_v44 = vadd.f32 2.0, %v4692_v27  ;;  %v462_v56 = vadd.f32 2.0, %v4694_v28 }
  0x53   : > { %4707 = vrcp.f32 %v555_v2  ;;  %v427_v32 = vmul.f32 1.442695, %v371_v34  ;;  %v429_v6 = vmul.f32 1.442695, %v372_v40  ;;  %824 = vst.msk [vmem:[#allocation2 + $0x2a0] sm:$0xff] %vm635_vm1, %v792_v55  ;;  %v263_v57 = vld [vmem:[%s4893_s9 + $0xd0] sm:$0xff]  ;;  %v4698_v43 = vpop.eup %4697  ;;  %v1997_v15 = vpack.c.bf16 %v1971_v60, %v1970_v37 }
  0x54   : > { %825 = vst.msk [vmem:[#allocation2 + $0x2a8] sm:$0x7f] %vm750_vm3, %v793_v19  ;;  %v910_v14 = vld [vmem:[#allocation2 + $0x190] sm:$0xff]  ;;  %4709 = vrcp.f32 %v556_v18  ;;  %v264_v0 = vld [vmem:[%s4893_s9 + $0xd8] sm:$0xff]  ;;  %v5211_v12 = vmul.f32 %v4692_v27, %v461_v44  ;;  %v463_v13 = vadd.f32 2.0, %v4696_v49  ;;  %v5214_v35 = vmul.f32 %v4694_v28, %v462_v56  ;;  %v265_v17 = vld [vmem:[%s4893_s9 + $0xe0] sm:$0xff]  ;;  %4055 = vmatmul.mubr.msk.bf16.gmra.mrb[8].mxu1 %vm635_vm1, %v933_v36 }
  0x55   : > { %v911_v50 = vld [vmem:[#allocation2 + $0x198] sm:$0xff]  ;;  %4711 = vpow2.f32 %v427_v32  ;;  %762 = vst.msk [vmem:[#allocation2 + $0x71] sm:$0xff] %vm635_vm1, %v910_v14  ;;  %v464_v48 = vadd.f32 2.0, %v4698_v43  ;;  %v302_v39 = vmul.f32 %v4886_v7, %v263_v57  ;;  %v724_v21 = vld [vmem:[#allocation2 + $0x168] sm:$0x7f]  ;;  %v303_v10 = vmul.f32 %v4886_v7, %v264_v0  ;;  %4058 = vmatprep.mubr.msk.bf16.mxu1 %vm635_vm1, %v1997_v15 }
  0x56   : > { %v794_v58 = vld [vmem:[#allocation2 + $0x191] sm:$0xff]  ;;  %v795_v61 = vld [vmem:[#allocation2 + $0x199] sm:$0x7f]  ;;  %4713 = vpow2.f32 %v429_v6  ;;  %v935_v41 = vpack.c.bf16 %v911_v50, %v910_v14  ;;  %v557_v22 = vadd.f32 2.0, %v5211_v12  ;;  %v5220_v5 = vmul.f32 %v4696_v49, %v463_v13  ;;  %757 = vst.msk [vmem:[#allocation2 + $0x49] sm:$0x7f] %vm750_vm3, %v724_v21 }
  0x57   : > { %826 = vst.msk [vmem:[#allocation2 + $0x2b0] sm:$0xff] %vm635_vm1, %v794_v58  ;;  %v4700_v53 = vpop.eup %4699  ;;  %v726_v63 = vld [vmem:[#allocation2 + $0x178] sm:$0x7f]  ;;  %v558_v59 = vadd.f32 2.0, %v5214_v35  ;;  %v5225_v23 = vmul.f32 %v4698_v43, %v464_v48  ;;  %v304_v36 = vmul.f32 %v4886_v7, %v265_v17  ;;  %v728_v38 = vld [vmem:[#allocation2 + $0x188] sm:$0x7f]  ;;  %v523_v27 = vmul.f32 %v5185_v30, %v5007_v46 }
  0x58   : > { %827 = vst.msk [vmem:[#allocation2 + $0x2b8] sm:$0x7f] %vm750_vm3, %v795_v61  ;;  %v465_v26 = vadd.f32 2.0, %v4700_v53  ;;  %759 = vst.msk [vmem:[#allocation2 + $0x59] sm:$0x7f] %vm750_vm3, %v726_v63  ;;  %4715 = vrcp.f32 %v557_v22  ;;  %v559_v37 = vadd.f32 2.0, %v5220_v5  ;;  %4191 = vmatmul.mubr.msk.bf16.gmra.mrb[8].mxu0 %vm635_vm1, %v1997_v15  ;;  %v524_v60 = vmul.f32 %v5192_v16, %v5011_v51 }
  0x59   : > { %v4702_v34 = vpop.eup %4701  ;;  %v730_v31 = vld [vmem:[#allocation2 + $0x198] sm:$0x7f]  ;;  %4717 = vrcp.f32 %v558_v59  ;;  %v560_v18 = vadd.f32 2.0, %v5225_v23  ;;  %v266_v55 = vld [vmem:[%s4893_s9 + $0xe8] sm:$0xff]  ;;  %761 = vst.msk [vmem:[#allocation2 + $0x69] sm:$0x7f] %vm750_vm3, %v728_v38  ;;  %4194 = vmatprep.mubr.msk.bf16.mxu0 %vm635_vm1, %v935_v41  ;;  %v5247_v30 = vadd.f32 %v4898_v8, %v302_v39  ;;  %v5250_v32 = vadd.f32 %v4898_v8, %v303_v10 }
  0x5a   : > { %v4704_v2 = vpop.eup %4703  ;;  %v617_v40 = vmul.f32 %v4702_v34, %v521_v54  ;;  %763 = vst.msk [vmem:[#allocation2 + $0x79] sm:$0x7f] %vm750_vm3, %v730_v31  ;;  %4719 = vrcp.f32 %v559_v37  ;;  %v5243_v44 = vmul.f32 %v4700_v53, %v465_v26  ;;  %v305_v51 = vmul.f32 %v4886_v7, %v266_v55  ;;  %v2254_v17 = vld [vmem:[#allocation2 + $0x250] sm:$0xff]  ;;  %v2255_v53 = vld [vmem:[#allocation2 + $0x258] sm:$0xff] }
  0x5b   : > { %v4706_v19 = vpop.eup %4705  ;;  %v618_v28 = vmul.f32 %v4704_v2, %v522_v11  ;;  %4721 = vrcp.f32 %v560_v18  ;;  %v5256_v16 = vadd.f32 %v4898_v8, %v304_v36  ;;  %v373_v57 = vmin.f32 %v5247_v30, 20.0 }
  0x5c   : > { %699 = vst.msk [vmem:[#allocation2 + $0x1a0] sm:$0xff] %vm635_vm1, %v617_v40  ;;  %v466_v46 = vadd.f32 2.0, %v4706_v19  ;;  %v561_v49 = vadd.f32 2.0, %v5243_v44  ;;  %v374_v0 = vmin.f32 %v5250_v32, 20.0  ;;  %v5263_v11 = vadd.f32 %v4898_v8, %v305_v51  ;;  %4059 = vmatmul.mubr.msk.bf16.gmra.mrb[12].mxu1 %vm635_vm1, %v935_v41 }
  0x5d   : > { %v4708_v6 = vpop.eup %4707  ;;  %700 = vst.msk [vmem:[#allocation2 + $0x1a8] sm:$0xff] %vm635_vm1, %v618_v28  ;;  %v375_v13 = vmin.f32 %v5256_v16, 20.0  ;;  %v525_v58 = vmul.f32 %v5211_v12, %v5086_v29  ;;  %v431_v48 = vmul.f32 1.442695, %v373_v57  ;;  %v526_v8 = vmul.f32 %v5214_v35, %v5089_v45  ;;  %v268_v28 = vld [vmem:[%s4893_s9 + $0xf8] sm:$0xff] }
  0x5e   : > { %v4710_v14 = vpop.eup %4709  ;;  %v619_v54 = vmul.f32 %v4708_v6, %v523_v27  ;;  %v5258_v56 = vmul.f32 %v4706_v19, %v466_v46  ;;  %4723 = vrcp.f32 %v561_v49  ;;  %v433_v39 = vmul.f32 1.442695, %v374_v0  ;;  %v267_v19 = vld [vmem:[%s4893_s9 + $0xf0] sm:$0xff]  ;;  %v2256_v46 = vld [vmem:[#allocation2 + $0x260] sm:$0xff]  ;;  %v2257_v6 = vld [vmem:[#allocation2 + $0x268] sm:$0xff] }
  0x5f   : > { %v4712_v43 = vpop.eup %4711  ;;  %v620_v50 = vmul.f32 %v4710_v14, %v524_v60  ;;  %v376_v41 = vmin.f32 %v5263_v11, 20.0  ;;  %v527_v21 = vmul.f32 %v5220_v5, %v5094_v52  ;;  %v528_v59 = vmul.f32 %v5225_v23, %v5097_v33  ;;  %v2258_v0 = vld [vmem:[#allocation2 + $0x270] sm:$0xff] }
  0x60   : > { %v4714_v7 = vpop.eup %4713  ;;  %701 = vst.msk [vmem:[#allocation2 + $0x1b0] sm:$0xff] %vm635_vm1, %v619_v54  ;;  %v562_v61 = vadd.f32 2.0, %v5258_v56  ;;  %v467_v15 = vadd.f32 2.0, %v4712_v43  ;;  %v435_v10 = vmul.f32 1.442695, %v375_v13  ;;  %v2286_v34 = vpack.c.bf16 %v2255_v53, %v2254_v17 }
  0x61   : > { %702 = vst.msk [vmem:[#allocation2 + $0x1b8] sm:$0xff] %vm635_vm1, %v620_v50  ;;  %v468_v22 = vadd.f32 2.0, %v4714_v7  ;;  %v437_v2 = vmul.f32 1.442695, %v376_v41  ;;  %v529_v55 = vmul.f32 %v5243_v44, %v5104_v9  ;;  %v530_v9 = vmul.f32 %v5258_v56, %v5112_v4  ;;  %v4755_v4 = vld [vmem:[%s5882_s2] ss:$0 sm:$0xff] }
  0x62   : > { %4725 = vrcp.f32 %v562_v61  ;;  %v5277_v29 = vmul.f32 %v4712_v43, %v467_v15  ;;  %v4716_v12 = vpop.eup %4715  ;;  %v2259_v43 = vld [vmem:[#allocation2 + $0x278] sm:$0xff]  ;;  %v306_v56 = vmul.f32 %v4755_v4, %v267_v19  ;;  %v307_v50 = vmul.f32 %v4755_v4, %v268_v28  ;;  %v4756_v61 = vld [vmem:[%s5883_s3] ss:$0 sm:$0xff] }
  0x63   : > { %v1974_v63 = vld [vmem:[#allocation2 + $0x1a0] sm:$0xff]  ;;  %v5281_v26 = vmul.f32 %v4714_v7, %v468_v22  ;;  %4727 = vpow2.f32 %v431_v48  ;;  %v4718_v45 = vpop.eup %4717  ;;  %v621_v37 = vmul.f32 %v4716_v12, %v525_v58  ;;  %v5310_v58 = vpack.c.bf16 %v2257_v6, %v2256_v46 }
  0x64   : > { %v1975_v35 = vld [vmem:[#allocation2 + $0x1a8] sm:$0xff]  ;;  %v563_v36 = vadd.f32 2.0, %v5277_v29  ;;  %4729 = vpow2.f32 %v433_v39  ;;  %764 = vst.msk [vmem:[#allocation2 + $0x81] sm:$0xff] %vm635_vm1, %v1974_v63  ;;  %v4720_v38 = vpop.eup %4719  ;;  %v622_v33 = vmul.f32 %v4718_v45, %v526_v8  ;;  %v5315_v15 = vadd.f32 %v4756_v61, %v306_v56  ;;  %v2260_v45 = vld [vmem:[#allocation2 + $0x280] sm:$0xff] }
  0x65   : > { %v796_v52 = vld [vmem:[#allocation2 + $0x1a1] sm:$0xff]  ;;  %v797_v5 = vld [vmem:[#allocation2 + $0x1a9] sm:$0x7f]  ;;  %v1999_v31 = vpack.c.bf16 %v1975_v35, %v1974_v63  ;;  %v564_v23 = vadd.f32 2.0, %v5281_v26  ;;  %v4722_v27 = vpop.eup %4721  ;;  %703 = vst.msk [vmem:[#allocation2 + $0x1c0] sm:$0xff] %vm635_vm1, %v621_v37  ;;  %v623_v18 = vmul.f32 %v4720_v38, %v527_v21  ;;  %v5317_v48 = vadd.f32 %v4756_v61, %v307_v50 }
  0x66   : > { %828 = vst.msk [vmem:[#allocation2 + $0x2c0] sm:$0xff] %vm635_vm1, %v796_v52  ;;  %v732_v40 = vld [vmem:[#allocation2 + $0x1a8] sm:$0x7f]  ;;  %4731 = vrcp.f32 %v563_v36  ;;  %704 = vst.msk [vmem:[#allocation2 + $0x1c8] sm:$0xff] %vm635_vm1, %v622_v33  ;;  %v624_v49 = vmul.f32 %v4722_v27, %v528_v59  ;;  %v2648_v53 = vsel %vm994_vm0, %v5131_v62, 0  ;;  %v5321_v8 = vpack.c.bf16 %v2259_v43, %v2258_v0  ;;  %v2262_v33 = vld [vmem:[#allocation2 + $0x290] sm:$0xff] }
  0x67   : > { %829 = vst.msk [vmem:[#allocation2 + $0x2c8] sm:$0x7f] %vm750_vm3, %v797_v5  ;;  %765 = vst.msk [vmem:[#allocation2 + $0x89] sm:$0x7f] %vm750_vm3, %v732_v40  ;;  %4195 = vmatmul.mubr.msk.bf16.gmra.mrb[12].mxu0 %vm635_vm1, %v1999_v31  ;;  %4062 = vmatprep.mubr.msk.bf16.mxu1 %vm635_vm1, %v1999_v31  ;;  %v914_v60 = vld [vmem:[#allocation2 + $0x1b0] sm:$0xff]  ;;  %4733 = vrcp.f32 %v564_v23  ;;  %v531_v21 = vmul.f32 %v5277_v29, %v5149_v47  ;;  %v377_v12 = vmin.f32 %v5315_v15, 20.0 }
  0x68   : > { %v915_v51 = vld [vmem:[#allocation2 + $0x1b8] sm:$0xff]  ;;  %4216 = vmatprep.mubr.msk.bf16.mxu0 %vm635_vm1, %v2286_v34  ;;  %705 = vst.msk [vmem:[#allocation2 + $0x1d0] sm:$0xff] %vm635_vm1, %v623_v18  ;;  %4735 = vpow2.f32 %v435_v10  ;;  %766 = vst.msk [vmem:[#allocation2 + $0x91] sm:$0xff] %vm635_vm1, %v914_v60  ;;  %v4724_v54 = vpop.eup %4723  ;;  %v378_v63 = vmin.f32 %v5317_v48, 20.0  ;;  %v5331_v59 = vld [vmem:[%s5881_s1 + $0xe] sm:$0x3]  ;;  %v532_v35 = vmul.f32 %v5281_v26, %v5179_v20 }
  0x69   : > { %v798_v44 = vld [vmem:[#allocation2 + $0x1b1] sm:$0xff]  ;;  %v799_v14 = vld [vmem:[#allocation2 + $0x1b9] sm:$0x7f]  ;;  %v937_v57 = vpack.c.bf16 %v915_v51, %v914_v60  ;;  %706 = vst.msk [vmem:[#allocation2 + $0x1d8] sm:$0xff] %vm635_vm1, %v624_v49  ;;  %4737 = vpow2.f32 %v437_v2  ;;  %v625_v7 = vmul.f32 %v4724_v54, %v529_v55  ;;  %v439_v5 = vmul.f32 1.442695, %v377_v12 }
  0x6a   : > { %830 = vst.msk [vmem:[#allocation2 + $0x2d0] sm:$0xff] %vm635_vm1, %v798_v44  ;;  %v734_v13 = vld [vmem:[#allocation2 + $0x1b8] sm:$0x7f]  ;;  %v441_v38 = vmul.f32 1.442695, %v378_v63  ;;  %v2261_v31 = vld [vmem:[#allocation2 + $0x288] sm:$0xff] }
  0x6b   : > { %831 = vst.msk [vmem:[#allocation2 + $0x2d8] sm:$0x7f] %vm750_vm3, %v799_v14  ;;  %767 = vst.msk [vmem:[#allocation2 + $0x99] sm:$0x7f] %vm750_vm3, %v734_v13  ;;  %4063 = vmatmul.mubr.msk.bf16.gmra.mrb[16].mxu1 %vm635_vm1, %v937_v57  ;;  %v2263_v18 = vld [vmem:[#allocation2 + $0x298] sm:$0xff]  ;;  %4739 = vpow2.f32 %v439_v5  ;;  %v5350_v44 = vpack.c.bf16 %v2261_v31, %v2260_v45 }
  0x6c   : > { %v4726_v17 = vpop.eup %4725  ;;  %707 = vst.msk [vmem:[#allocation2 + $0x1e0] sm:$0xff] %vm635_vm1, %v625_v7  ;;  %v916_v39 = vld [vmem:[#allocation2 + $0x1c0] sm:$0xff]  ;;  %4741 = vpow2.f32 %v441_v38  ;;  %v5356_v0 = vpack.c.bf16 %v2263_v18, %v2262_v33  ;;  %v2267_v12 = vld [vmem:[#allocation2 + $0x2b8] sm:$0xff] }
  0x6d   : > { %v4728_v22 = vpop.eup %4727  ;;  %v626_v41 = vmul.f32 %v4726_v17, %v530_v9  ;;  %v917_v10 = vld [vmem:[#allocation2 + $0x1c8] sm:$0xff]  ;;  %768 = vst.msk [vmem:[#allocation2 + $0xa1] sm:$0xff] %vm635_vm1, %v916_v39 }
  0x6e   : > { %v4730_v62 = vpop.eup %4729  ;;  %v469_v34 = vadd.f32 2.0, %v4728_v22  ;;  %v800_v37 = vld [vmem:[#allocation2 + $0x1c1] sm:$0xff]  ;;  %v801_v36 = vld [vmem:[#allocation2 + $0x1c9] sm:$0x7f]  ;;  %v938_v47 = vpack.c.bf16 %v917_v10, %v916_v39 }
  0x6f   : > { %4217 = vmatmul.mubr.msk.bf16.vlgmr.msra.gmra.mrb[0].mxu0 %vm635_vm1, %v5310_v58  ;;  %v918_v29 = vld [vmem:[#allocation2 + $0x1d0] sm:$0xff]  ;;  %708 = vst.msk [vmem:[#allocation2 + $0x1e8] sm:$0xff] %vm635_vm1, %v626_v41  ;;  %v470_v52 = vadd.f32 2.0, %v4730_v62  ;;  %832 = vst.msk [vmem:[#allocation2 + $0x2e0] sm:$0xff] %vm635_vm1, %v800_v37  ;;  %v736_v49 = vld [vmem:[#allocation2 + $0x1c8] sm:$0x7f] }
  0x70   : > { %833 = vst.msk [vmem:[#allocation2 + $0x2e8] sm:$0x7f] %vm750_vm3, %v801_v36  ;;  %v4732_v20 = vpop.eup %4731  ;;  %4249 = vmatpush3.bf16.msra.mxu0 %v2648_v53  ;;  %v919_v26 = vld [vmem:[#allocation2 + $0x1d8] sm:$0xff]  ;;  %4220 = vmatprep.mubr.msk.bf16.mxu0 %vm635_vm1, %v5321_v8  ;;  %v501_v23 = vmul.f32 %v4728_v22, %v469_v34  ;;  %769 = vst.msk [vmem:[#allocation2 + $0xa9] sm:$0x7f] %vm750_vm3, %v736_v49  ;;  %v2264_v53 = vld [vmem:[#allocation2 + $0x2a0] sm:$0xff] }
  0x71   : > { %770 = vst.msk [vmem:[#allocation2 + $0xb1] sm:$0xff] %vm635_vm1, %v918_v29  ;;  %v4734_v2 = vpop.eup %4733  ;;  %4066 = vmatprep.mubr.msk.bf16.mxu1 %vm635_vm1, %v938_v47  ;;  %v939_v40 = vpack.c.bf16 %v919_v26, %v918_v29  ;;  %v627_v27 = vmul.f32 %v4732_v20, %v531_v21  ;;  %v502_v55 = vmul.f32 %v4730_v62, %v470_v52  ;;  %v802_v19 = vld [vmem:[#allocation2 + $0x1d1] sm:$0xff]  ;;  %v803_v28 = vld [vmem:[#allocation2 + $0x1d9] sm:$0x7f]  ;;  %v2265_v22 = vld [vmem:[#allocation2 + $0x2a8] sm:$0xff] }
  0x72   : > { %v4736_v60 = vpop.eup %4735  ;;  %v628_v46 = vmul.f32 %v4734_v2, %v532_v35  ;;  %v565_v6 = vadd.f32 2.0, %v501_v23  ;;  %834 = vst.msk [vmem:[#allocation2 + $0x2f0] sm:$0xff] %vm635_vm1, %v802_v19  ;;  %4616 = vmatprep.subr.msk.bf16.mxu0 %vm994_vm0, %v5331_v59  ;;  %v738_v51 = vld [vmem:[#allocation2 + $0x1d8] sm:$0x7f]  ;;  %v2266_v21 = vld [vmem:[#allocation2 + $0x2b0] sm:$0xff]  ;;  %v5367_v10 = vpack.c.bf16 %v2265_v22, %v2264_v53  ;;  %v533_v45 = vmul.f32 %v501_v23, %v5247_v30  ;;  %v2268_v2 = vld [vmem:[#allocation2 + $0x2c0] sm:$0xff] }
  0x73   : > { %835 = vst.msk [vmem:[#allocation2 + $0x2f8] sm:$0x7f] %vm750_vm3, %v803_v28  ;;  %v4738_v9 = vpop.eup %4737  ;;  %4067 = vmatmul.mubr.msk.bf16.gmra.mrb[20].mxu1 %vm635_vm1, %v939_v40  ;;  %v920_v14 = vld [vmem:[#allocation2 + $0x1e0] sm:$0xff]  ;;  %v566_v54 = vadd.f32 2.0, %v502_v55  ;;  %v471_v57 = vadd.f32 2.0, %v4736_v60  ;;  %v534_v47 = vmul.f32 %v502_v55, %v5250_v32  ;;  %v5372_v29 = vpack.c.bf16 %v2267_v12, %v2266_v21  ;;  %v2269_v40 = vld [vmem:[#allocation2 + $0x2c8] sm:$0xff] }
  0x74   : > { %709 = vst.msk [vmem:[#allocation2 + $0x1f0] sm:$0xff] %vm635_vm1, %v627_v27  ;;  %710 = vst.msk [vmem:[#allocation2 + $0x1f8] sm:$0xff] %vm635_vm1, %v628_v46  ;;  %4743 = vrcp.f32 %v565_v6  ;;  %v472_v43 = vadd.f32 2.0, %v4738_v9  ;;  %v2270_v55 = vld [vmem:[#allocation2 + $0x2d0] sm:$0xff]  ;;  %v2271_v19 = vld [vmem:[#allocation2 + $0x2d8] sm:$0xff]  ;;  %v5386_v6 = vpack.c.bf16 %v2269_v40, %v2268_v2 }
  0x75   : > { %771 = vst.msk [vmem:[#allocation2 + $0xb9] sm:$0x7f] %vm750_vm3, %v738_v51  ;;  %4745 = vrcp.f32 %v566_v54  ;;  %v503_v4 = vmul.f32 %v4736_v60, %v471_v57  ;;  %v4740_v37 = vpop.eup %4739  ;;  %v5388_v51 = vpack.c.bf16 %v2271_v19, %v2270_v55  ;;  %v847_v53 = vld [vmem:[#allocation2 + $0x8] sm:$0xff]  ;;  %v5436_v40 = vld [vmem:[%s5881_s1 + $0x6] sm:$0x3] }
  0x76   : > { %772 = vst.msk [vmem:[#allocation2 + $0xc1] sm:$0xff] %vm635_vm1, %v920_v14  ;;  %v921_v56 = vld [vmem:[#allocation2 + $0x1e8] sm:$0xff]  ;;  %v504_v50 = vmul.f32 %v4738_v9, %v472_v43  ;;  %v4742_v5 = vpop.eup %4741  ;;  %v473_v38 = vadd.f32 2.0, %v4740_v37 }
  0x77   : > { %4221 = vmatmul.mubr.msk.bf16.gmra.mrb[4].mxu0 %vm635_vm1, %v5350_v44  ;;  %v940_v13 = vpack.c.bf16 %v921_v56, %v920_v14  ;;  %v567_v7 = vadd.f32 2.0, %v503_v4  ;;  %v804_v61 = vld [vmem:[#allocation2 + $0x1e1] sm:$0xff]  ;;  %v805_v17 = vld [vmem:[#allocation2 + $0x1e9] sm:$0x7f]  ;;  %v474_v20 = vadd.f32 2.0, %v4742_v5  ;;  %v535_v23 = vmul.f32 %v503_v4, %v5256_v16 }
  0x78   : > { %4224 = vmatprep.mubr.msk.bf16.mxu0 %vm635_vm1, %v5356_v0  ;;  %v568_v39 = vadd.f32 2.0, %v504_v50  ;;  %836 = vst.msk [vmem:[#allocation2 + $0x300] sm:$0xff] %vm635_vm1, %v804_v61  ;;  %v740_v41 = vld [vmem:[#allocation2 + $0x1e8] sm:$0x7f]  ;;  %v505_v31 = vmul.f32 %v4740_v37, %v473_v38  ;;  %v536_v18 = vmul.f32 %v504_v50, %v5263_v11  ;;  %v2272_v11 = vld [vmem:[#allocation2 + $0x2e0] sm:$0xff] }
  0x79   : > { %837 = vst.msk [vmem:[#allocation2 + $0x308] sm:$0x7f] %vm750_vm3, %v805_v17  ;;  %4070 = vmatprep.mubr.msk.bf16.mxu1 %vm635_vm1, %v940_v13  ;;  %4747 = vrcp.f32 %v567_v7  ;;  %773 = vst.msk [vmem:[#allocation2 + $0xc9] sm:$0x7f] %vm750_vm3, %v740_v41  ;;  %v506_v27 = vmul.f32 %v4742_v5, %v474_v20  ;;  %v2273_v14 = vld [vmem:[#allocation2 + $0x2e8] sm:$0xff]  ;;  %v2274_v57 = vld [vmem:[#allocation2 + $0x2f0] sm:$0xff] }
  0x7a   : > { %4749 = vrcp.f32 %v568_v39  ;;  %v569_v28 = vadd.f32 2.0, %v505_v31  ;;  %v2275_v43 = vld [vmem:[#allocation2 + $0x2f8] sm:$0xff]  ;;  %v537_v7 = vmul.f32 %v505_v31, %v5315_v15  ;;  %v846_v17 = vld [vmem:[#allocation2] sm:$0xff]  ;;  %v5402_v22 = vpack.c.bf16 %v2273_v14, %v2272_v11  ;;  %v855_v14 = vld [vmem:[#allocation2 + $0x48] sm:$0xff] }
  0x7b   : > { %v922_v63 = vld [vmem:[#allocation2 + $0x1f0] sm:$0xff]  ;;  %v923_v62 = vld [vmem:[#allocation2 + $0x1f8] sm:$0xff]  ;;  %v570_v60 = vadd.f32 2.0, %v506_v27  ;;  %v538_v39 = vmul.f32 %v506_v27, %v5317_v48  ;;  %v5408_v41 = vpack.c.bf16 %v2275_v43, %v2274_v57  ;;  %v1471_v27 = vsel %vm994_vm0, %v5122_v24, 0  ;;  %v854_v11 = vld [vmem:[#allocation2 + $0x40] sm:$0xff] }
  0x7c   : > { %v806_v35 = vld [vmem:[#allocation2 + $0x1f1] sm:$0xff]  ;;  %v807_v34 = vld [vmem:[#allocation2 + $0x1f9] sm:$0x7f]  ;;  %774 = vst.msk [vmem:[#allocation2 + $0xd1] sm:$0xff] %vm635_vm1, %v922_v63  ;;  %v941_v36 = vpack.c.bf16 %v923_v62, %v922_v63  ;;  %4751 = vrcp.f32 %v569_v28 }
  0x7d   : > { %838 = vst.msk [vmem:[#allocation2 + $0x310] sm:$0xff] %vm635_vm1, %v806_v35  ;;  %v742_v52 = vld [vmem:[#allocation2 + $0x1f8] sm:$0x7f]  ;;  %4753 = vrcp.f32 %v570_v60 }
  0x7e   : > { %839 = vst.msk [vmem:[#allocation2 + $0x318] sm:$0x7f] %vm750_vm3, %v807_v34  ;;  %775 = vst.msk [vmem:[#allocation2 + $0xd9] sm:$0x7f] %vm750_vm3, %v742_v52  ;;  %v4744_v30 = vpop.eup %4743  ;;  %4071 = vmatmul.mubr.msk.bf16.gmra.mrb[24].mxu1 %vm635_vm1, %v941_v36  ;;  %v849_v20 = vld [vmem:[#allocation2 + $0x18] sm:$0xff] }
  0x7f   : > { %v4746_v26 = vpop.eup %4745  ;;  %4225 = vmatmul.mubr.msk.bf16.gmra.mrb[8].mxu0 %vm635_vm1, %v5367_v10  ;;  %v629_v32 = vmul.f32 %v4744_v30, %v533_v45  ;;  %v878_v45 = vpack.c.bf16 %v847_v53, %v846_v17  ;;  %v848_v30 = vld [vmem:[#allocation2 + $0x10] sm:$0xff]  ;;  %v858_v17 = vld [vmem:[#allocation2 + $0x60] sm:$0xff]  ;;  %v859_v53 = vld [vmem:[#allocation2 + $0x68] sm:$0xff] }
  0x80   : > { %v630_v33 = vmul.f32 %v4746_v26, %v534_v47  ;;  %4228 = vmatprep.mubr.msk.bf16.mxu0 %vm635_vm1, %v5372_v29  ;;  %v2276_v47 = vld [vmem:[#allocation2 + $0x300] sm:$0xff]  ;;  %v2277_v52 = vld [vmem:[#allocation2 + $0x308] sm:$0xff] }
  0x81   : > { %711 = vst.msk [vmem:[#allocation2 + $0x200] sm:$0xff] %vm635_vm1, %v629_v32  ;;  %v850_v26 = vld [vmem:[#allocation2 + $0x20] sm:$0xff]  ;;  %v851_v32 = vld [vmem:[#allocation2 + $0x28] sm:$0xff]  ;;  %v5425_v31 = vpack.c.bf16 %v2277_v52, %v2276_v47  ;;  %v865_v47 = vld [vmem:[#allocation2 + $0x98] sm:$0xff] }
  0x82   : > { %712 = vst.msk [vmem:[#allocation2 + $0x208] sm:$0xff] %vm635_vm1, %v630_v33  ;;  %v5431_v2 = vpack.c.bf16 %v851_v32, %v850_v26  ;;  %v866_v52 = vld [vmem:[#allocation2 + $0xa0] sm:$0xff]  ;;  %v869_v26 = vld [vmem:[#allocation2 + $0xb8] sm:$0xff] }
  0x83   : > { %v4748_v46 = vpop.eup %4747  ;;  %v870_v32 = vld [vmem:[#allocation2 + $0xc0] sm:$0xff] }
  0x84   : > { %v4750_v16 = vpop.eup %4749  ;;  %v631_v49 = vmul.f32 %v4748_v46, %v535_v23  ;;  %v2278_v5 = vld [vmem:[#allocation2 + $0x310] sm:$0xff]  ;;  %v5429_v23 = vpack.c.bf16 %v849_v20, %v848_v30 }
  0x85   : > { %v632_v9 = vmul.f32 %v4750_v16, %v536_v18  ;;  %v2279_v38 = vld [vmem:[#allocation2 + $0x318] sm:$0xff]  ;;  %v868_v20 = vld [vmem:[#allocation2 + $0xb0] sm:$0xff] }
  0x86   : > { %713 = vst.msk [vmem:[#allocation2 + $0x210] sm:$0xff] %vm635_vm1, %v631_v49  ;;  %v4752_v21 = vpop.eup %4751  ;;  %v5427_v33 = vpack.c.bf16 %v2279_v38, %v2278_v5  ;;  %v852_v49 = vld [vmem:[#allocation2 + $0x30] sm:$0xff]  ;;  %v867_v5 = vld [vmem:[#allocation2 + $0xa8] sm:$0xff] }
  0x87   : > { %714 = vst.msk [vmem:[#allocation2 + $0x218] sm:$0xff] %vm635_vm1, %v632_v9  ;;  %4229 = vmatmul.mubr.msk.bf16.gmra.mrb[12].mxu0 %vm635_vm1, %v5386_v6  ;;  %v4754_v63 = vpop.eup %4753  ;;  %v633_v34 = vmul.f32 %v4752_v21, %v537_v7  ;;  %v853_v9 = vld [vmem:[#allocation2 + $0x38] sm:$0xff]  ;;  %v856_v7 = vld [vmem:[#allocation2 + $0x50] sm:$0xff]  ;;  %v5510_v30 = vpack.c.bf16 %v867_v5, %v866_v52 }
  0x88   : > { %v924_v54 = vld [vmem:[#allocation2 + $0x200] sm:$0xff]  ;;  %4232 = vmatprep.mubr.msk.bf16.mxu0 %vm635_vm1, %v5388_v51  ;;  %v634_v48 = vmul.f32 %v4754_v63, %v538_v39  ;;  %v5461_v43 = vpack.c.bf16 %v853_v9, %v852_v49  ;;  %v860_v63 = vld [vmem:[#allocation2 + $0x70] sm:$0xff]  ;;  %v2847_v5 = vld [vmem:[#allocation2 + $0x158] sm:$0xff] }
  0x89   : > { %v925_v4 = vld [vmem:[#allocation2 + $0x208] sm:$0xff]  ;;  %776 = vst.msk [vmem:[#allocation2 + $0xe1] sm:$0xff] %vm635_vm1, %v924_v54  ;;  %715 = vst.msk [vmem:[#allocation2 + $0x220] sm:$0xff] %vm635_vm1, %v633_v34  ;;  %v2943_v34 = vsel %vm994_vm0, %v5331_v59, 0  ;;  %v864_v59 = vld [vmem:[#allocation2 + $0x90] sm:$0xff] }
  0x8a   : > { %v808_v56 = vld [vmem:[#allocation2 + $0x201] sm:$0xff]  ;;  %v809_v50 = vld [vmem:[#allocation2 + $0x209] sm:$0x7f]  ;;  %v5397_v13 = vpack.c.bf16 %v925_v4, %v924_v54  ;;  %716 = vst.msk [vmem:[#allocation2 + $0x228] sm:$0xff] %vm635_vm1, %v634_v48  ;;  %v5463_v4 = vpack.c.bf16 %v855_v14, %v854_v11  ;;  %v5508_v38 = vpack.c.bf16 %v865_v47, %v864_v59  ;;  %v2580_v59 = vld [vmem:[#allocation2 + $0x118] sm:$0xff] }
  0x8b   : > { %840 = vst.msk [vmem:[#allocation2 + $0x320] sm:$0xff] %vm635_vm1, %v808_v56  ;;  %v744_v61 = vld [vmem:[#allocation2 + $0x208] sm:$0x7f]  ;;  %v1372_v14 = vld [vmem:[#allocation2 + $0x240] sm:$0xff] }
  0x8c   : > { %841 = vst.msk [vmem:[#allocation2 + $0x328] sm:$0x7f] %vm750_vm3, %v809_v50  ;;  %777 = vst.msk [vmem:[#allocation2 + $0xe9] sm:$0x7f] %vm750_vm3, %v744_v61  ;;  %4074 = vmatprep.mubr.msk.bf16.mxu1 %vm635_vm1, %v5397_v13  ;;  %v857_v61 = vld [vmem:[#allocation2 + $0x58] sm:$0xff] }
  0x8d   : > { %v926_v12 = vld [vmem:[#allocation2 + $0x210] sm:$0xff]  ;;  %v5475_v21 = vpack.c.bf16 %v857_v61, %v856_v7 }
  0x8e   : > { %v927_v62 = vld [vmem:[#allocation2 + $0x218] sm:$0xff]  ;;  %778 = vst.msk [vmem:[#allocation2 + $0xf1] sm:$0xff] %vm635_vm1, %v926_v12  ;;  %v1374_v61 = vld [vmem:[#allocation2 + $0x250] sm:$0xff] }
  0x8f   : > { %v810_v15 = vld [vmem:[#allocation2 + $0x211] sm:$0xff]  ;;  %v811_v35 = vld [vmem:[#allocation2 + $0x219] sm:$0x7f]  ;;  %v5411_v37 = vpack.c.bf16 %v927_v62, %v926_v12  ;;  %4233 = vmatmul.mubr.msk.bf16.gmra.mrb[16].mxu0 %vm635_vm1, %v5402_v22  ;;  %v5477_v12 = vpack.c.bf16 %v859_v53, %v858_v17 }
  0x90   : > { %842 = vst.msk [vmem:[#allocation2 + $0x330] sm:$0xff] %vm635_vm1, %v810_v15  ;;  %v746_v36 = vld [vmem:[#allocation2 + $0x218] sm:$0x7f]  ;;  %4236 = vmatprep.mubr.msk.bf16.mxu0 %vm635_vm1, %v5408_v41  ;;  %v5442_v19 = vld [vmem:[#allocation2 + $0x220] sm:$0xff]  ;;  %v863_v15 = vld [vmem:[#allocation2 + $0x88] sm:$0xff] }
  0x91   : > { %843 = vst.msk [vmem:[#allocation2 + $0x338] sm:$0x7f] %vm750_vm3, %v811_v35  ;;  %779 = vst.msk [vmem:[#allocation2 + $0xf9] sm:$0x7f] %vm750_vm3, %v746_v36  ;;  %4075 = vmatmul.mubr.msk.bf16.gmra.mrb[28].mxu1 %vm635_vm1, %v5411_v37  ;;  %v812_v28 = vld [vmem:[#allocation2 + $0x221] sm:$0xff]  ;;  %v861_v62 = vld [vmem:[#allocation2 + $0x78] sm:$0xff] }
  0x92   : > { %4080 = vmatprep.mubr.msk.bf16.mxu1 %vm635_vm1, %v878_v45  ;;  %v2280_v18 = vld [vmem:[#allocation2 + $0x320] sm:$0xff]  ;;  %v813_v60 = vld [vmem:[#allocation2 + $0x229] sm:$0x7f]  ;;  %780 = vst.msk [vmem:[#allocation2 + $0x101] sm:$0xff] %vm635_vm1, %v5442_v19  ;;  %844 = vst.msk [vmem:[#allocation2 + $0x340] sm:$0xff] %vm635_vm1, %v812_v28  ;;  %v5487_v35 = vpack.c.bf16 %v861_v62, %v860_v63  ;;  %v1765_v63 = vsel %vm994_vm0, %v5436_v40, 0 }
  0x93   : > { %v2281_v55 = vld [vmem:[#allocation2 + $0x328] sm:$0xff]  ;;  %845 = vst.msk [vmem:[#allocation2 + $0x348] sm:$0x7f] %vm750_vm3, %v813_v60  ;;  %v862_v45 = vld [vmem:[#allocation2 + $0x80] sm:$0xff]  ;;  %v5496_v36 = vld [vmem:[%s5881_s1 + $0x10] sm:$0x3] }
  0x94   : > { %v748_v46 = vld [vmem:[#allocation2 + $0x228] sm:$0x7f]  ;;  %v5455_v54 = vpack.c.bf16 %v2281_v55, %v2280_v18  ;;  %v5491_v48 = vpack.c.bf16 %v863_v15, %v862_v45  ;;  %v5520_v18 = vpack.c.bf16 %v869_v26, %v868_v20  ;;  %v872_v28 = vld [vmem:[#allocation2 + $0xd0] sm:$0xff]  ;;  %v873_v60 = vld [vmem:[#allocation2 + $0xd8] sm:$0xff] }
  0x95   : > { %781 = vst.msk [vmem:[#allocation2 + $0x109] sm:$0x7f] %vm750_vm3, %v748_v46  ;;  %v874_v46 = vld [vmem:[#allocation2 + $0xe0] sm:$0xff]  ;;  %v876_v9 = vld [vmem:[#allocation2 + $0xf0] sm:$0xff]  ;;  %v1375_v17 = vld [vmem:[#allocation2 + $0x258] sm:$0xff] }
  0x96   : > { %v1405_v53 = vpack.c.bf16 %v1375_v17, %v1374_v61  ;;  %v4757_v15 = vld [vmem:[%s5881_s1 + $0x8] sm:$0x3]  ;;  %v2863_v61 = vld [vmem:[#allocation2 + $0x1d8] sm:$0xff]  ;;  %v2864_v17 = vld [vmem:[#allocation2 + $0x1e0] sm:$0xff] }
  0x97   : > { %4237 = vmatmul.mubr.msk.bf16.gmra.mrb[20].mxu0 %vm635_vm1, %v5425_v31  ;;  %v2282_v24 = vld [vmem:[#allocation2 + $0x330] sm:$0xff]  ;;  %v2849_v20 = vld [vmem:[#allocation2 + $0x168] sm:$0xff] }
  0x98   : > { %4240 = vmatprep.mubr.msk.bf16.mxu0 %vm635_vm1, %v5427_v33  ;;  %v2283_v16 = vld [vmem:[#allocation2 + $0x338] sm:$0xff]  ;;  %v2878_v26 = vpack.c.bf16 %v2849_v20, %v5174_v1 }
  0x99   : > { %4081 = vmatmul.mubr.msk.bf16.vlgmr.msra.gmra.mrb[0].mxu1 %vm635_vm1, %v5429_v23  ;;  %v5459_v57 = vpack.c.bf16 %v2283_v16, %v2282_v24  ;;  %v2284_v56 = vld [vmem:[#allocation2 + $0x340] sm:$0xff]  ;;  %v875_v24 = vld [vmem:[#allocation2 + $0xe8] sm:$0xff]  ;;  %v5532_v16 = vpack.c.bf16 %v873_v60, %v872_v28  ;;  %v877_v11 = vld [vmem:[#allocation2 + $0xf8] sm:$0xff] }
  0x9a   : > { %4113 = vmatpush3.bf16.msra.mxu1 %v1471_v27  ;;  %4084 = vmatprep.mubr.msk.bf16.mxu1 %vm635_vm1, %v5431_v2  ;;  %v2285_v50 = vld [vmem:[#allocation2 + $0x348] sm:$0xff]  ;;  %v5534_v49 = vpack.c.bf16 %v875_v24, %v874_v46  ;;  %v2577_v62 = vld [vmem:[#allocation2 + $0x100] sm:$0xff]  ;;  %v2859_v24 = vld [vmem:[#allocation2 + $0x1b8] sm:$0xff] }
  0x9b   : > { %4611 = vmatprep.subr.msk.bf16.mxu1 %vm994_vm0, %v5436_v40  ;;  %v5473_v39 = vpack.c.bf16 %v2285_v50, %v2284_v56  ;;  %v871_v27 = vld [vmem:[#allocation2 + $0xc8] sm:$0xff]  ;;  %v5544_v50 = vpack.c.bf16 %v877_v11, %v876_v9  ;;  %v2856_v28 = vld [vmem:[#allocation2 + $0x1a0] sm:$0xff] }
  0x9c   : > { %v5522_v55 = vpack.c.bf16 %v871_v27, %v870_v32  ;;  %v1373_v56 = vld [vmem:[#allocation2 + $0x248] sm:$0xff]  ;;  %v2851_v32 = vld [vmem:[#allocation2 + $0x178] sm:$0xff]  ;;  %v2860_v9 = vld [vmem:[#allocation2 + $0x1c0] sm:$0xff] }
  0x9d   : > { %v1404_v7 = vpack.c.bf16 %v1373_v56, %v1372_v14  ;;  %v2578_v45 = vld [vmem:[#allocation2 + $0x108] sm:$0xff] }
  0x9e   : > { %v5566_v40 = vpack.c.bf16 %v2578_v45, %v2577_v62  ;;  %v2853_v27 = vld [vmem:[#allocation2 + $0x188] sm:$0xff]  ;;  %v2866_v45 = vld [vmem:[#allocation2 + $0x1f0] sm:$0xff] }
  0x9f   : > { %4241 = vmatmul.mubr.msk.bf16.gmra.mrb[24].mxu0 %vm635_vm1, %v5455_v54  ;;  %v2857_v60 = vld [vmem:[#allocation2 + $0x1a8] sm:$0xff] }
  0xa0   : > { %4244 = vmatprep.mubr.msk.bf16.mxu0 %vm635_vm1, %v5459_v57  ;;  %v2882_v46 = vpack.c.bf16 %v2857_v60, %v2856_v28  ;;  %v2861_v11 = vld [vmem:[#allocation2 + $0x1c8] sm:$0xff] }
  0xa1   : > { %4085 = vmatmul.mubr.msk.bf16.gmra.mrb[4].mxu1 %vm635_vm1, %v5461_v43  ;;  %v5607_v56 = vpack.c.bf16 %v2861_v11, %v2860_v9 }
  0xa2   : > { %4088 = vmatprep.mubr.msk.bf16.mxu1 %vm635_vm1, %v5463_v4 }
  0xa7   : > { %4245 = vmatmul.mubr.msk.bf16.gmra.mrb[28].mxu0 %vm635_vm1, %v5473_v39 }
  0xa8   : > { %4250 = vmatprep.mubr.msk.bf16.mxu0 %vm635_vm1, %v5431_v2 }
  0xa9   : > { %4089 = vmatmul.mubr.msk.bf16.gmra.mrb[8].mxu1 %vm635_vm1, %v5475_v21 }
  0xaa   : > { %4092 = vmatprep.mubr.msk.bf16.mxu1 %vm635_vm1, %v5477_v12 }
  0xaf   : > { %4251 = vmatmul.mubr.msk.bf16.vlgmr.msra.gmra.mrb[0].mxu0 %vm635_vm1, %v5461_v43 }
  0xb0   : > { %4283 = vmatpush3.bf16.msra.mxu0 %v2943_v34  ;;  %4254 = vmatprep.mubr.msk.bf16.mxu0 %vm635_vm1, %v5463_v4  ;;  %v2579_v34 = vld [vmem:[#allocation2 + $0x110] sm:$0xff] }
  0xb1   : > { %4093 = vmatmul.mubr.msk.bf16.gmra.mrb[12].mxu1 %vm635_vm1, %v5487_v35  ;;  %4617 = vmatprep.subr.msk.bf16.mxu0 %vm994_vm0, %v5496_v36  ;;  %v2596_v47 = vpack.c.bf16 %v2580_v59, %v2579_v34  ;;  %v2873_v59 = vld [vmem:[#allocation2 + $0x228] sm:$0xff] }
  0xb2   : > { %4096 = vmatprep.mubr.msk.bf16.mxu1 %vm635_vm1, %v5491_v48 }
  0xb7   : > { %4255 = vmatmul.mubr.msk.bf16.gmra.mrb[4].mxu0 %vm635_vm1, %v5475_v21 }
  0xb8   : > { %4258 = vmatprep.mubr.msk.bf16.mxu0 %vm635_vm1, %v5477_v12 }
  0xb9   : > { %4097 = vmatmul.mubr.msk.bf16.gmra.mrb[16].mxu1 %vm635_vm1, %v5508_v38 }
  0xba   : > { %4100 = vmatprep.mubr.msk.bf16.mxu1 %vm635_vm1, %v5510_v30 }
  0xbf   : > { %4259 = vmatmul.mubr.msk.bf16.gmra.mrb[8].mxu0 %vm635_vm1, %v5487_v35 }
  0xc0   : > { %4262 = vmatprep.mubr.msk.bf16.mxu0 %vm635_vm1, %v5491_v48 }
  0xc1   : > { %4101 = vmatmul.mubr.msk.bf16.gmra.mrb[20].mxu1 %vm635_vm1, %v5520_v18 }
  0xc2   : > { %4104 = vmatprep.mubr.msk.bf16.mxu1 %vm635_vm1, %v5522_v55 }
  0xc7   : > { %4263 = vmatmul.mubr.msk.bf16.gmra.mrb[12].mxu0 %vm635_vm1, %v5508_v38 }
  0xc8   : > { %4266 = vmatprep.mubr.msk.bf16.mxu0 %vm635_vm1, %v5510_v30 }
  0xc9   : > { %4105 = vmatmul.mubr.msk.bf16.gmra.mrb[24].mxu1 %vm635_vm1, %v5532_v16 }
  0xca   : > { %4108 = vmatprep.mubr.msk.bf16.mxu1 %vm635_vm1, %v5534_v49 }
  0xcf   : > { %4267 = vmatmul.mubr.msk.bf16.gmra.mrb[16].mxu0 %vm635_vm1, %v5520_v18 }
  0xd0   : > { %4270 = vmatprep.mubr.msk.bf16.mxu0 %vm635_vm1, %v5522_v55 }
  0xd1   : > { %4109 = vmatmul.mubr.msk.bf16.gmra.mrb[28].mxu1 %vm635_vm1, %v5544_v50 }
  0xd2   : > { %4114 = vmatprep.mubr.msk.bf16.mxu1 %vm635_vm1, %v1404_v7  ;;  %v2862_v7 = vld [vmem:[#allocation2 + $0x1d0] sm:$0xff] }
  0xd7   : > { %4271 = vmatmul.mubr.msk.bf16.gmra.mrb[20].mxu0 %vm635_vm1, %v5532_v16 }
  0xd8   : > { %4274 = vmatprep.mubr.msk.bf16.mxu0 %vm635_vm1, %v5534_v49 }
  0xd9   : > { %4115 = vmatmul.mubr.msk.bf16.vlgmr.msra.gmra.mrb[0].mxu1 %vm635_vm1, %v1405_v53  ;;  %v2865_v53 = vld [vmem:[#allocation2 + $0x1e8] sm:$0xff] }
  0xda   : > { %4147 = vmatpush3.bf16.msra.mxu1 %v1765_v63  ;;  %4118 = vmatprep.mubr.msk.bf16.mxu1 %vm635_vm1, %v5310_v58  ;;  %v2845_v58 = vld [vmem:[#allocation2 + $0x148] sm:$0xff]  ;;  %v5617_v63 = vpack.c.bf16 %v2863_v61, %v2862_v7  ;;  %v5619_v62 = vpack.c.bf16 %v2865_v53, %v2864_v17 }
  0xdb   : > { %4613 = vmatprep.subr.msk.bf16.mxu1 %vm994_vm0, %v4757_v15  ;;  %v2876_v52 = vpack.c.bf16 %v2845_v58, %v5124_v25  ;;  %v2850_v25 = vld [vmem:[#allocation2 + $0x170] sm:$0xff]  ;;  %v2867_v15 = vld [vmem:[#allocation2 + $0x1f8] sm:$0xff]  ;;  %v5641_v58 = vpack.c.bf16 %v2873_v59, %v5442_v19 }
  0xdc   : > { %v5629_v34 = vpack.c.bf16 %v2867_v15, %v2866_v45  ;;  %v3142_v19 = vld [vmem:[#allocation2 + $0x278] sm:$0xff] }
  0xdf   : > { %4275 = vmatmul.mubr.msk.bf16.gmra.mrb[24].mxu0 %vm635_vm1, %v5544_v50 }
  0xe0   : > { %4278 = vmatprep.mubr.msk.bf16.mxu0 %vm635_vm1, %v5566_v40 }
  0xe1   : > { %4119 = vmatmul.mubr.msk.bf16.gmra.mrb[4].mxu1 %vm635_vm1, %v5321_v8  ;;  %v2877_v8 = vpack.c.bf16 %v2847_v5, %v5143_v42  ;;  %v2879_v42 = vpack.c.bf16 %v2851_v32, %v2850_v25  ;;  %v3144_v5 = vld [vmem:[#allocation2 + $0x288] sm:$0xff]  ;;  %v3150_v32 = vld [vmem:[#allocation2 + $0x2b8] sm:$0xff] }
  0xe2   : > { %4122 = vmatprep.mubr.msk.bf16.mxu1 %vm635_vm1, %v5350_v44  ;;  %v3238_v44 = vsel %vm994_vm0, %v5496_v36, 0  ;;  %v2855_v36 = vld [vmem:[#allocation2 + $0x198] sm:$0xff] }
  0xe7   : > { %4279 = vmatmul.mubr.msk.bf16.gmra.mrb[28].mxu0 %vm635_vm1, %v2596_v47  ;;  %v3140_v47 = vld [vmem:[#allocation2 + $0x268] sm:$0xff] }
  0xe8   : > { %4284 = vmatprep.mubr.msk.bf16.mxu0 %vm635_vm1, %v2876_v52  ;;  %v3143_v52 = vld [vmem:[#allocation2 + $0x280] sm:$0xff] }
  0xe9   : > { %4123 = vmatmul.mubr.msk.bf16.gmra.mrb[8].mxu1 %vm635_vm1, %v5356_v0  ;;  %v2852_v0 = vld [vmem:[#allocation2 + $0x180] sm:$0xff]  ;;  %v3173_v20 = vpack.c.bf16 %v3144_v5, %v3143_v52 }
  0xea   : > { %4126 = vmatprep.mubr.msk.bf16.mxu1 %vm635_vm1, %v5367_v10  ;;  %v2880_v1 = vpack.c.bf16 %v2853_v27, %v2852_v0  ;;  %v2854_v10 = vld [vmem:[#allocation2 + $0x190] sm:$0xff]  ;;  %v3151_v0 = vld [vmem:[#allocation2 + $0x2c0] sm:$0xff]  ;;  %v3152_v27 = vld [vmem:[#allocation2 + $0x2c8] sm:$0xff] }
  0xef   : > { %4285 = vmatmul.mubr.msk.bf16.vlgmr.msra.gmra.mrb[0].mxu0 %vm635_vm1, %v2877_v8  ;;  %v3146_v8 = vld [vmem:[#allocation2 + $0x298] sm:$0xff] }
  0xf0   : > { %4317 = vmatpush3.bf16.msra.mxu0 %v3238_v44  ;;  %4288 = vmatprep.mubr.msk.bf16.mxu0 %vm635_vm1, %v2878_v26  ;;  %v3147_v26 = vld [vmem:[#allocation2 + $0x2a0] sm:$0xff]  ;;  %v3148_v44 = vld [vmem:[#allocation2 + $0x2a8] sm:$0xff] }
  0xf1   : > { %4127 = vmatmul.mubr.msk.bf16.gmra.mrb[12].mxu1 %vm635_vm1, %v5372_v29  ;;  %v2881_v29 = vpack.c.bf16 %v2855_v36, %v2854_v10  ;;  %v3175_v25 = vpack.c.bf16 %v3148_v44, %v3147_v26 }
  0xf2   : > { %4130 = vmatprep.mubr.msk.bf16.mxu1 %vm635_vm1, %v5386_v6  ;;  %v2858_v6 = vld [vmem:[#allocation2 + $0x1b0] sm:$0xff] }
  0xf3   : > { %v5605_v14 = vpack.c.bf16 %v2859_v24, %v2858_v6 }
  0xf7   : > { %4289 = vmatmul.mubr.msk.bf16.gmra.mrb[4].mxu0 %vm635_vm1, %v2879_v42  ;;  %v3177_v42 = vpack.c.bf16 %v3152_v27, %v3151_v0 }
  0xf8   : > { %4292 = vmatprep.mubr.msk.bf16.mxu0 %vm635_vm1, %v2880_v1 }
  0xf9   : > { %4131 = vmatmul.mubr.msk.bf16.gmra.mrb[16].mxu1 %vm635_vm1, %v5388_v51 }
  0xfa   : > { %4134 = vmatprep.mubr.msk.bf16.mxu1 %vm635_vm1, %v5402_v22 }
  0xff   : > { %4293 = vmatmul.mubr.msk.bf16.gmra.mrb[8].mxu0 %vm635_vm1, %v2881_v29 }
 0x100   : > { %4296 = vmatprep.mubr.msk.bf16.mxu0 %vm635_vm1, %v2882_v46 }
 0x101   : > { %4135 = vmatmul.mubr.msk.bf16.gmra.mrb[20].mxu1 %vm635_vm1, %v5408_v41 }
 0x102   : > { %4138 = vmatprep.mubr.msk.bf16.mxu1 %vm635_vm1, %v5425_v31 }
 0x107   : > { %4297 = vmatmul.mubr.msk.bf16.gmra.mrb[12].mxu0 %vm635_vm1, %v5605_v14 }
 0x108   : > { %4300 = vmatprep.mubr.msk.bf16.mxu0 %vm635_vm1, %v5607_v56 }
 0x109   : > { %4139 = vmatmul.mubr.msk.bf16.gmra.mrb[24].mxu1 %vm635_vm1, %v5427_v33 }
 0x10a   : > { %4142 = vmatprep.mubr.msk.bf16.mxu1 %vm635_vm1, %v5455_v54 }
 0x10f   : > { %4301 = vmatmul.mubr.msk.bf16.gmra.mrb[16].mxu0 %vm635_vm1, %v5617_v63 }
 0x110   : > { %4304 = vmatprep.mubr.msk.bf16.mxu0 %vm635_vm1, %v5619_v62 }
 0x111   : > { %4143 = vmatmul.mubr.msk.bf16.gmra.mrb[28].mxu1 %vm635_vm1, %v5459_v57 }
 0x112   : > { %4148 = vmatprep.mubr.msk.bf16.mxu1 %vm635_vm1, %v5429_v23  ;;  %v2874_v23 = vld [vmem:[#allocation2 + $0x230] sm:$0xff] }
 0x117   : > { %4305 = vmatmul.mubr.msk.bf16.gmra.mrb[20].mxu0 %vm635_vm1, %v5629_v34 }
 0x118   : > { %4308 = vmatprep.mubr.msk.bf16.mxu0 %vm635_vm1, %v5397_v13  ;;  %v2875_v13 = vld [vmem:[#allocation2 + $0x238] sm:$0xff] }
 0x119   : > { %4149 = vmatmul.mubr.msk.bf16.vlgmr.msra.gmra.mrb[0].mxu1 %vm635_vm1, %v5431_v2  ;;  %v3139_v2 = vld [vmem:[#allocation2 + $0x260] sm:$0xff] }
 0x11a   : > { %4351 = vmatpush3.bf16.msra.mxu1 %v4815_v3  ;;  %4152 = vmatprep.mubr.msk.bf16.mxu1 %vm635_vm1, %v5461_v43  ;;  %v2891_v3 = vpack.c.bf16 %v2875_v13, %v2874_v23  ;;  %v3171_v43 = vpack.c.bf16 %v3140_v47, %v3139_v2 }
 0x11f   : > { %4309 = vmatmul.mubr.msk.bf16.gmra.mrb[24].mxu0 %vm635_vm1, %v5411_v37  ;;  %v3141_v37 = vld [vmem:[#allocation2 + $0x270] sm:$0xff] }
 0x120   : > { %4312 = vmatprep.mubr.msk.bf16.mxu0 %vm635_vm1, %v5641_v58 }
 0x121   : > { %4153 = vmatmul.mubr.msk.bf16.gmra.mrb[4].mxu1 %vm635_vm1, %v5463_v4  ;;  %v3172_v4 = vpack.c.bf16 %v3142_v19, %v3141_v37 }
 0x122   : > { %4156 = vmatprep.mubr.msk.bf16.mxu1 %vm635_vm1, %v5475_v21  ;;  %v3145_v21 = vld [vmem:[#allocation2 + $0x290] sm:$0xff] }
 0x127   : > { %4313 = vmatmul.mubr.msk.bf16.gmra.mrb[28].mxu0 %vm635_vm1, %v2891_v3 }
 0x128   : > { %4318 = vmatprep.mubr.msk.bf16.mxu0 %vm635_vm1, %v3171_v43 }
 0x129   : > { %4157 = vmatmul.mubr.msk.bf16.gmra.mrb[8].mxu1 %vm635_vm1, %v5477_v12  ;;  %v3174_v12 = vpack.c.bf16 %v3146_v8, %v3145_v21 }
 0x12a   : > { %4160 = vmatprep.mubr.msk.bf16.mxu1 %vm635_vm1, %v5487_v35  ;;  %v3149_v35 = vld [vmem:[#allocation2 + $0x2b0] sm:$0xff] }
 0x12f   : > { %4319 = vmatmul.mubr.msk.bf16.vlgmr.msra.gmra.mrb[0].mxu0 %vm635_vm1, %v3172_v4 }
 0x130   : > { %4322 = vmatprep.mubr.msk.bf16.mxu0 %vm635_vm1, %v3173_v20 }
 0x131   : > { %4161 = vmatmul.mubr.msk.bf16.gmra.mrb[12].mxu1 %vm635_vm1, %v5491_v48  ;;  %v3176_v48 = vpack.c.bf16 %v3150_v32, %v3149_v35 }
 0x132   : > { %4164 = vmatprep.mubr.msk.bf16.mxu1 %vm635_vm1, %v5508_v38 }
 0x137   : > { %4323 = vmatmul.mubr.msk.bf16.gmra.mrb[4].mxu0 %vm635_vm1, %v3174_v12 }
 0x138   : > { %4326 = vmatprep.mubr.msk.bf16.mxu0 %vm635_vm1, %v3175_v25 }
 0x139   : > { %4165 = vmatmul.mubr.msk.bf16.gmra.mrb[16].mxu1 %vm635_vm1, %v5510_v30 }
 0x13a   : > { %4168 = vmatprep.mubr.msk.bf16.mxu1 %vm635_vm1, %v5520_v18 }
 0x13f   : > { %4327 = vmatmul.mubr.msk.bf16.gmra.mrb[8].mxu0 %vm635_vm1, %v3176_v48 }
 0x140   : > { %4330 = vmatprep.mubr.msk.bf16.mxu0 %vm635_vm1, %v3177_v42 }
 0x141   : > { %4169 = vmatmul.mubr.msk.bf16.gmra.mrb[20].mxu1 %vm635_vm1, %v5522_v55 }
 0x142   : > { %4172 = vmatprep.mubr.msk.bf16.mxu1 %vm635_vm1, %v5532_v16 }
 0x147   : > { %4331 = vmatmul.mubr.msk.bf16.gmra.mrb[12].mxu0 %vm635_vm1, %v5388_v51  ;;  %v3169_v51 = vld [vmem:[#allocation2 + $0x350] sm:$0xff] }
 0x148   : > { %4334 = vmatprep.mubr.msk.bf16.mxu0 %vm635_vm1, %v5402_v22  ;;  %v3170_v22 = vld [vmem:[#allocation2 + $0x358] sm:$0xff] }
 0x149   : > { %4173 = vmatmul.mubr.msk.bf16.gmra.mrb[24].mxu1 %vm635_vm1, %v5534_v49  ;;  %v3186_v38 = vpack.c.bf16 %v3170_v22, %v3169_v51 }
 0x14a   : > { %4176 = vmatprep.mubr.msk.bf16.mxu1 %vm635_vm1, %v5544_v50 }
 0x14f   : > { %4335 = vmatmul.mubr.msk.bf16.gmra.mrb[16].mxu0 %vm635_vm1, %v5408_v41  ;;  %v1986_v41 = vld [vmem:[#allocation2 + $0x200] sm:$0xff] }
 0x150   : > { %4338 = vmatprep.mubr.msk.bf16.mxu0 %vm635_vm1, %v5425_v31  ;;  %v1987_v31 = vld [vmem:[#allocation2 + $0x208] sm:$0xff] }
 0x151   : > { %4177 = vmatmul.mubr.msk.bf16.gmra.mrb[28].mxu1 %vm635_vm1, %v5566_v40  ;;  %v2005_v30 = vpack.c.bf16 %v1987_v31, %v1986_v41 }
 0x152   : > { %4198 = vmatprep.mubr.msk.bf16.mxu1 %vm635_vm1, %v5605_v14 }
 0x157   : > { %4339 = vmatmul.mubr.msk.bf16.gmra.mrb[20].mxu0 %vm635_vm1, %v5427_v33  ;;  %v1988_v33 = vld [vmem:[#allocation2 + $0x210] sm:$0xff] }
 0x158   : > { %4342 = vmatprep.mubr.msk.bf16.mxu0 %vm635_vm1, %v5455_v54  ;;  %v1989_v54 = vld [vmem:[#allocation2 + $0x218] sm:$0xff] }
 0x159   : > { %4199 = vmatmul.mubr.msk.bf16.vlgmr.msra.gmra.mrb[16].mxu1 %vm635_vm1, %v5607_v56  ;;  %v2006_v18 = vpack.c.bf16 %v1989_v54, %v1988_v33 }
 0x15a   : > { %4202 = vmatprep.mubr.msk.bf16.mxu1 %vm635_vm1, %v5617_v63 }
 0x15f   : > { %4343 = vmatmul.mubr.msk.bf16.gmra.mrb[24].mxu0 %vm635_vm1, %v5459_v57 }
 0x160   : > { %4346 = vmatprep.mubr.msk.bf16.mxu0 %vm635_vm1, %v5473_v39 }
 0x161   : > { %4203 = vmatmul.mubr.msk.bf16.gmra.mrb[20].mxu1 %vm635_vm1, %v5619_v62 }
 0x162   : > { %4206 = vmatprep.mubr.msk.bf16.mxu1 %vm635_vm1, %v5629_v34 }
 0x167   : > { %4347 = vmatmul.mubr.msk.bf16.gmra.mrb[28].mxu0 %vm635_vm1, %v3186_v38 }
 0x169   : > { %4207 = vmatmul.mubr.msk.bf16.gmra.mrb[24].mxu1 %vm635_vm1, %v2005_v30 }
 0x16a   : > { %4210 = vmatprep.mubr.msk.bf16.mxu1 %vm635_vm1, %v2006_v18 }
 0x171   : > { %4211 = vmatmul.mubr.msk.bf16.gmra.mrb[28].mxu1 %vm635_vm1, %v5641_v58 }
 0x1ec   : > { %v4150_v57 = vpop.f32.mrb[0].mxu1 }
 0x1ed   : > { %v1801_v39 = vpop.f32.mrb[1].mxu1 }
 0x1ee   : > { %v4151_v55 = vpop.f32.mrb[2].mxu1 }
 0x1ef   : > { %v1804_v16 = vpop.f32.mrb[3].mxu1 }
 0x1f4   : > { %v4154_v49 = vpop.f32.mrb[4].mxu1 }
 0x1f5   : > { %v1817_v50 = vpop.f32.mrb[5].mxu1 }
 0x1f6   : > { %v4155_v40 = vpop.f32.mrb[6].mxu1 }
 0x1f7   : > { %v1820_v1 = vpop.f32.mrb[7].mxu1 }
 0x1fc   : > { %v5712_v10 = vpop.f32.mrb[8].mxu1 }
 0x1fd   : > { %v5714_v36 = vpop.f32.mrb[9].mxu1 }
 0x1fe   : > { %v5716_v28 = vpop.f32.mrb[10].mxu1 }
 0x1ff   : > { %v5718_v60 = vpop.f32.mrb[11].mxu1 }
 0x202   : > { %v4320_v29 = vpop.f32.mrb[0].mxu0 }
 0x203   : > { %v4352_v46 = vadd.f32 %v4320_v29, %v4150_v57  ;;  %v3274_v6 = vpop.f32.mrb[1].mxu0 }
 0x204   : > { %v5727_v24 = vpop.f32.mrb[12].mxu1  ;;  %v4353_v9 = vadd.f32 %v3274_v6, %v1801_v39  ;;  %v4321_v11 = vpop.f32.mrb[2].mxu0 }
 0x205   : > { %v5729_v14 = vpop.f32.mrb[13].mxu1  ;;  %3435 = vst.msk [vmem:[%s5725_s8 + $0x10] sm:$0xff] %vm635_vm1, %v4352_v46  ;;  %v4354_v56 = vadd.f32 %v4321_v11, %v4151_v55  ;;  %v3277_v7 = vpop.f32.mrb[3].mxu0  ;;  %v3537_v62 = vmul.f32 %v4352_v46, %v4352_v46  ;;  %v3468_v23 = vsel %vm635_vm1, %v4352_v46, 0.0 }
 0x206   : > { %v5733_v61 = vpop.f32.mrb[14].mxu1  ;;  %3433 = vst.msk [vmem:[%s5725_s8] sm:$0xff] %vm635_vm1, %v4353_v9  ;;  %v3535_v17 = vmul.f32 %v4353_v9, %v4353_v9  ;;  %v4355_v53 = vadd.f32 %v3277_v7, %v1804_v16  ;;  %v3465_v45 = vsel %vm635_vm1, %v4353_v9, 0.0 }
 0x207   : > { %v5737_v63 = vpop.f32.mrb[15].mxu1  ;;  %3436 = vst.msk [vmem:[%s5725_s8 + $0x18] sm:$0xff] %vm635_vm1, %v4354_v56  ;;  %v3538_v59 = vmul.f32 %v4354_v56, %v4354_v56  ;;  %v3570_v52 = vsel %vm635_vm1, %v3537_v62, 0.0  ;;  %v3470_v5 = vsel %vm635_vm1, %v4354_v56, 0.0 }
 0x208   : > { %3434 = vst.msk [vmem:[%s5725_s8 + $0x8] sm:$0xff] %vm635_vm1, %v4355_v53  ;;  %v3466_v15 = vsel %vm635_vm1, %v4355_v53, 0.0  ;;  %v3536_v34 = vmul.f32 %v4355_v53, %v4355_v53  ;;  %v3567_v13 = vsel %vm635_vm1, %v3535_v17, 0.0 }
 0x209   : > { %v3467_v58 = vadd.f32 %v3466_v15, %v3465_v45  ;;  %v3572_v21 = vsel %vm635_vm1, %v3538_v59, 0.0 }
 0x20a   : > { %v3568_v2 = vsel %vm635_vm1, %v3536_v34, 0.0  ;;  %v4324_v47 = vpop.f32.mrb[4].mxu0 }
 0x20b   : > { %v3469_v3 = vadd.f32 %v3468_v23, %v3467_v58  ;;  %v3569_v43 = vadd.f32 %v3568_v2, %v3567_v13  ;;  %v4356_v37 = vadd.f32 %v4324_v47, %v4154_v49  ;;  %v3290_v19 = vpop.f32.mrb[5].mxu0 }
 0x20c   : > { %v4357_v4 = vadd.f32 %v3290_v19, %v1817_v50  ;;  %v4325_v20 = vpop.f32.mrb[6].mxu0 }
 0x20d   : > { %v3571_v8 = vadd.f32 %v3570_v52, %v3569_v43  ;;  %3439 = vst.msk [vmem:[%s5725_s8 + $0x30] sm:$0xff] %vm635_vm1, %v4356_v37  ;;  %v3471_v26 = vadd.f32 %v3470_v5, %v3469_v3  ;;  %v3293_v44 = vpop.f32.mrb[7].mxu0  ;;  %v4358_v35 = vadd.f32 %v4325_v20, %v4155_v40  ;;  %v3541_v51 = vmul.f32 %v4356_v37, %v4356_v37 }
 0x20e   : > { %3437 = vst.msk [vmem:[%s5725_s8 + $0x20] sm:$0xff] %vm635_vm1, %v4357_v4  ;;  %v3472_v12 = vsel %vm635_vm1, %v4357_v4, 0.0  ;;  %v3539_v25 = vmul.f32 %v4357_v4, %v4357_v4  ;;  %v4359_v32 = vadd.f32 %v3293_v44, %v1820_v1  ;;  %v3476_v33 = vsel %vm635_vm1, %v4356_v37, 0.0 }
 0x20f   : > { %v3473_v0 = vadd.f32 %v3472_v12, %v3471_v26  ;;  %v3573_v27 = vadd.f32 %v3572_v21, %v3571_v8  ;;  %3440 = vst.msk [vmem:[%s5725_s8 + $0x38] sm:$0xff] %vm635_vm1, %v4358_v35  ;;  %v3542_v38 = vmul.f32 %v4358_v35, %v4358_v35  ;;  %v3478_v55 = vsel %vm635_vm1, %v4358_v35, 0.0 }
 0x210   : > { %v3574_v48 = vsel %vm635_vm1, %v3539_v25, 0.0  ;;  %3438 = vst.msk [vmem:[%s5725_s8 + $0x28] sm:$0xff] %vm635_vm1, %v4359_v32  ;;  %v3474_v42 = vsel %vm635_vm1, %v4359_v32, 0.0  ;;  %v3540_v31 = vmul.f32 %v4359_v32, %v4359_v32  ;;  %v3578_v40 = vsel %vm635_vm1, %v3541_v51, 0.0 }
 0x211   : > { %v3575_v22 = vadd.f32 %v3574_v48, %v3573_v27  ;;  %v3475_v41 = vadd.f32 %v3474_v42, %v3473_v0 }
 0x212   : > { %v4328_v54 = vpop.f32.mrb[8].mxu0  ;;  %v3576_v18 = vsel %vm635_vm1, %v3540_v31, 0.0 }
 0x213   : > { %v3477_v30 = vadd.f32 %v3476_v33, %v3475_v41  ;;  %v4360_v57 = vadd.f32 %v4328_v54, %v5712_v10  ;;  %v3306_v39 = vpop.f32.mrb[9].mxu0  ;;  %v3577_v16 = vadd.f32 %v3576_v18, %v3575_v22 }
 0x214   : > { %v4361_v49 = vadd.f32 %v3306_v39, %v5714_v36  ;;  %v4329_v50 = vpop.f32.mrb[10].mxu0  ;;  %v3580_v36 = vsel %vm635_vm1, %v3542_v38, 0.0 }
 0x215   : > { %3443 = vst.msk [vmem:[%s5725_s8 + $0x50] sm:$0xff] %vm635_vm1, %v4360_v57  ;;  %v3479_v1 = vadd.f32 %v3478_v55, %v3477_v30  ;;  %v4362_v29 = vadd.f32 %v4329_v50, %v5716_v28  ;;  %v3309_v46 = vpop.f32.mrb[11].mxu0  ;;  %v3579_v6 = vadd.f32 %v3578_v40, %v3577_v16  ;;  %v3545_v62 = vmul.f32 %v4360_v57, %v4360_v57 }
 0x216   : > { %3441 = vst.msk [vmem:[%s5725_s8 + $0x40] sm:$0xff] %vm635_vm1, %v4361_v49  ;;  %v3480_v10 = vsel %vm635_vm1, %v4361_v49, 0.0  ;;  %v3543_v9 = vmul.f32 %v4361_v49, %v4361_v49  ;;  %v4363_v11 = vadd.f32 %v3309_v46, %v5718_v60  ;;  %v3484_v15 = vsel %vm635_vm1, %v4360_v57, 0.0 }
 0x217   : > { %v3481_v56 = vadd.f32 %v3480_v10, %v3479_v1  ;;  %3444 = vst.msk [vmem:[%s5725_s8 + $0x58] sm:$0xff] %vm635_vm1, %v4362_v29  ;;  %v3581_v7 = vadd.f32 %v3580_v36, %v3579_v6  ;;  %v3546_v58 = vmul.f32 %v4362_v29, %v4362_v29  ;;  %v3486_v47 = vsel %vm635_vm1, %v4362_v29, 0.0 }
 0x218   : > { %v3582_v17 = vsel %vm635_vm1, %v3543_v9, 0.0  ;;  %3442 = vst.msk [vmem:[%s5725_s8 + $0x48] sm:$0xff] %vm635_vm1, %v4363_v11  ;;  %v3482_v28 = vsel %vm635_vm1, %v4363_v11, 0.0  ;;  %v3544_v53 = vmul.f32 %v4363_v11, %v4363_v11  ;;  %v3586_v19 = vsel %vm635_vm1, %v3545_v62, 0.0 }
 0x219   : > { %v3483_v45 = vadd.f32 %v3482_v28, %v3481_v56  ;;  %v3583_v34 = vadd.f32 %v3582_v17, %v3581_v7 }
 0x21a   : > { %v3584_v60 = vsel %vm635_vm1, %v3544_v53, 0.0  ;;  %v4332_v59 = vpop.f32.mrb[12].mxu0 }
 0x21b   : > { %v3485_v23 = vadd.f32 %v3484_v15, %v3483_v45  ;;  %v4364_v13 = vadd.f32 %v4332_v59, %v5727_v24  ;;  %v3322_v2 = vpop.f32.mrb[13].mxu0  ;;  %v3585_v3 = vadd.f32 %v3584_v60, %v3583_v34 }
 0x21c   : > { %v4365_v43 = vadd.f32 %v3322_v2, %v5729_v14  ;;  %v4333_v37 = vpop.f32.mrb[14].mxu0  ;;  %v3588_v14 = vsel %vm635_vm1, %v3546_v58, 0.0 }
 0x21d   : > { %3447 = vst.msk [vmem:[%s5725_s8 + $0x70] sm:$0xff] %vm635_vm1, %v4364_v13  ;;  %v3487_v52 = vadd.f32 %v3486_v47, %v3485_v23  ;;  %v4366_v5 = vadd.f32 %v4333_v37, %v5733_v61  ;;  %v3325_v4 = vpop.f32.mrb[15].mxu0  ;;  %v3587_v20 = vadd.f32 %v3586_v19, %v3585_v3  ;;  %v3549_v35 = vmul.f32 %v4364_v13, %v4364_v13 }
 0x21e   : > { %3445 = vst.msk [vmem:[%s5725_s8 + $0x60] sm:$0xff] %vm635_vm1, %v4365_v43  ;;  %v3488_v24 = vsel %vm635_vm1, %v4365_v43, 0.0  ;;  %v3547_v21 = vmul.f32 %v4365_v43, %v4365_v43  ;;  %v4367_v8 = vadd.f32 %v3325_v4, %v5737_v63  ;;  %v3492_v0 = vsel %vm635_vm1, %v4364_v13, 0.0 }
 0x21f   : > { %v3489_v26 = vadd.f32 %v3488_v24, %v3487_v52  ;;  %3448 = vst.msk [vmem:[%s5725_s8 + $0x78] sm:$0xff] %vm635_vm1, %v4366_v5  ;;  %v3589_v44 = vadd.f32 %v3588_v14, %v3587_v20  ;;  %v3550_v42 = vmul.f32 %v4366_v5, %v4366_v5  ;;  %v3494_v41 = vsel %vm635_vm1, %v4366_v5, 0.0 }
 0x220   : > { %v3590_v12 = vsel %vm635_vm1, %v3547_v21, 0.0  ;;  %3446 = vst.msk [vmem:[%s5725_s8 + $0x68] sm:$0xff] %vm635_vm1, %v4367_v8  ;;  %v3490_v61 = vsel %vm635_vm1, %v4367_v8, 0.0  ;;  %v3548_v25 = vmul.f32 %v4367_v8, %v4367_v8  ;;  %v3594_v54 = vsel %vm635_vm1, %v3549_v35, 0.0 }
 0x221   : > { %v3491_v32 = vadd.f32 %v3490_v61, %v3489_v26  ;;  %v3591_v27 = vadd.f32 %v3590_v12, %v3589_v44  ;;  %v3596_v57 = vsel %vm635_vm1, %v3550_v42, 0.0 }
 0x222   : > { %v3592_v63 = vsel %vm635_vm1, %v3548_v25, 0.0  ;;  %v4336_v48 = vpop.f32.mrb[16].mxu0 }
 0x223   : > { %v3493_v51 = vadd.f32 %v3492_v0, %v3491_v32  ;;  %v3338_v22 = vpop.f32.mrb[17].mxu0  ;;  %v3593_v31 = vadd.f32 %v3592_v63, %v3591_v27 }
 0x224   : > { %v4337_v33 = vpop.f32.mrb[18].mxu0 }
 0x225   : > { %v3495_v38 = vadd.f32 %v3494_v41, %v3493_v51  ;;  %v3341_v30 = vpop.f32.mrb[19].mxu0  ;;  %v3595_v18 = vadd.f32 %v3594_v54, %v3593_v31 }
 0x227   : > { %v3597_v39 = vadd.f32 %v3596_v57, %v3595_v18 }
 0x22a   : > { %v4340_v55 = vpop.f32.mrb[20].mxu0 }
 0x22b   : > { %v3354_v16 = vpop.f32.mrb[21].mxu0 }
 0x22c   : > { %v4200_v49 = vpop.f32.mrb[16].mxu1  ;;  %v4341_v50 = vpop.f32.mrb[22].mxu0 }
 0x22d   : > { %v2159_v40 = vpop.f32.mrb[17].mxu1  ;;  %v4368_v1 = vadd.f32 %v4336_v48, %v4200_v49  ;;  %v3357_v29 = vpop.f32.mrb[23].mxu0 }
 0x22e   : > { %v4201_v46 = vpop.f32.mrb[18].mxu1  ;;  %v4369_v6 = vadd.f32 %v3338_v22, %v2159_v40 }
 0x22f   : > { %3451 = vst.msk [vmem:[%s5725_s8 + $0x90] sm:$0xff] %vm635_vm1, %v4368_v1  ;;  %v2162_v10 = vpop.f32.mrb[19].mxu1  ;;  %v4370_v9 = vadd.f32 %v4337_v33, %v4201_v46  ;;  %v3553_v17 = vmul.f32 %v4368_v1, %v4368_v1  ;;  %v3500_v58 = vsel %vm635_vm1, %v4368_v1, 0.0 }
 0x230   : > { %3449 = vst.msk [vmem:[%s5725_s8 + $0x80] sm:$0xff] %vm635_vm1, %v4369_v6  ;;  %v3496_v11 = vsel %vm635_vm1, %v4369_v6, 0.0  ;;  %v3551_v36 = vmul.f32 %v4369_v6, %v4369_v6  ;;  %v4371_v56 = vadd.f32 %v3341_v30, %v2162_v10 }
 0x231   : > { %v3497_v7 = vadd.f32 %v3496_v11, %v3495_v38  ;;  %3452 = vst.msk [vmem:[%s5725_s8 + $0x98] sm:$0xff] %vm635_vm1, %v4370_v9  ;;  %v3554_v34 = vmul.f32 %v4370_v9, %v4370_v9  ;;  %v3602_v52 = vsel %vm635_vm1, %v3553_v17, 0.0  ;;  %v3502_v5 = vsel %vm635_vm1, %v4370_v9, 0.0 }
 0x232   : > { %v3598_v28 = vsel %vm635_vm1, %v3551_v36, 0.0  ;;  %3450 = vst.msk [vmem:[%s5725_s8 + $0x88] sm:$0xff] %vm635_vm1, %v4371_v56  ;;  %v3498_v53 = vsel %vm635_vm1, %v4371_v56, 0.0  ;;  %v3552_v62 = vmul.f32 %v4371_v56, %v4371_v56  ;;  %v4344_v45 = vpop.f32.mrb[24].mxu0 }
 0x233   : > { %v3599_v15 = vadd.f32 %v3598_v28, %v3597_v39  ;;  %v3499_v60 = vadd.f32 %v3498_v53, %v3497_v7  ;;  %v3370_v59 = vpop.f32.mrb[25].mxu0  ;;  %v3604_v24 = vsel %vm635_vm1, %v3554_v34, 0.0 }
 0x234   : > { %v3600_v23 = vsel %vm635_vm1, %v3552_v62, 0.0  ;;  %v4204_v13 = vpop.f32.mrb[20].mxu1  ;;  %v4345_v2 = vpop.f32.mrb[26].mxu0 }
 0x235   : > { %v3501_v47 = vadd.f32 %v3500_v58, %v3499_v60  ;;  %v3601_v3 = vadd.f32 %v3600_v23, %v3599_v15  ;;  %v2175_v43 = vpop.f32.mrb[21].mxu1  ;;  %v4372_v37 = vadd.f32 %v4340_v55, %v4204_v13  ;;  %v3373_v19 = vpop.f32.mrb[27].mxu0 }
 0x236   : > { %v4205_v4 = vpop.f32.mrb[22].mxu1  ;;  %v4373_v20 = vadd.f32 %v3354_v16, %v2175_v43 }
 0x237   : > { %v3603_v21 = vadd.f32 %v3602_v52, %v3601_v3  ;;  %3455 = vst.msk [vmem:[%s5725_s8 + $0xb0] sm:$0xff] %vm635_vm1, %v4372_v37  ;;  %v3503_v8 = vadd.f32 %v3502_v5, %v3501_v47  ;;  %v2178_v14 = vpop.f32.mrb[23].mxu1  ;;  %v4374_v12 = vadd.f32 %v4341_v50, %v4205_v4  ;;  %v3557_v63 = vmul.f32 %v4372_v37, %v4372_v37 }
 0x238   : > { %3453 = vst.msk [vmem:[%s5725_s8 + $0xa0] sm:$0xff] %vm635_vm1, %v4373_v20  ;;  %v3504_v26 = vsel %vm635_vm1, %v4373_v20, 0.0  ;;  %v3555_v44 = vmul.f32 %v4373_v20, %v4373_v20  ;;  %v4375_v61 = vadd.f32 %v3357_v29, %v2178_v14  ;;  %v3508_v41 = vsel %vm635_vm1, %v4372_v37, 0.0 }
 0x239   : > { %v3505_v25 = vadd.f32 %v3504_v26, %v3503_v8  ;;  %v3605_v35 = vadd.f32 %v3604_v24, %v3603_v21  ;;  %3456 = vst.msk [vmem:[%s5725_s8 + $0xb8] sm:$0xff] %vm635_vm1, %v4374_v12  ;;  %v3558_v54 = vmul.f32 %v4374_v12, %v4374_v12  ;;  %v3510_v55 = vsel %vm635_vm1, %v4374_v12, 0.0 }
 0x23a   : > { %v3606_v32 = vsel %vm635_vm1, %v3555_v44, 0.0  ;;  %3454 = vst.msk [vmem:[%s5725_s8 + $0xa8] sm:$0xff] %vm635_vm1, %v4375_v61  ;;  %v3506_v0 = vsel %vm635_vm1, %v4375_v61, 0.0  ;;  %v4348_v27 = vpop.f32.mrb[28].mxu0  ;;  %v3556_v51 = vmul.f32 %v4375_v61, %v4375_v61  ;;  %v3610_v40 = vsel %vm635_vm1, %v3557_v63, 0.0 }
 0x23b   : > { %v3607_v48 = vadd.f32 %v3606_v32, %v3605_v35  ;;  %v3507_v42 = vadd.f32 %v3506_v0, %v3505_v25  ;;  %v3386_v22 = vpop.f32.mrb[29].mxu0  ;;  %v3612_v36 = vsel %vm635_vm1, %v3558_v54, 0.0 }
 0x23c   : > { %v4208_v31 = vpop.f32.mrb[24].mxu1  ;;  %v4349_v33 = vpop.f32.mrb[30].mxu0  ;;  %v3608_v30 = vsel %vm635_vm1, %v3556_v51, 0.0 }
 0x23d   : > { %v3509_v38 = vadd.f32 %v3508_v41, %v3507_v42  ;;  %v2191_v18 = vpop.f32.mrb[25].mxu1  ;;  %v4376_v57 = vadd.f32 %v4344_v45, %v4208_v31  ;;  %v3389_v39 = vpop.f32.mrb[31].mxu0  ;;  %v3609_v16 = vadd.f32 %v3608_v30, %v3607_v48 }
 0x23e   : > { %v4209_v49 = vpop.f32.mrb[26].mxu1  ;;  %v4377_v50 = vadd.f32 %v3370_v59, %v2191_v18 }
 0x23f   : > { %3459 = vst.msk [vmem:[%s5725_s8 + $0xd0] sm:$0xff] %vm635_vm1, %v4376_v57  ;;  %v3511_v1 = vadd.f32 %v3510_v55, %v3509_v38  ;;  %v2194_v29 = vpop.f32.mrb[27].mxu1  ;;  %v4378_v46 = vadd.f32 %v4345_v2, %v4209_v49  ;;  %v3611_v6 = vadd.f32 %v3610_v40, %v3609_v16  ;;  %v3561_v62 = vmul.f32 %v4376_v57, %v4376_v57 }
 0x240   : > { %3457 = vst.msk [vmem:[%s5725_s8 + $0xc0] sm:$0xff] %vm635_vm1, %v4377_v50  ;;  %v3512_v10 = vsel %vm635_vm1, %v4377_v50, 0.0  ;;  %v3559_v9 = vmul.f32 %v4377_v50, %v4377_v50  ;;  %v4379_v11 = vadd.f32 %v3373_v19, %v2194_v29  ;;  %v3516_v15 = vsel %vm635_vm1, %v4376_v57, 0.0 }
 0x241   : > { %v3513_v56 = vadd.f32 %v3512_v10, %v3511_v1  ;;  %3460 = vst.msk [vmem:[%s5725_s8 + $0xd8] sm:$0xff] %vm635_vm1, %v4378_v46  ;;  %v3613_v7 = vadd.f32 %v3612_v36, %v3611_v6  ;;  %v3562_v58 = vmul.f32 %v4378_v46, %v4378_v46  ;;  %v3518_v47 = vsel %vm635_vm1, %v4378_v46, 0.0 }
 0x242   : > { %v3614_v17 = vsel %vm635_vm1, %v3559_v9, 0.0  ;;  %3458 = vst.msk [vmem:[%s5725_s8 + $0xc8] sm:$0xff] %vm635_vm1, %v4379_v11  ;;  %v3514_v28 = vsel %vm635_vm1, %v4379_v11, 0.0  ;;  %v3560_v53 = vmul.f32 %v4379_v11, %v4379_v11  ;;  %v3618_v19 = vsel %vm635_vm1, %v3561_v62, 0.0 }
 0x243   : > { %v3515_v45 = vadd.f32 %v3514_v28, %v3513_v56  ;;  %v3615_v34 = vadd.f32 %v3614_v17, %v3613_v7  ;;  %v3620_v14 = vsel %vm635_vm1, %v3562_v58, 0.0 }
 0x244   : > { %v3616_v60 = vsel %vm635_vm1, %v3560_v53, 0.0  ;;  %v4212_v59 = vpop.f32.mrb[28].mxu1 }
 0x245   : > { %v3517_v23 = vadd.f32 %v3516_v15, %v3515_v45  ;;  %v2207_v13 = vpop.f32.mrb[29].mxu1  ;;  %v4380_v2 = vadd.f32 %v4348_v27, %v4212_v59  ;;  %v3617_v3 = vadd.f32 %v3616_v60, %v3615_v34 }
 0x246   : > { %v4213_v43 = vpop.f32.mrb[30].mxu1  ;;  %v4381_v37 = vadd.f32 %v3386_v22, %v2207_v13 }
 0x247   : > { %3463 = vst.msk [vmem:[%s5725_s8 + $0xf0] sm:$0xff] %vm635_vm1, %v4380_v2  ;;  %v3519_v52 = vadd.f32 %v3518_v47, %v3517_v23  ;;  %v2210_v5 = vpop.f32.mrb[31].mxu1  ;;  %v4382_v4 = vadd.f32 %v4349_v33, %v4213_v43  ;;  %v3619_v20 = vadd.f32 %v3618_v19, %v3617_v3  ;;  %v3565_v35 = vmul.f32 %v4380_v2, %v4380_v2 }
 0x248   : > { %3461 = vst.msk [vmem:[%s5725_s8 + $0xe0] sm:$0xff] %vm635_vm1, %v4381_v37  ;;  %v3520_v24 = vsel %vm635_vm1, %v4381_v37, 0.0  ;;  %v3563_v21 = vmul.f32 %v4381_v37, %v4381_v37  ;;  %v4383_v8 = vadd.f32 %v3389_v39, %v2210_v5  ;;  %v3524_v0 = vsel %vm635_vm1, %v4380_v2, 0.0 }
 0x249   : > { %v3521_v26 = vadd.f32 %v3520_v24, %v3519_v52  ;;  %3464 = vst.msk [vmem:[%s5725_s8 + $0xf8] sm:$0xff] %vm635_vm1, %v4382_v4  ;;  %v3621_v44 = vadd.f32 %v3620_v14, %v3619_v20  ;;  %v3566_v48 = vmul.f32 %v4382_v4, %v4382_v4  ;;  %v3526_v51 = vsel %vm635_vm1, %v4382_v4, 0.0 }
 0x24a   : > { %v3622_v12 = vsel %vm635_vm1, %v3563_v21, 0.0  ;;  %3462 = vst.msk [vmem:[%s5725_s8 + $0xe8] sm:$0xff] %vm635_vm1, %v4383_v8  ;;  %v3522_v61 = vsel %vm635_vm1, %v4383_v8, 0.0  ;;  %v3564_v25 = vmul.f32 %v4383_v8, %v4383_v8  ;;  %v3626_v41 = vsel %vm635_vm1, %v3565_v35, 0.0 }
 0x24b   : > { %v3523_v32 = vadd.f32 %v3522_v61, %v3521_v26  ;;  %v3623_v27 = vadd.f32 %v3622_v12, %v3621_v44  ;;  %v3628_v54 = vsel %vm635_vm1, %v3566_v48, 0.0 }
 0x24c   : > { %v3624_v63 = vsel %vm635_vm1, %v3564_v25, 0.0 }
 0x24d   : > { %v3525_v42 = vadd.f32 %v3524_v0, %v3523_v32  ;;  %v3625_v22 = vadd.f32 %v3624_v63, %v3623_v27 }
 0x24f   : > { %v3527_v31 = vadd.f32 %v3526_v51, %v3525_v42  ;;  %v3627_v33 = vadd.f32 %v3626_v41, %v3625_v22 }
 0x251   : > { %v3528_v38 = vrot.slane %v3527_v31, 4  ;;  %v3629_v30 = vadd.f32 %v3628_v54, %v3627_v33 }
 0x253   : > { %v3529_v18 = vadd.f32 %v3528_v38, %v3527_v31  ;;  %v3630_v57 = vrot.slane %v3629_v30, 4 }
 0x255   : > { %v3530_v39 = vrot.slane %v3529_v18, 2  ;;  %v3631_v55 = vadd.f32 %v3630_v57, %v3629_v30 }
 0x257   : > { %v3531_v16 = vadd.f32 %v3530_v39, %v3529_v18  ;;  %v3632_v49 = vrot.slane %v3631_v55, 2 }
 0x259   : > { %v3532_v50 = vrot.slane %v3531_v16, 1  ;;  %v3633_v40 = vadd.f32 %v3632_v49, %v3631_v55 }
 0x25b   : > { %v3533_v1 = vadd.f32 %v3532_v50, %v3531_v16  ;;  %v3634_v29 = vrot.slane %v3633_v40, 1 }
 0x25d   : > { %3534 = vst.msk [vmem:[%s235_s11] sm:$0x1] %vm650_vm2, %v3533_v1  ;;  %v3635_v46 = vadd.f32 %v3634_v29, %v3633_v40 }
 0x25f   : > { %3636 = vst.msk [vmem:[%s235_s11 + $0x1] sm:$0x1] %vm650_vm2, %v3635_v46 }
 0x260 PF: > { %s16_s18 = sadd.s32 1, %s4764_s18  }
 0x261   : > { %p13_p4 = scmp.ge.s32.totalorder %s16_s18, 4  }
 0x263   :  { %15 = sbr.rel (!%p13_p4) target bundleno = 1 (0x1), region = 95 }

</bundles_post_ra>
